<compile_context>
chip_gen: v5e
topology: v5e:2x2
jax: 0.10.0
libtpu: 0.0.40
codegen_flags: <defaults>
</compile_context>

<pallas_src>
import functools

import jax
import jax.numpy as jnp
from jax import lax
from jax.experimental import pallas as pl
from jax.experimental.pallas import tpu as pltpu


# ----------------------------------------------------------------------------
# Kernel: per grid step, space-to-depth a tile of TBC images via thin matmuls.
# ----------------------------------------------------------------------------
def _pixel_stack_kernel(x_ref, o_ref, *, scale, precision):
    # x_ref: (TBC, H, W) input image tile
    # o_ref: (TBC, s*s, Hq, Wq) output tile (channel-phase major, matches NCHW out)
    tbc, H, W = x_ref.shape
    s = scale
    Hq, Wq = H // s, W // s
    cdt = x_ref.dtype

    # Thin per-phase 0/1 selection matrices, generated on the VPU once per grid
    # step (replaces the old O((H*W)^2) permutation constant entirely):
    #   pht[i][hq, h] = 1 iff h == hq*s + i        (row gather,   shape (Hq, H))
    #   pw [j][w, wq] = 1 iff w == wq*s + j        (col gather,   shape (W, Wq))
    h_ids = lax.broadcasted_iota(jnp.int32, (Hq, H), 1)
    hq_ids = lax.broadcasted_iota(jnp.int32, (Hq, H), 0)
    w_ids = lax.broadcasted_iota(jnp.int32, (W, Wq), 0)
    wq_ids = lax.broadcasted_iota(jnp.int32, (W, Wq), 1)
    phts = [(h_ids == hq_ids * s + i).astype(cdt) for i in range(s)]
    pws = [(w_ids == wq_ids * s + j).astype(cdt) for j in range(s)]

    # Static unroll: tbc is kept small by the wrapper, s is tiny (2 or 4).
    for b in range(tbc):
        xb = x_ref[b]                                              # (H, W)
        for i in range(s):
            # Row-phase gather first -> (Hq, W); exact (single 1.0 per row).
            ti = jnp.dot(phts[i], xb, precision=precision,
                         preferred_element_type=jnp.float32).astype(cdt)
            for j in range(s):
                # Column-phase gather -> (Hq, Wq); exact (single 1.0 per col).
                oij = jnp.dot(ti, pws[j], precision=precision,
                              preferred_element_type=jnp.float32)
                o_ref[b, i * s + j, :, :] = oij.astype(o_ref.dtype)


def _round_up(a, m):
    return (a + m - 1) // m * m


# ----------------------------------------------------------------------------
# Wrapper
# ----------------------------------------------------------------------------
def pixel_stack(x, scale):
    """PixelStack.forward: (B, C, H, W) -> (B, C*scale^2, H/scale, W/scale)."""
    s = int(scale)
    assert s >= 1, "scale factor must be a positive int"
    if s == 1:
        return x

    B, C, H, W = x.shape
    assert H % s == 0 and W % s == 0, f"{(H, W)} must be an integral multiple of scale"
    Hq, Wq = H // s, W // s
    rows = B * C

    # Dtype / precision policy (exactness of the 0/1-selection matmuls).
    orig_dtype = x.dtype
    if orig_dtype == jnp.bfloat16:
        precision, xk = lax.Precision.DEFAULT, x          # single MXU pass, exact
    elif orig_dtype == jnp.float32:
        precision, xk = lax.Precision.HIGHEST, x          # multi-pass, bit-exact f32
    else:
        # TODO(synk): int32/int64 with |x| >= 2**24 would need a non-MXU copy path
        # (v7x MXU has no integer datapath); small ints / fp16 round-trip exactly.
        precision, xk = lax.Precision.HIGHEST, x.astype(jnp.float32)

    x3 = xk.reshape(rows, H, W)                           # free reshape of contiguous NCHW
    itemsize = x3.dtype.itemsize

    # --- tile selection: few, large grid steps (perf feedback #1) -------------
    image_bytes = H * W * itemsize
    target_bytes = 512 * 1024                             # aim >= ~0.5 MiB input per step
    tbc = max(1, min(rows, 16, target_bytes // max(image_bytes, 1)))

    def _blocks_bytes(t):                                 # double-buffered in + out blocks
        in_blk = t * H * W * itemsize
        out_blk = t * s * s * _round_up(Hq, 8) * _round_up(Wq, 128) * itemsize
        return 2 * in_blk + 2 * out_blk

    while tbc > 1 and _blocks_bytes(tbc) > 24 * 1024 * 1024:
        tbc -= 1
    while rows % tbc != 0:                                # keep the grid un-ragged
        tbc -= 1
    grid = (rows // tbc,)

    # --- generation-aware VMEM limit (perf feedback #4) -----------------------
    try:
        vmem_cap = int(pltpu.get_tpu_info().vmem_capacity_bytes)
    except Exception:
        vmem_cap = 64 * 1024 * 1024                       # v7x physical = safe lower bound
    vmem_limit = min(vmem_cap * 3 // 4,
                     max(64 * 1024 * 1024, _blocks_bytes(tbc) + (4 << 20)))

    flops_per_image = s * 2 * Hq * H * W + s * s * 2 * Hq * W * Wq
    cost = pl.CostEstimate(
        flops=rows * flops_per_image,
        transcendentals=0,
        bytes_accessed=2 * rows * H * W * itemsize,
    )

    kern = functools.partial(_pixel_stack_kernel, scale=s, precision=precision)

    out3 = pl.pallas_call(
        kern,
        out_shape=jax.ShapeDtypeStruct((rows, s * s, Hq, Wq), x3.dtype),
        grid=grid,
        in_specs=[pl.BlockSpec((tbc, H, W), lambda r: (r, 0, 0))],
        out_specs=pl.BlockSpec((tbc, s * s, Hq, Wq), lambda r: (r, 0, 0, 0)),
        compiler_params=pltpu.CompilerParams(
            dimension_semantics=("parallel",),
            vmem_limit_bytes=int(vmem_limit),
        ),
        cost_estimate=cost,
    )(x3)

    # Memory order of out3 is (b, c, i, j, hq, wq) == PyTorch output order.
    out = out3.reshape(B, C * s * s, Hq, Wq)              # free reshape (contiguous)
    if out.dtype != orig_dtype:
        out = out.astype(orig_dtype)
    return out


# ----------------------------------------------------------------------------
# Pure-JAX reference (mirrors the PyTorch view/permute/view exactly)
# ----------------------------------------------------------------------------
def pixel_stack_ref(x, scale):
    if scale == 1:
        return x
    B, C, H, W = x.shape
    s = scale
    x6 = x.reshape(B, C, H // s, s, W // s, s)
    x6 = jnp.transpose(x6, (0, 1, 3, 5, 2, 4))
    return x6.reshape(B, C * s * s, H // s, W // s)


if __name__ == "__main__":
    key = jax.random.PRNGKey(0)
    B, C, H, W, scale = 2, 4, 16, 16, 2

    x = jax.random.normal(key, (B, C, H, W), jnp.float32)

    fn = jax.jit(pixel_stack, static_argnums=1)
    out = jax.block_until_ready(fn(x, scale))

    assert out.shape == (B, C * scale ** 2, H // scale, W // scale), out.shape
    assert bool(jnp.isfinite(out).all())
    ref = pixel_stack_ref(x, scale)
    max_err = float(jnp.max(jnp.abs(out - ref)))
    assert jnp.allclose(out, ref, atol=1e-6, rtol=1e-6), f"max abs err {max_err}"

    # Secondary check: bf16 input, more channels (multi-step grid), same scale.
    x2 = jax.random.normal(jax.random.PRNGKey(1), (2, 16, 16, 16),
                           jnp.float32).astype(jnp.bfloat16)
    out2 = jax.block_until_ready(fn(x2, 2))
    ref2 = pixel_stack_ref(x2, 2)
    assert out2.shape == ref2.shape and bool(jnp.array_equal(out2, ref2))

    print("KERNEL_OK")
</pallas_src>

<mosaic_0001>
module attributes {stable_mosaic.version = 11 : i64} {
  func.func @_pixel_stack_kernel(%arg0: i32, %arg1: memref<8x16x16xf32, #tpu.memory_space<vmem>>, %arg2: memref<8x4x8x8xf32, #tpu.memory_space<vmem>>) attributes {dimension_semantics = [#tpu.dimension_semantics<parallel>], iteration_bounds = array<i64: 1>, scalar_prefetch = 0 : i64, scratch_operands = 0 : i64, tpu.core_type = #tpu.core_type<tc>, window_params = [{transform_indices = @transform_0, window_bounds = array<i64: 8, 16, 16>}, {transform_indices = @transform_1, window_bounds = array<i64: 8, 4, 8, 8>}]} {
    %0 = tpu.iota {dimensions = array<i32: 1>} : vector<8x16xi32>
    %1 = tpu.iota {dimensions = array<i32: 0>} : vector<8x16xi32>
    %2 = tpu.iota {dimensions = array<i32: 0>} : vector<16x8xi32>
    %3 = tpu.iota {dimensions = array<i32: 1>} : vector<16x8xi32>
    %c2_i32 = arith.constant 2 : i32
    %4 = vector.broadcast %c2_i32 : i32 to vector<8x16xi32>
    %5 = arith.muli %1, %4 : vector<8x16xi32>
    %c0_i32 = arith.constant 0 : i32
    %6 = vector.broadcast %c0_i32 : i32 to vector<8x16xi32>
    %7 = arith.addi %5, %6 : vector<8x16xi32>
    %8 = arith.cmpi eq, %0, %7 : vector<8x16xi32>
    %9 = arith.extui %8 : vector<8x16xi1> to vector<8x16xi32>
    %10 = arith.sitofp %9 : vector<8x16xi32> to vector<8x16xf32>
    %c2_i32_0 = arith.constant 2 : i32
    %11 = vector.broadcast %c2_i32_0 : i32 to vector<8x16xi32>
    %12 = arith.muli %1, %11 : vector<8x16xi32>
    %c1_i32 = arith.constant 1 : i32
    %13 = vector.broadcast %c1_i32 : i32 to vector<8x16xi32>
    %14 = arith.addi %12, %13 : vector<8x16xi32>
    %15 = arith.cmpi eq, %0, %14 : vector<8x16xi32>
    %16 = arith.extui %15 : vector<8x16xi1> to vector<8x16xi32>
    %17 = arith.sitofp %16 : vector<8x16xi32> to vector<8x16xf32>
    %c2_i32_1 = arith.constant 2 : i32
    %18 = vector.broadcast %c2_i32_1 : i32 to vector<16x8xi32>
    %19 = arith.muli %3, %18 : vector<16x8xi32>
    %c0_i32_2 = arith.constant 0 : i32
    %20 = vector.broadcast %c0_i32_2 : i32 to vector<16x8xi32>
    %21 = arith.addi %19, %20 : vector<16x8xi32>
    %22 = arith.cmpi eq, %2, %21 : vector<16x8xi32>
    %23 = arith.extui %22 : vector<16x8xi1> to vector<16x8xi32>
    %24 = arith.sitofp %23 : vector<16x8xi32> to vector<16x8xf32>
    %c2_i32_3 = arith.constant 2 : i32
    %25 = vector.broadcast %c2_i32_3 : i32 to vector<16x8xi32>
    %26 = arith.muli %3, %25 : vector<16x8xi32>
    %c1_i32_4 = arith.constant 1 : i32
    %27 = vector.broadcast %c1_i32_4 : i32 to vector<16x8xi32>
    %28 = arith.addi %26, %27 : vector<16x8xi32>
    %29 = arith.cmpi eq, %2, %28 : vector<16x8xi32>
    %30 = arith.extui %29 : vector<16x8xi1> to vector<16x8xi32>
    %31 = arith.sitofp %30 : vector<16x8xi32> to vector<16x8xf32>
    %c0 = arith.constant 0 : index
    %c0_5 = arith.constant 0 : index
    %c0_6 = arith.constant 0 : index
    %32 = vector.load %arg1[%c0, %c0_5, %c0_6] : memref<8x16x16xf32, #tpu.memory_space<vmem>>, vector<1x16x16xf32>
    %33 = vector.shape_cast %32 : vector<1x16x16xf32> to vector<16x16xf32>
    %cst = arith.constant dense<0.000000e+00> : vector<8x16xf32>
    %34 = tpu.matmul %10, %33, %cst {dimension_numbers = #tpu.dot_dimension_numbers<[1], [0], [0], [1], [0, 0, 1, 1], [], []>, precision = #tpu.contract_precision<fp32>} : vector<8x16xf32>, vector<16x16xf32>, vector<8x16xf32> -> vector<8x16xf32>
    %cst_7 = arith.constant dense<0.000000e+00> : vector<8x8xf32>
    %35 = tpu.matmul %34, %24, %cst_7 {dimension_numbers = #tpu.dot_dimension_numbers<[1], [0], [0], [1], [0, 0, 1, 1], [], []>, precision = #tpu.contract_precision<fp32>} : vector<8x16xf32>, vector<16x8xf32>, vector<8x8xf32> -> vector<8x8xf32>
    %c0_8 = arith.constant 0 : index
    %c0_9 = arith.constant 0 : index
    %c0_10 = arith.constant 0 : index
    %c0_11 = arith.constant 0 : index
    %36 = vector.load %arg2[%c0_8, %c0_9, %c0_10, %c0_11] : memref<8x4x8x8xf32, #tpu.memory_space<vmem>>, vector<1x1x8x8xf32>
    %37 = vector.shape_cast %36 : vector<1x1x8x8xf32> to vector<8x8xf32>
    %38 = vector.shape_cast %35 : vector<8x8xf32> to vector<1x1x8x8xf32>
    tpu.vector_store %arg2[%c0_8, %c0_9, %c0_10, %c0_11], %38 {strides = array<i32>} : memref<8x4x8x8xf32, #tpu.memory_space<vmem>>, vector<1x1x8x8xf32>,
    %cst_12 = arith.constant dense<0.000000e+00> : vector<8x8xf32>
    %39 = tpu.matmul %34, %31, %cst_12 {dimension_numbers = #tpu.dot_dimension_numbers<[1], [0], [0], [1], [0, 0, 1, 1], [], []>, precision = #tpu.contract_precision<fp32>} : vector<8x16xf32>, vector<16x8xf32>, vector<8x8xf32> -> vector<8x8xf32>
    %c0_13 = arith.constant 0 : index
    %c1 = arith.constant 1 : index
    %c0_14 = arith.constant 0 : index
    %c0_15 = arith.constant 0 : index
    %40 = vector.load %arg2[%c0_13, %c1, %c0_14, %c0_15] : memref<8x4x8x8xf32, #tpu.memory_space<vmem>>, vector<1x1x8x8xf32>
    %41 = vector.shape_cast %40 : vector<1x1x8x8xf32> to vector<8x8xf32>
    %42 = vector.shape_cast %39 : vector<8x8xf32> to vector<1x1x8x8xf32>
    tpu.vector_store %arg2[%c0_13, %c1, %c0_14, %c0_15], %42 {strides = array<i32>} : memref<8x4x8x8xf32, #tpu.memory_space<vmem>>, vector<1x1x8x8xf32>,
    %cst_16 = arith.constant dense<0.000000e+00> : vector<8x16xf32>
    %43 = tpu.matmul %17, %33, %cst_16 {dimension_numbers = #tpu.dot_dimension_numbers<[1], [0], [0], [1], [0, 0, 1, 1], [], []>, precision = #tpu.contract_precision<fp32>} : vector<8x16xf32>, vector<16x16xf32>, vector<8x16xf32> -> vector<8x16xf32>
    %cst_17 = arith.constant dense<0.000000e+00> : vector<8x8xf32>
    %44 = tpu.matmul %43, %24, %cst_17 {dimension_numbers = #tpu.dot_dimension_numbers<[1], [0], [0], [1], [0, 0, 1, 1], [], []>, precision = #tpu.contract_precision<fp32>} : vector<8x16xf32>, vector<16x8xf32>, vector<8x8xf32> -> vector<8x8xf32>
    %c0_18 = arith.constant 0 : index
    %c2 = arith.constant 2 : index
    %c0_19 = arith.constant 0 : index
    %c0_20 = arith.constant 0 : index
    %45 = vector.load %arg2[%c0_18, %c2, %c0_19, %c0_20] : memref<8x4x8x8xf32, #tpu.memory_space<vmem>>, vector<1x1x8x8xf32>
    %46 = vector.shape_cast %45 : vector<1x1x8x8xf32> to vector<8x8xf32>
    %47 = vector.shape_cast %44 : vector<8x8xf32> to vector<1x1x8x8xf32>
    tpu.vector_store %arg2[%c0_18, %c2, %c0_19, %c0_20], %47 {strides = array<i32>} : memref<8x4x8x8xf32, #tpu.memory_space<vmem>>, vector<1x1x8x8xf32>,
    %cst_21 = arith.constant dense<0.000000e+00> : vector<8x8xf32>
    %48 = tpu.matmul %43, %31, %cst_21 {dimension_numbers = #tpu.dot_dimension_numbers<[1], [0], [0], [1], [0, 0, 1, 1], [], []>, precision = #tpu.contract_precision<fp32>} : vector<8x16xf32>, vector<16x8xf32>, vector<8x8xf32> -> vector<8x8xf32>
    %c0_22 = arith.constant 0 : index
    %c3 = arith.constant 3 : index
    %c0_23 = arith.constant 0 : index
    %c0_24 = arith.constant 0 : index
    %49 = vector.load %arg2[%c0_22, %c3, %c0_23, %c0_24] : memref<8x4x8x8xf32, #tpu.memory_space<vmem>>, vector<1x1x8x8xf32>
    %50 = vector.shape_cast %49 : vector<1x1x8x8xf32> to vector<8x8xf32>
    %51 = vector.shape_cast %48 : vector<8x8xf32> to vector<1x1x8x8xf32>
    tpu.vector_store %arg2[%c0_22, %c3, %c0_23, %c0_24], %51 {strides = array<i32>} : memref<8x4x8x8xf32, #tpu.memory_space<vmem>>, vector<1x1x8x8xf32>,
    %c1_25 = arith.constant 1 : index
    %c0_26 = arith.constant 0 : index
    %c0_27 = arith.constant 0 : index
    %52 = vector.load %arg1[%c1_25, %c0_26, %c0_27] : memref<8x16x16xf32, #tpu.memory_space<vmem>>, vector<1x16x16xf32>
    %53 = vector.shape_cast %52 : vector<1x16x16xf32> to vector<16x16xf32>
    %cst_28 = arith.constant dense<0.000000e+00> : vector<8x16xf32>
    %54 = tpu.matmul %10, %53, %cst_28 {dimension_numbers = #tpu.dot_dimension_numbers<[1], [0], [0], [1], [0, 0, 1, 1], [], []>, precision = #tpu.contract_precision<fp32>} : vector<8x16xf32>, vector<16x16xf32>, vector<8x16xf32> -> vector<8x16xf32>
    %cst_29 = arith.constant dense<0.000000e+00> : vector<8x8xf32>
    %55 = tpu.matmul %54, %24, %cst_29 {dimension_numbers = #tpu.dot_dimension_numbers<[1], [0], [0], [1], [0, 0, 1, 1], [], []>, precision = #tpu.contract_precision<fp32>} : vector<8x16xf32>, vector<16x8xf32>, vector<8x8xf32> -> vector<8x8xf32>
    %c1_30 = arith.constant 1 : index
    %c0_31 = arith.constant 0 : index
    %c0_32 = arith.constant 0 : index
    %c0_33 = arith.constant 0 : index
    %56 = vector.load %arg2[%c1_30, %c0_31, %c0_32, %c0_33] : memref<8x4x8x8xf32, #tpu.memory_space<vmem>>, vector<1x1x8x8xf32>
    %57 = vector.shape_cast %56 : vector<1x1x8x8xf32> to vector<8x8xf32>
    %58 = vector.shape_cast %55 : vector<8x8xf32> to vector<1x1x8x8xf32>
    tpu.vector_store %arg2[%c1_30, %c0_31, %c0_32, %c0_33], %58 {strides = array<i32>} : memref<8x4x8x8xf32, #tpu.memory_space<vmem>>, vector<1x1x8x8xf32>,
    %cst_34 = arith.constant dense<0.000000e+00> : vector<8x8xf32>
    %59 = tpu.matmul %54, %31, %cst_34 {dimension_numbers = #tpu.dot_dimension_numbers<[1], [0], [0], [1], [0, 0, 1, 1], [], []>, precision = #tpu.contract_precision<fp32>} : vector<8x16xf32>, vector<16x8xf32>, vector<8x8xf32> -> vector<8x8xf32>
    %c1_35 = arith.constant 1 : index
    %c1_36 = arith.constant 1 : index
    %c0_37 = arith.constant 0 : index
    %c0_38 = arith.constant 0 : index
    %60 = vector.load %arg2[%c1_35, %c1_36, %c0_37, %c0_38] : memref<8x4x8x8xf32, #tpu.memory_space<vmem>>, vector<1x1x8x8xf32>
    %61 = vector.shape_cast %60 : vector<1x1x8x8xf32> to vector<8x8xf32>
    %62 = vector.shape_cast %59 : vector<8x8xf32> to vector<1x1x8x8xf32>
    tpu.vector_store %arg2[%c1_35, %c1_36, %c0_37, %c0_38], %62 {strides = array<i32>} : memref<8x4x8x8xf32, #tpu.memory_space<vmem>>, vector<1x1x8x8xf32>,
    %cst_39 = arith.constant dense<0.000000e+00> : vector<8x16xf32>
    %63 = tpu.matmul %17, %53, %cst_39 {dimension_numbers = #tpu.dot_dimension_numbers<[1], [0], [0], [1], [0, 0, 1, 1], [], []>, precision = #tpu.contract_precision<fp32>} : vector<8x16xf32>, vector<16x16xf32>, vector<8x16xf32> -> vector<8x16xf32>
    %cst_40 = arith.constant dense<0.000000e+00> : vector<8x8xf32>
    %64 = tpu.matmul %63, %24, %cst_40 {dimension_numbers = #tpu.dot_dimension_numbers<[1], [0], [0], [1], [0, 0, 1, 1], [], []>, precision = #tpu.contract_precision<fp32>} : vector<8x16xf32>, vector<16x8xf32>, vector<8x8xf32> -> vector<8x8xf32>
    %c1_41 = arith.constant 1 : index
    %c2_42 = arith.constant 2 : index
    %c0_43 = arith.constant 0 : index
    %c0_44 = arith.constant 0 : index
    %65 = vector.load %arg2[%c1_41, %c2_42, %c0_43, %c0_44] : memref<8x4x8x8xf32, #tpu.memory_space<vmem>>, vector<1x1x8x8xf32>
    %66 = vector.shape_cast %65 : vector<1x1x8x8xf32> to vector<8x8xf32>
    %67 = vector.shape_cast %64 : vector<8x8xf32> to vector<1x1x8x8xf32>
    tpu.vector_store %arg2[%c1_41, %c2_42, %c0_43, %c0_44], %67 {strides = array<i32>} : memref<8x4x8x8xf32, #tpu.memory_space<vmem>>, vector<1x1x8x8xf32>,
    %cst_45 = arith.constant dense<0.000000e+00> : vector<8x8xf32>
    %68 = tpu.matmul %63, %31, %cst_45 {dimension_numbers = #tpu.dot_dimension_numbers<[1], [0], [0], [1], [0, 0, 1, 1], [], []>, precision = #tpu.contract_precision<fp32>} : vector<8x16xf32>, vector<16x8xf32>, vector<8x8xf32> -> vector<8x8xf32>
    %c1_46 = arith.constant 1 : index
    %c3_47 = arith.constant 3 : index
    %c0_48 = arith.constant 0 : index
    %c0_49 = arith.constant 0 : index
    %69 = vector.load %arg2[%c1_46, %c3_47, %c0_48, %c0_49] : memref<8x4x8x8xf32, #tpu.memory_space<vmem>>, vector<1x1x8x8xf32>
    %70 = vector.shape_cast %69 : vector<1x1x8x8xf32> to vector<8x8xf32>
    %71 = vector.shape_cast %68 : vector<8x8xf32> to vector<1x1x8x8xf32>
    tpu.vector_store %arg2[%c1_46, %c3_47, %c0_48, %c0_49], %71 {strides = array<i32>} : memref<8x4x8x8xf32, #tpu.memory_space<vmem>>, vector<1x1x8x8xf32>,
    %c2_50 = arith.constant 2 : index
    %c0_51 = arith.constant 0 : index
    %c0_52 = arith.constant 0 : index
    %72 = vector.load %arg1[%c2_50, %c0_51, %c0_52] : memref<8x16x16xf32, #tpu.memory_space<vmem>>, vector<1x16x16xf32>
    %73 = vector.shape_cast %72 : vector<1x16x16xf32> to vector<16x16xf32>
    %cst_53 = arith.constant dense<0.000000e+00> : vector<8x16xf32>
    %74 = tpu.matmul %10, %73, %cst_53 {dimension_numbers = #tpu.dot_dimension_numbers<[1], [0], [0], [1], [0, 0, 1, 1], [], []>, precision = #tpu.contract_precision<fp32>} : vector<8x16xf32>, vector<16x16xf32>, vector<8x16xf32> -> vector<8x16xf32>
    %cst_54 = arith.constant dense<0.000000e+00> : vector<8x8xf32>
    %75 = tpu.matmul %74, %24, %cst_54 {dimension_numbers = #tpu.dot_dimension_numbers<[1], [0], [0], [1], [0, 0, 1, 1], [], []>, precision = #tpu.contract_precision<fp32>} : vector<8x16xf32>, vector<16x8xf32>, vector<8x8xf32> -> vector<8x8xf32>
    %c2_55 = arith.constant 2 : index
    %c0_56 = arith.constant 0 : index
    %c0_57 = arith.constant 0 : index
    %c0_58 = arith.constant 0 : index
    %76 = vector.load %arg2[%c2_55, %c0_56, %c0_57, %c0_58] : memref<8x4x8x8xf32, #tpu.memory_space<vmem>>, vector<1x1x8x8xf32>
    %77 = vector.shape_cast %76 : vector<1x1x8x8xf32> to vector<8x8xf32>
    %78 = vector.shape_cast %75 : vector<8x8xf32> to vector<1x1x8x8xf32>
    tpu.vector_store %arg2[%c2_55, %c0_56, %c0_57, %c0_58], %78 {strides = array<i32>} : memref<8x4x8x8xf32, #tpu.memory_space<vmem>>, vector<1x1x8x8xf32>,
    %cst_59 = arith.constant dense<0.000000e+00> : vector<8x8xf32>
    %79 = tpu.matmul %74, %31, %cst_59 {dimension_numbers = #tpu.dot_dimension_numbers<[1], [0], [0], [1], [0, 0, 1, 1], [], []>, precision = #tpu.contract_precision<fp32>} : vector<8x16xf32>, vector<16x8xf32>, vector<8x8xf32> -> vector<8x8xf32>
    %c2_60 = arith.constant 2 : index
    %c1_61 = arith.constant 1 : index
    %c0_62 = arith.constant 0 : index
    %c0_63 = arith.constant 0 : index
    %80 = vector.load %arg2[%c2_60, %c1_61, %c0_62, %c0_63] : memref<8x4x8x8xf32, #tpu.memory_space<vmem>>, vector<1x1x8x8xf32>
    %81 = vector.shape_cast %80 : vector<1x1x8x8xf32> to vector<8x8xf32>
    %82 = vector.shape_cast %79 : vector<8x8xf32> to vector<1x1x8x8xf32>
    tpu.vector_store %arg2[%c2_60, %c1_61, %c0_62, %c0_63], %82 {strides = array<i32>} : memref<8x4x8x8xf32, #tpu.memory_space<vmem>>, vector<1x1x8x8xf32>,
    %cst_64 = arith.constant dense<0.000000e+00> : vector<8x16xf32>
    %83 = tpu.matmul %17, %73, %cst_64 {dimension_numbers = #tpu.dot_dimension_numbers<[1], [0], [0], [1], [0, 0, 1, 1], [], []>, precision = #tpu.contract_precision<fp32>} : vector<8x16xf32>, vector<16x16xf32>, vector<8x16xf32> -> vector<8x16xf32>
    %cst_65 = arith.constant dense<0.000000e+00> : vector<8x8xf32>
    %84 = tpu.matmul %83, %24, %cst_65 {dimension_numbers = #tpu.dot_dimension_numbers<[1], [0], [0], [1], [0, 0, 1, 1], [], []>, precision = #tpu.contract_precision<fp32>} : vector<8x16xf32>, vector<16x8xf32>, vector<8x8xf32> -> vector<8x8xf32>
    %c2_66 = arith.constant 2 : index
    %c2_67 = arith.constant 2 : index
    %c0_68 = arith.constant 0 : index
    %c0_69 = arith.constant 0 : index
    %85 = vector.load %arg2[%c2_66, %c2_67, %c0_68, %c0_69] : memref<8x4x8x8xf32, #tpu.memory_space<vmem>>, vector<1x1x8x8xf32>
    %86 = vector.shape_cast %85 : vector<1x1x8x8xf32> to vector<8x8xf32>
    %87 = vector.shape_cast %84 : vector<8x8xf32> to vector<1x1x8x8xf32>
    tpu.vector_store %arg2[%c2_66, %c2_67, %c0_68, %c0_69], %87 {strides = array<i32>} : memref<8x4x8x8xf32, #tpu.memory_space<vmem>>, vector<1x1x8x8xf32>,
    %cst_70 = arith.constant dense<0.000000e+00> : vector<8x8xf32>
    %88 = tpu.matmul %83, %31, %cst_70 {dimension_numbers = #tpu.dot_dimension_numbers<[1], [0], [0], [1], [0, 0, 1, 1], [], []>, precision = #tpu.contract_precision<fp32>} : vector<8x16xf32>, vector<16x8xf32>, vector<8x8xf32> -> vector<8x8xf32>
    %c2_71 = arith.constant 2 : index
    %c3_72 = arith.constant 3 : index
    %c0_73 = arith.constant 0 : index
    %c0_74 = arith.constant 0 : index
    %89 = vector.load %arg2[%c2_71, %c3_72, %c0_73, %c0_74] : memref<8x4x8x8xf32, #tpu.memory_space<vmem>>, vector<1x1x8x8xf32>
    %90 = vector.shape_cast %89 : vector<1x1x8x8xf32> to vector<8x8xf32>
    %91 = vector.shape_cast %88 : vector<8x8xf32> to vector<1x1x8x8xf32>
    tpu.vector_store %arg2[%c2_71, %c3_72, %c0_73, %c0_74], %91 {strides = array<i32>} : memref<8x4x8x8xf32, #tpu.memory_space<vmem>>, vector<1x1x8x8xf32>,
    %c3_75 = arith.constant 3 : index
    %c0_76 = arith.constant 0 : index
    %c0_77 = arith.constant 0 : index
    %92 = vector.load %arg1[%c3_75, %c0_76, %c0_77] : memref<8x16x16xf32, #tpu.memory_space<vmem>>, vector<1x16x16xf32>
    %93 = vector.shape_cast %92 : vector<1x16x16xf32> to vector<16x16xf32>
    %cst_78 = arith.constant dense<0.000000e+00> : vector<8x16xf32>
    %94 = tpu.matmul %10, %93, %cst_78 {dimension_numbers = #tpu.dot_dimension_numbers<[1], [0], [0], [1], [0, 0, 1, 1], [], []>, precision = #tpu.contract_precision<fp32>} : vector<8x16xf32>, vector<16x16xf32>, vector<8x16xf32> -> vector<8x16xf32>
    %cst_79 = arith.constant dense<0.000000e+00> : vector<8x8xf32>
    %95 = tpu.matmul %94, %24, %cst_79 {dimension_numbers = #tpu.dot_dimension_numbers<[1], [0], [0], [1], [0, 0, 1, 1], [], []>, precision = #tpu.contract_precision<fp32>} : vector<8x16xf32>, vector<16x8xf32>, vector<8x8xf32> -> vector<8x8xf32>
    %c3_80 = arith.constant 3 : index
    %c0_81 = arith.constant 0 : index
    %c0_82 = arith.constant 0 : index
    %c0_83 = arith.constant 0 : index
    %96 = vector.load %arg2[%c3_80, %c0_81, %c0_82, %c0_83] : memref<8x4x8x8xf32, #tpu.memory_space<vmem>>, vector<1x1x8x8xf32>
    %97 = vector.shape_cast %96 : vector<1x1x8x8xf32> to vector<8x8xf32>
    %98 = vector.shape_cast %95 : vector<8x8xf32> to vector<1x1x8x8xf32>
    tpu.vector_store %arg2[%c3_80, %c0_81, %c0_82, %c0_83], %98 {strides = array<i32>} : memref<8x4x8x8xf32, #tpu.memory_space<vmem>>, vector<1x1x8x8xf32>,
    %cst_84 = arith.constant dense<0.000000e+00> : vector<8x8xf32>
    %99 = tpu.matmul %94, %31, %cst_84 {dimension_numbers = #tpu.dot_dimension_numbers<[1], [0], [0], [1], [0, 0, 1, 1], [], []>, precision = #tpu.contract_precision<fp32>} : vector<8x16xf32>, vector<16x8xf32>, vector<8x8xf32> -> vector<8x8xf32>
    %c3_85 = arith.constant 3 : index
    %c1_86 = arith.constant 1 : index
    %c0_87 = arith.constant 0 : index
    %c0_88 = arith.constant 0 : index
    %100 = vector.load %arg2[%c3_85, %c1_86, %c0_87, %c0_88] : memref<8x4x8x8xf32, #tpu.memory_space<vmem>>, vector<1x1x8x8xf32>
    %101 = vector.shape_cast %100 : vector<1x1x8x8xf32> to vector<8x8xf32>
    %102 = vector.shape_cast %99 : vector<8x8xf32> to vector<1x1x8x8xf32>
    tpu.vector_store %arg2[%c3_85, %c1_86, %c0_87, %c0_88], %102 {strides = array<i32>} : memref<8x4x8x8xf32, #tpu.memory_space<vmem>>, vector<1x1x8x8xf32>,
    %cst_89 = arith.constant dense<0.000000e+00> : vector<8x16xf32>
    %103 = tpu.matmul %17, %93, %cst_89 {dimension_numbers = #tpu.dot_dimension_numbers<[1], [0], [0], [1], [0, 0, 1, 1], [], []>, precision = #tpu.contract_precision<fp32>} : vector<8x16xf32>, vector<16x16xf32>, vector<8x16xf32> -> vector<8x16xf32>
    %cst_90 = arith.constant dense<0.000000e+00> : vector<8x8xf32>
    %104 = tpu.matmul %103, %24, %cst_90 {dimension_numbers = #tpu.dot_dimension_numbers<[1], [0], [0], [1], [0, 0, 1, 1], [], []>, precision = #tpu.contract_precision<fp32>} : vector<8x16xf32>, vector<16x8xf32>, vector<8x8xf32> -> vector<8x8xf32>
    %c3_91 = arith.constant 3 : index
    %c2_92 = arith.constant 2 : index
    %c0_93 = arith.constant 0 : index
    %c0_94 = arith.constant 0 : index
    %105 = vector.load %arg2[%c3_91, %c2_92, %c0_93, %c0_94] : memref<8x4x8x8xf32, #tpu.memory_space<vmem>>, vector<1x1x8x8xf32>
    %106 = vector.shape_cast %105 : vector<1x1x8x8xf32> to vector<8x8xf32>
    %107 = vector.shape_cast %104 : vector<8x8xf32> to vector<1x1x8x8xf32>
    tpu.vector_store %arg2[%c3_91, %c2_92, %c0_93, %c0_94], %107 {strides = array<i32>} : memref<8x4x8x8xf32, #tpu.memory_space<vmem>>, vector<1x1x8x8xf32>,
    %cst_95 = arith.constant dense<0.000000e+00> : vector<8x8xf32>
    %108 = tpu.matmul %103, %31, %cst_95 {dimension_numbers = #tpu.dot_dimension_numbers<[1], [0], [0], [1], [0, 0, 1, 1], [], []>, precision = #tpu.contract_precision<fp32>} : vector<8x16xf32>, vector<16x8xf32>, vector<8x8xf32> -> vector<8x8xf32>
    %c3_96 = arith.constant 3 : index
    %c3_97 = arith.constant 3 : index
    %c0_98 = arith.constant 0 : index
    %c0_99 = arith.constant 0 : index
    %109 = vector.load %arg2[%c3_96, %c3_97, %c0_98, %c0_99] : memref<8x4x8x8xf32, #tpu.memory_space<vmem>>, vector<1x1x8x8xf32>
    %110 = vector.shape_cast %109 : vector<1x1x8x8xf32> to vector<8x8xf32>
    %111 = vector.shape_cast %108 : vector<8x8xf32> to vector<1x1x8x8xf32>
    tpu.vector_store %arg2[%c3_96, %c3_97, %c0_98, %c0_99], %111 {strides = array<i32>} : memref<8x4x8x8xf32, #tpu.memory_space<vmem>>, vector<1x1x8x8xf32>,
    %c4 = arith.constant 4 : index
    %c0_100 = arith.constant 0 : index
    %c0_101 = arith.constant 0 : index
    %112 = vector.load %arg1[%c4, %c0_100, %c0_101] : memref<8x16x16xf32, #tpu.memory_space<vmem>>, vector<1x16x16xf32>
    %113 = vector.shape_cast %112 : vector<1x16x16xf32> to vector<16x16xf32>
    %cst_102 = arith.constant dense<0.000000e+00> : vector<8x16xf32>
    %114 = tpu.matmul %10, %113, %cst_102 {dimension_numbers = #tpu.dot_dimension_numbers<[1], [0], [0], [1], [0, 0, 1, 1], [], []>, precision = #tpu.contract_precision<fp32>} : vector<8x16xf32>, vector<16x16xf32>, vector<8x16xf32> -> vector<8x16xf32>
    %cst_103 = arith.constant dense<0.000000e+00> : vector<8x8xf32>
    %115 = tpu.matmul %114, %24, %cst_103 {dimension_numbers = #tpu.dot_dimension_numbers<[1], [0], [0], [1], [0, 0, 1, 1], [], []>, precision = #tpu.contract_precision<fp32>} : vector<8x16xf32>, vector<16x8xf32>, vector<8x8xf32> -> vector<8x8xf32>
    %c4_104 = arith.constant 4 : index
    %c0_105 = arith.constant 0 : index
    %c0_106 = arith.constant 0 : index
    %c0_107 = arith.constant 0 : index
    %116 = vector.load %arg2[%c4_104, %c0_105, %c0_106, %c0_107] : memref<8x4x8x8xf32, #tpu.memory_space<vmem>>, vector<1x1x8x8xf32>
    %117 = vector.shape_cast %116 : vector<1x1x8x8xf32> to vector<8x8xf32>
    %118 = vector.shape_cast %115 : vector<8x8xf32> to vector<1x1x8x8xf32>
    tpu.vector_store %arg2[%c4_104, %c0_105, %c0_106, %c0_107], %118 {strides = array<i32>} : memref<8x4x8x8xf32, #tpu.memory_space<vmem>>, vector<1x1x8x8xf32>,
    %cst_108 = arith.constant dense<0.000000e+00> : vector<8x8xf32>
    %119 = tpu.matmul %114, %31, %cst_108 {dimension_numbers = #tpu.dot_dimension_numbers<[1], [0], [0], [1], [0, 0, 1, 1], [], []>, precision = #tpu.contract_precision<fp32>} : vector<8x16xf32>, vector<16x8xf32>, vector<8x8xf32> -> vector<8x8xf32>
    %c4_109 = arith.constant 4 : index
    %c1_110 = arith.constant 1 : index
    %c0_111 = arith.constant 0 : index
    %c0_112 = arith.constant 0 : index
    %120 = vector.load %arg2[%c4_109, %c1_110, %c0_111, %c0_112] : memref<8x4x8x8xf32, #tpu.memory_space<vmem>>, vector<1x1x8x8xf32>
    %121 = vector.shape_cast %120 : vector<1x1x8x8xf32> to vector<8x8xf32>
    %122 = vector.shape_cast %119 : vector<8x8xf32> to vector<1x1x8x8xf32>
    tpu.vector_store %arg2[%c4_109, %c1_110, %c0_111, %c0_112], %122 {strides = array<i32>} : memref<8x4x8x8xf32, #tpu.memory_space<vmem>>, vector<1x1x8x8xf32>,
    %cst_113 = arith.constant dense<0.000000e+00> : vector<8x16xf32>
    %123 = tpu.matmul %17, %113, %cst_113 {dimension_numbers = #tpu.dot_dimension_numbers<[1], [0], [0], [1], [0, 0, 1, 1], [], []>, precision = #tpu.contract_precision<fp32>} : vector<8x16xf32>, vector<16x16xf32>, vector<8x16xf32> -> vector<8x16xf32>
    %cst_114 = arith.constant dense<0.000000e+00> : vector<8x8xf32>
    %124 = tpu.matmul %123, %24, %cst_114 {dimension_numbers = #tpu.dot_dimension_numbers<[1], [0], [0], [1], [0, 0, 1, 1], [], []>, precision = #tpu.contract_precision<fp32>} : vector<8x16xf32>, vector<16x8xf32>, vector<8x8xf32> -> vector<8x8xf32>
    %c4_115 = arith.constant 4 : index
    %c2_116 = arith.constant 2 : index
    %c0_117 = arith.constant 0 : index
    %c0_118 = arith.constant 0 : index
    %125 = vector.load %arg2[%c4_115, %c2_116, %c0_117, %c0_118] : memref<8x4x8x8xf32, #tpu.memory_space<vmem>>, vector<1x1x8x8xf32>
    %126 = vector.shape_cast %125 : vector<1x1x8x8xf32> to vector<8x8xf32>
    %127 = vector.shape_cast %124 : vector<8x8xf32> to vector<1x1x8x8xf32>
    tpu.vector_store %arg2[%c4_115, %c2_116, %c0_117, %c0_118], %127 {strides = array<i32>} : memref<8x4x8x8xf32, #tpu.memory_space<vmem>>, vector<1x1x8x8xf32>,
    %cst_119 = arith.constant dense<0.000000e+00> : vector<8x8xf32>
    %128 = tpu.matmul %123, %31, %cst_119 {dimension_numbers = #tpu.dot_dimension_numbers<[1], [0], [0], [1], [0, 0, 1, 1], [], []>, precision = #tpu.contract_precision<fp32>} : vector<8x16xf32>, vector<16x8xf32>, vector<8x8xf32> -> vector<8x8xf32>
    %c4_120 = arith.constant 4 : index
    %c3_121 = arith.constant 3 : index
    %c0_122 = arith.constant 0 : index
    %c0_123 = arith.constant 0 : index
    %129 = vector.load %arg2[%c4_120, %c3_121, %c0_122, %c0_123] : memref<8x4x8x8xf32, #tpu.memory_space<vmem>>, vector<1x1x8x8xf32>
    %130 = vector.shape_cast %129 : vector<1x1x8x8xf32> to vector<8x8xf32>
    %131 = vector.shape_cast %128 : vector<8x8xf32> to vector<1x1x8x8xf32>
    tpu.vector_store %arg2[%c4_120, %c3_121, %c0_122, %c0_123], %131 {strides = array<i32>} : memref<8x4x8x8xf32, #tpu.memory_space<vmem>>, vector<1x1x8x8xf32>,
    %c5 = arith.constant 5 : index
    %c0_124 = arith.constant 0 : index
    %c0_125 = arith.constant 0 : index
    %132 = vector.load %arg1[%c5, %c0_124, %c0_125] : memref<8x16x16xf32, #tpu.memory_space<vmem>>, vector<1x16x16xf32>
    %133 = vector.shape_cast %132 : vector<1x16x16xf32> to vector<16x16xf32>
    %cst_126 = arith.constant dense<0.000000e+00> : vector<8x16xf32>
    %134 = tpu.matmul %10, %133, %cst_126 {dimension_numbers = #tpu.dot_dimension_numbers<[1], [0], [0], [1], [0, 0, 1, 1], [], []>, precision = #tpu.contract_precision<fp32>} : vector<8x16xf32>, vector<16x16xf32>, vector<8x16xf32> -> vector<8x16xf32>
    %cst_127 = arith.constant dense<0.000000e+00> : vector<8x8xf32>
    %135 = tpu.matmul %134, %24, %cst_127 {dimension_numbers = #tpu.dot_dimension_numbers<[1], [0], [0], [1], [0, 0, 1, 1], [], []>, precision = #tpu.contract_precision<fp32>} : vector<8x16xf32>, vector<16x8xf32>, vector<8x8xf32> -> vector<8x8xf32>
    %c5_128 = arith.constant 5 : index
    %c0_129 = arith.constant 0 : index
    %c0_130 = arith.constant 0 : index
    %c0_131 = arith.constant 0 : index
    %136 = vector.load %arg2[%c5_128, %c0_129, %c0_130, %c0_131] : memref<8x4x8x8xf32, #tpu.memory_space<vmem>>, vector<1x1x8x8xf32>
    %137 = vector.shape_cast %136 : vector<1x1x8x8xf32> to vector<8x8xf32>
    %138 = vector.shape_cast %135 : vector<8x8xf32> to vector<1x1x8x8xf32>
    tpu.vector_store %arg2[%c5_128, %c0_129, %c0_130, %c0_131], %138 {strides = array<i32>} : memref<8x4x8x8xf32, #tpu.memory_space<vmem>>, vector<1x1x8x8xf32>,
    %cst_132 = arith.constant dense<0.000000e+00> : vector<8x8xf32>
    %139 = tpu.matmul %134, %31, %cst_132 {dimension_numbers = #tpu.dot_dimension_numbers<[1], [0], [0], [1], [0, 0, 1, 1], [], []>, precision = #tpu.contract_precision<fp32>} : vector<8x16xf32>, vector<16x8xf32>, vector<8x8xf32> -> vector<8x8xf32>
    %c5_133 = arith.constant 5 : index
    %c1_134 = arith.constant 1 : index
    %c0_135 = arith.constant 0 : index
    %c0_136 = arith.constant 0 : index
    %140 = vector.load %arg2[%c5_133, %c1_134, %c0_135, %c0_136] : memref<8x4x8x8xf32, #tpu.memory_space<vmem>>, vector<1x1x8x8xf32>
    %141 = vector.shape_cast %140 : vector<1x1x8x8xf32> to vector<8x8xf32>
    %142 = vector.shape_cast %139 : vector<8x8xf32> to vector<1x1x8x8xf32>
    tpu.vector_store %arg2[%c5_133, %c1_134, %c0_135, %c0_136], %142 {strides = array<i32>} : memref<8x4x8x8xf32, #tpu.memory_space<vmem>>, vector<1x1x8x8xf32>,
    %cst_137 = arith.constant dense<0.000000e+00> : vector<8x16xf32>
    %143 = tpu.matmul %17, %133, %cst_137 {dimension_numbers = #tpu.dot_dimension_numbers<[1], [0], [0], [1], [0, 0, 1, 1], [], []>, precision = #tpu.contract_precision<fp32>} : vector<8x16xf32>, vector<16x16xf32>, vector<8x16xf32> -> vector<8x16xf32>
    %cst_138 = arith.constant dense<0.000000e+00> : vector<8x8xf32>
    %144 = tpu.matmul %143, %24, %cst_138 {dimension_numbers = #tpu.dot_dimension_numbers<[1], [0], [0], [1], [0, 0, 1, 1], [], []>, precision = #tpu.contract_precision<fp32>} : vector<8x16xf32>, vector<16x8xf32>, vector<8x8xf32> -> vector<8x8xf32>
    %c5_139 = arith.constant 5 : index
    %c2_140 = arith.constant 2 : index
    %c0_141 = arith.constant 0 : index
    %c0_142 = arith.constant 0 : index
    %145 = vector.load %arg2[%c5_139, %c2_140, %c0_141, %c0_142] : memref<8x4x8x8xf32, #tpu.memory_space<vmem>>, vector<1x1x8x8xf32>
    %146 = vector.shape_cast %145 : vector<1x1x8x8xf32> to vector<8x8xf32>
    %147 = vector.shape_cast %144 : vector<8x8xf32> to vector<1x1x8x8xf32>
    tpu.vector_store %arg2[%c5_139, %c2_140, %c0_141, %c0_142], %147 {strides = array<i32>} : memref<8x4x8x8xf32, #tpu.memory_space<vmem>>, vector<1x1x8x8xf32>,
    %cst_143 = arith.constant dense<0.000000e+00> : vector<8x8xf32>
    %148 = tpu.matmul %143, %31, %cst_143 {dimension_numbers = #tpu.dot_dimension_numbers<[1], [0], [0], [1], [0, 0, 1, 1], [], []>, precision = #tpu.contract_precision<fp32>} : vector<8x16xf32>, vector<16x8xf32>, vector<8x8xf32> -> vector<8x8xf32>
    %c5_144 = arith.constant 5 : index
    %c3_145 = arith.constant 3 : index
    %c0_146 = arith.constant 0 : index
    %c0_147 = arith.constant 0 : index
    %149 = vector.load %arg2[%c5_144, %c3_145, %c0_146, %c0_147] : memref<8x4x8x8xf32, #tpu.memory_space<vmem>>, vector<1x1x8x8xf32>
    %150 = vector.shape_cast %149 : vector<1x1x8x8xf32> to vector<8x8xf32>
    %151 = vector.shape_cast %148 : vector<8x8xf32> to vector<1x1x8x8xf32>
    tpu.vector_store %arg2[%c5_144, %c3_145, %c0_146, %c0_147], %151 {strides = array<i32>} : memref<8x4x8x8xf32, #tpu.memory_space<vmem>>, vector<1x1x8x8xf32>,
    %c6 = arith.constant 6 : index
    %c0_148 = arith.constant 0 : index
    %c0_149 = arith.constant 0 : index
    %152 = vector.load %arg1[%c6, %c0_148, %c0_149] : memref<8x16x16xf32, #tpu.memory_space<vmem>>, vector<1x16x16xf32>
    %153 = vector.shape_cast %152 : vector<1x16x16xf32> to vector<16x16xf32>
    %cst_150 = arith.constant dense<0.000000e+00> : vector<8x16xf32>
    %154 = tpu.matmul %10, %153, %cst_150 {dimension_numbers = #tpu.dot_dimension_numbers<[1], [0], [0], [1], [0, 0, 1, 1], [], []>, precision = #tpu.contract_precision<fp32>} : vector<8x16xf32>, vector<16x16xf32>, vector<8x16xf32> -> vector<8x16xf32>
    %cst_151 = arith.constant dense<0.000000e+00> : vector<8x8xf32>
    %155 = tpu.matmul %154, %24, %cst_151 {dimension_numbers = #tpu.dot_dimension_numbers<[1], [0], [0], [1], [0, 0, 1, 1], [], []>, precision = #tpu.contract_precision<fp32>} : vector<8x16xf32>, vector<16x8xf32>, vector<8x8xf32> -> vector<8x8xf32>
    %c6_152 = arith.constant 6 : index
    %c0_153 = arith.constant 0 : index
    %c0_154 = arith.constant 0 : index
    %c0_155 = arith.constant 0 : index
    %156 = vector.load %arg2[%c6_152, %c0_153, %c0_154, %c0_155] : memref<8x4x8x8xf32, #tpu.memory_space<vmem>>, vector<1x1x8x8xf32>
    %157 = vector.shape_cast %156 : vector<1x1x8x8xf32> to vector<8x8xf32>
    %158 = vector.shape_cast %155 : vector<8x8xf32> to vector<1x1x8x8xf32>
    tpu.vector_store %arg2[%c6_152, %c0_153, %c0_154, %c0_155], %158 {strides = array<i32>} : memref<8x4x8x8xf32, #tpu.memory_space<vmem>>, vector<1x1x8x8xf32>,
    %cst_156 = arith.constant dense<0.000000e+00> : vector<8x8xf32>
    %159 = tpu.matmul %154, %31, %cst_156 {dimension_numbers = #tpu.dot_dimension_numbers<[1], [0], [0], [1], [0, 0, 1, 1], [], []>, precision = #tpu.contract_precision<fp32>} : vector<8x16xf32>, vector<16x8xf32>, vector<8x8xf32> -> vector<8x8xf32>
    %c6_157 = arith.constant 6 : index
    %c1_158 = arith.constant 1 : index
    %c0_159 = arith.constant 0 : index
    %c0_160 = arith.constant 0 : index
    %160 = vector.load %arg2[%c6_157, %c1_158, %c0_159, %c0_160] : memref<8x4x8x8xf32, #tpu.memory_space<vmem>>, vector<1x1x8x8xf32>
    %161 = vector.shape_cast %160 : vector<1x1x8x8xf32> to vector<8x8xf32>
    %162 = vector.shape_cast %159 : vector<8x8xf32> to vector<1x1x8x8xf32>
    tpu.vector_store %arg2[%c6_157, %c1_158, %c0_159, %c0_160], %162 {strides = array<i32>} : memref<8x4x8x8xf32, #tpu.memory_space<vmem>>, vector<1x1x8x8xf32>,
    %cst_161 = arith.constant dense<0.000000e+00> : vector<8x16xf32>
    %163 = tpu.matmul %17, %153, %cst_161 {dimension_numbers = #tpu.dot_dimension_numbers<[1], [0], [0], [1], [0, 0, 1, 1], [], []>, precision = #tpu.contract_precision<fp32>} : vector<8x16xf32>, vector<16x16xf32>, vector<8x16xf32> -> vector<8x16xf32>
    %cst_162 = arith.constant dense<0.000000e+00> : vector<8x8xf32>
    %164 = tpu.matmul %163, %24, %cst_162 {dimension_numbers = #tpu.dot_dimension_numbers<[1], [0], [0], [1], [0, 0, 1, 1], [], []>, precision = #tpu.contract_precision<fp32>} : vector<8x16xf32>, vector<16x8xf32>, vector<8x8xf32> -> vector<8x8xf32>
    %c6_163 = arith.constant 6 : index
    %c2_164 = arith.constant 2 : index
    %c0_165 = arith.constant 0 : index
    %c0_166 = arith.constant 0 : index
    %165 = vector.load %arg2[%c6_163, %c2_164, %c0_165, %c0_166] : memref<8x4x8x8xf32, #tpu.memory_space<vmem>>, vector<1x1x8x8xf32>
    %166 = vector.shape_cast %165 : vector<1x1x8x8xf32> to vector<8x8xf32>
    %167 = vector.shape_cast %164 : vector<8x8xf32> to vector<1x1x8x8xf32>
    tpu.vector_store %arg2[%c6_163, %c2_164, %c0_165, %c0_166], %167 {strides = array<i32>} : memref<8x4x8x8xf32, #tpu.memory_space<vmem>>, vector<1x1x8x8xf32>,
    %cst_167 = arith.constant dense<0.000000e+00> : vector<8x8xf32>
    %168 = tpu.matmul %163, %31, %cst_167 {dimension_numbers = #tpu.dot_dimension_numbers<[1], [0], [0], [1], [0, 0, 1, 1], [], []>, precision = #tpu.contract_precision<fp32>} : vector<8x16xf32>, vector<16x8xf32>, vector<8x8xf32> -> vector<8x8xf32>
    %c6_168 = arith.constant 6 : index
    %c3_169 = arith.constant 3 : index
    %c0_170 = arith.constant 0 : index
    %c0_171 = arith.constant 0 : index
    %169 = vector.load %arg2[%c6_168, %c3_169, %c0_170, %c0_171] : memref<8x4x8x8xf32, #tpu.memory_space<vmem>>, vector<1x1x8x8xf32>
    %170 = vector.shape_cast %169 : vector<1x1x8x8xf32> to vector<8x8xf32>
    %171 = vector.shape_cast %168 : vector<8x8xf32> to vector<1x1x8x8xf32>
    tpu.vector_store %arg2[%c6_168, %c3_169, %c0_170, %c0_171], %171 {strides = array<i32>} : memref<8x4x8x8xf32, #tpu.memory_space<vmem>>, vector<1x1x8x8xf32>,
    %c7 = arith.constant 7 : index
    %c0_172 = arith.constant 0 : index
    %c0_173 = arith.constant 0 : index
    %172 = vector.load %arg1[%c7, %c0_172, %c0_173] : memref<8x16x16xf32, #tpu.memory_space<vmem>>, vector<1x16x16xf32>
    %173 = vector.shape_cast %172 : vector<1x16x16xf32> to vector<16x16xf32>
    %cst_174 = arith.constant dense<0.000000e+00> : vector<8x16xf32>
    %174 = tpu.matmul %10, %173, %cst_174 {dimension_numbers = #tpu.dot_dimension_numbers<[1], [0], [0], [1], [0, 0, 1, 1], [], []>, precision = #tpu.contract_precision<fp32>} : vector<8x16xf32>, vector<16x16xf32>, vector<8x16xf32> -> vector<8x16xf32>
    %cst_175 = arith.constant dense<0.000000e+00> : vector<8x8xf32>
    %175 = tpu.matmul %174, %24, %cst_175 {dimension_numbers = #tpu.dot_dimension_numbers<[1], [0], [0], [1], [0, 0, 1, 1], [], []>, precision = #tpu.contract_precision<fp32>} : vector<8x16xf32>, vector<16x8xf32>, vector<8x8xf32> -> vector<8x8xf32>
    %c7_176 = arith.constant 7 : index
    %c0_177 = arith.constant 0 : index
    %c0_178 = arith.constant 0 : index
    %c0_179 = arith.constant 0 : index
    %176 = vector.load %arg2[%c7_176, %c0_177, %c0_178, %c0_179] : memref<8x4x8x8xf32, #tpu.memory_space<vmem>>, vector<1x1x8x8xf32>
    %177 = vector.shape_cast %176 : vector<1x1x8x8xf32> to vector<8x8xf32>
    %178 = vector.shape_cast %175 : vector<8x8xf32> to vector<1x1x8x8xf32>
    tpu.vector_store %arg2[%c7_176, %c0_177, %c0_178, %c0_179], %178 {strides = array<i32>} : memref<8x4x8x8xf32, #tpu.memory_space<vmem>>, vector<1x1x8x8xf32>,
    %cst_180 = arith.constant dense<0.000000e+00> : vector<8x8xf32>
    %179 = tpu.matmul %174, %31, %cst_180 {dimension_numbers = #tpu.dot_dimension_numbers<[1], [0], [0], [1], [0, 0, 1, 1], [], []>, precision = #tpu.contract_precision<fp32>} : vector<8x16xf32>, vector<16x8xf32>, vector<8x8xf32> -> vector<8x8xf32>
    %c7_181 = arith.constant 7 : index
    %c1_182 = arith.constant 1 : index
    %c0_183 = arith.constant 0 : index
    %c0_184 = arith.constant 0 : index
    %180 = vector.load %arg2[%c7_181, %c1_182, %c0_183, %c0_184] : memref<8x4x8x8xf32, #tpu.memory_space<vmem>>, vector<1x1x8x8xf32>
    %181 = vector.shape_cast %180 : vector<1x1x8x8xf32> to vector<8x8xf32>
    %182 = vector.shape_cast %179 : vector<8x8xf32> to vector<1x1x8x8xf32>
    tpu.vector_store %arg2[%c7_181, %c1_182, %c0_183, %c0_184], %182 {strides = array<i32>} : memref<8x4x8x8xf32, #tpu.memory_space<vmem>>, vector<1x1x8x8xf32>,
    %cst_185 = arith.constant dense<0.000000e+00> : vector<8x16xf32>
    %183 = tpu.matmul %17, %173, %cst_185 {dimension_numbers = #tpu.dot_dimension_numbers<[1], [0], [0], [1], [0, 0, 1, 1], [], []>, precision = #tpu.contract_precision<fp32>} : vector<8x16xf32>, vector<16x16xf32>, vector<8x16xf32> -> vector<8x16xf32>
    %cst_186 = arith.constant dense<0.000000e+00> : vector<8x8xf32>
    %184 = tpu.matmul %183, %24, %cst_186 {dimension_numbers = #tpu.dot_dimension_numbers<[1], [0], [0], [1], [0, 0, 1, 1], [], []>, precision = #tpu.contract_precision<fp32>} : vector<8x16xf32>, vector<16x8xf32>, vector<8x8xf32> -> vector<8x8xf32>
    %c7_187 = arith.constant 7 : index
    %c2_188 = arith.constant 2 : index
    %c0_189 = arith.constant 0 : index
    %c0_190 = arith.constant 0 : index
    %185 = vector.load %arg2[%c7_187, %c2_188, %c0_189, %c0_190] : memref<8x4x8x8xf32, #tpu.memory_space<vmem>>, vector<1x1x8x8xf32>
    %186 = vector.shape_cast %185 : vector<1x1x8x8xf32> to vector<8x8xf32>
    %187 = vector.shape_cast %184 : vector<8x8xf32> to vector<1x1x8x8xf32>
    tpu.vector_store %arg2[%c7_187, %c2_188, %c0_189, %c0_190], %187 {strides = array<i32>} : memref<8x4x8x8xf32, #tpu.memory_space<vmem>>, vector<1x1x8x8xf32>,
    %cst_191 = arith.constant dense<0.000000e+00> : vector<8x8xf32>
    %188 = tpu.matmul %183, %31, %cst_191 {dimension_numbers = #tpu.dot_dimension_numbers<[1], [0], [0], [1], [0, 0, 1, 1], [], []>, precision = #tpu.contract_precision<fp32>} : vector<8x16xf32>, vector<16x8xf32>, vector<8x8xf32> -> vector<8x8xf32>
    %c7_192 = arith.constant 7 : index
    %c3_193 = arith.constant 3 : index
    %c0_194 = arith.constant 0 : index
    %c0_195 = arith.constant 0 : index
    %189 = vector.load %arg2[%c7_192, %c3_193, %c0_194, %c0_195] : memref<8x4x8x8xf32, #tpu.memory_space<vmem>>, vector<1x1x8x8xf32>
    %190 = vector.shape_cast %189 : vector<1x1x8x8xf32> to vector<8x8xf32>
    %191 = vector.shape_cast %188 : vector<8x8xf32> to vector<1x1x8x8xf32>
    tpu.vector_store %arg2[%c7_192, %c3_193, %c0_194, %c0_195], %191 {strides = array<i32>} : memref<8x4x8x8xf32, #tpu.memory_space<vmem>>, vector<1x1x8x8xf32>,
    return
  }
  func.func @transform_0(%arg0: i32) -> (i32, i32, i32) {
    %c0_i32 = arith.constant 0 : i32
    %c0_i32_0 = arith.constant 0 : i32
    %c0_i32_1 = arith.constant 0 : i32
    return %arg0, %c0_i32, %c0_i32_0 : i32, i32, i32
  }
  func.func @transform_1(%arg0: i32) -> (i32, i32, i32, i32) {
    %c0_i32 = arith.constant 0 : i32
    %c0_i32_0 = arith.constant 0 : i32
    %c0_i32_1 = arith.constant 0 : i32
    %c0_i32_2 = arith.constant 0 : i32
    return %arg0, %c0_i32, %c0_i32_0, %c0_i32_1 : i32, i32, i32, i32
  }
}

</mosaic_0001>

<bundles_post_ra>
// kernel: pixel_stack.1
= control target key start
LH: loop header
LB: loop body
LE: loop exit
PB: predicated region body
PF: predicated region fallthrough
CT: control target
= control target key end

     0   :  { %6 = vsyncpa [#allocation3], 0  ;;  %s8138_s9 = smov [#allocation2]   ;;  %s8139_s11 = smov 128   ;;  %s9682_s0 = inlined_call_operand.hbm [shape: f32[8,16,16], index: 0, kind: input, shape index: {}]   ;;  %s9683_s1 = inlined_call_operand.vmem [shape: f32[8,4,8,8], index: 1, kind: output, shape index: {}]  }
   0x1   :  { %s11_s8 = sshll.u32 %s9682_s0, 4  ;;  %s13_s10 = sshll.u32 %s8138_s9, 4  ;;  %s12_s8 = int_to_ptr.hbm [resolvable:$true] %s11_s8  ;;  %s14_s10 = int_to_ptr.vmem [resolvable:$true] %s13_s10 }
   0x2   :  { %s8140_s12 = smov 8  }
   0x3   :  { %19 = dma.hbm_to_vmem [thread:$0]  %s12_s8, 2048, %s14_s10, [#allocation3], %s8139_s11, %s8139_s11, %s8140_s12  }
   0x4   :  { %8136 = dma.done.wait [#allocation3], 2048  }
   0x5   :  { %8137 = vsyncadd [#allocation3], 4294965248  ;;  %v24_v0 = vlaneseq  ;;  %vm53_vm0 = vcmask 130048   ;;  %v52_v6 = vld [vmem:[#allocation2 + $0x8] sm:$0xff]  ;;  %v51_v7 = vld [vmem:[#allocation2] sm:$0xff]  ;;  %v8141_v9 = vmov 0.0  }
   0x6   :  { %v8158_v12 = vand.u32 4294901760, %v52_v6  ;;  %v8160_v13 = vand.u32 4294901760, %v51_v7  ;;  %v8142_v46 = vmov 1.0   ;;  %vm378_vm7 = vcmask 64512  }
   0x7   :  { %v25_v1 = vand.u32 127, %v24_v0  ;;  %v27_v2 = vshrl.u32 %v24_v0, 7 }
   0x8   :  { %v8177_v19 = vsub.f32 %v52_v6, %v8158_v12  ;;  %72 = vmatpush.msra.mxu0 %v8158_v12  ;;  %v8181_v20 = vsub.f32 %v51_v7, %v8160_v13  ;;  %156 = vmatpush.msra.mxu3 %v8158_v12 }
   0x9   :  { %v29_v3 = vmul.u32 2, %v27_v2  ;;  %v37_v4 = vmul.u32 2, %v25_v1  ;;  %v28_v8 = vadd.s32 8, %v27_v2 }
   0xa   :  { %131 = vmatpush.msra.mxu2 %v8177_v19  ;;  %74 = vmatpush.msra.mxu0 %v8160_v13  ;;  %v8191_v22 = vand.u32 4294901760, %v8177_v19  ;;  %v8197_v24 = vand.u32 4294901760, %v8181_v20 }
   0xb   :  { %vm30_vm1 = vcmp.eq.s32.totalorder %v25_v1, %v29_v3  ;;  %v33_v5 = vadd.s32 1, %v29_v3  ;;  %v44_v11 = vadd.s32 1, %v37_v4  ;;  %vm8184_vm5 = vcmp.eq.s32.totalorder %v28_v8, %v37_v4  ;;  %158 = vmatpush.msra.mxu3 %v8160_v13 }
   0xc   :  { %v8156_v10 = vsel %vm30_vm1, 1.0, %v8141_v9  ;;  %vm8199_vm6 = vcmp.eq.s32.totalorder %v27_v2, %v37_v4  ;;  %134 = vmatpush.msra.mxu2 %v8181_v20  ;;  %v7833_v26 = vsel %vm8184_vm5, 1.0, %v8141_v9  ;;  %v101_v27 = vsub.f32 %v8177_v19, %v8191_v22  ;;  %183 = vmatpush.msrb.mxu0 %v8191_v22 }
   0xd   :  { %vm34_vm2 = vcmp.eq.s32.totalorder %v25_v1, %v33_v5  ;;  %v55_v14 = vsel %vm53_vm0, %v8156_v10, 0  ;;  %vm8166_vm3 = vcmp.eq.s32.totalorder %v27_v2, %v44_v11  ;;  %vm8170_vm4 = vcmp.eq.s32.totalorder %v28_v8, %v44_v11 }
   0xe   :  { %v8164_v15 = vsel %vm34_vm2, 1.0, %v8141_v9  ;;  %v8174_v18 = vsub.f32 %v55_v14, %v55_v14  ;;  %v107_v29 = vsub.f32 %v8181_v20, %v8197_v24  ;;  %v7832_v30 = vsel %vm8199_vm6, 1.0, %v8141_v9  ;;  %187 = vmatpush.msrb.mxu0 %v8197_v24  ;;  %7839 = vmatpush.msk.msrb.mxu2 %vm8184_vm5, %v8142_v46 }
   0xf   :  { %v8218_v31 = vand.u32 4294901760, %v101_v27  ;;  %v8224_v34 = vsub.f32 %v7833_v26, %v7833_v26  ;;  %v8229_v35 = vsub.f32 %v7832_v30, %v7832_v30  ;;  %v7835_v41 = vsel %vm8170_vm4, 1.0, %v8141_v9 }
  0x10   :  { %v8194_v23 = vand.u32 4294901760, %v8174_v18  ;;  %137 = vmatmul.f32.vlgmr.msra.gmra.mxu2 %v8174_v18  ;;  %v8222_v33 = vand.u32 4294901760, %v107_v29  ;;  %v7834_v43 = vsel %vm8166_vm3, 1.0, %v8141_v9  ;;  %v8261_v44 = vsub.f32 %v7835_v41, %v7835_v41 }
  0x11   :  { %103 = vmatpush.msra.mxu1 %v8218_v31  ;;  %v8243_v36 = vand.u32 4294901760, %v8224_v34  ;;  %v8248_v38 = vand.u32 4294901760, %v8229_v35  ;;  %v8264_v45 = vsub.f32 %v7834_v43, %v7834_v43  ;;  %7840 = vmatpush.msk.msrb.mxu2 %vm8199_vm6, %v8142_v46  ;;  %v542_v6 = vsel %vm53_vm0, %v8164_v15, 0 }
  0x12   :  { %v78_v28 = vsub.f32 %v8174_v18, %v8194_v23  ;;  %162 = vmatmul.f32.vlgmr.msra.gmra.mxu3 %v8194_v23  ;;  %v8285_v47 = vand.u32 4294901760, %v8261_v44  ;;  %v8333_v7 = vsub.f32 %v542_v6, %v542_v6 }
  0x13   :  { %109 = vmatpush.msra.mxu1 %v8222_v33  ;;  %v263_v37 = vsub.f32 %v8224_v34, %v8243_v36  ;;  %v269_v40 = vsub.f32 %v8229_v35, %v8248_v38  ;;  %345 = vmatpush.msra.mxu2 %v8243_v36  ;;  %v8297_v49 = vand.u32 4294901760, %v8264_v45 }
  0x14   :  { %v8220_v32 = vand.u32 4294901760, %v78_v28  ;;  %7836 = vmatmul.msk.f32.vlgmr.msra.gmra.mxu1 %vm53_vm0, %v8156_v10  ;;  %v424_v48 = vsub.f32 %v8261_v44, %v8285_v47  ;;  %v8340_v8 = vand.u32 4294901760, %v8333_v7 }
  0x15   :  { %208 = vmatpush.msrb.mxu1 %v8158_v12  ;;  %v8250_v39 = vand.u32 4294901760, %v263_v37  ;;  %v8257_v42 = vand.u32 4294901760, %v269_v40  ;;  %349 = vmatpush.msra.mxu2 %v8248_v38  ;;  %v430_v51 = vsub.f32 %v8264_v45, %v8297_v49 }
  0x16   :  { %80 = vmatmul.f32.vlgmr.msra.gmra.mxu0 %v8220_v32  ;;  %v8300_v50 = vand.u32 4294901760, %v424_v48  ;;  %v565_v9 = vsub.f32 %v8333_v7, %v8340_v8 }
  0x17   :  { %293 = vmatpush.msra.mxu0 %v8224_v34  ;;  %210 = vmatpush.msrb.mxu1 %v8160_v13  ;;  %v8305_v52 = vand.u32 4294901760, %v430_v51 }
  0x18   :  { %265 = vmatpush.msrb.mxu3 %v8250_v39  ;;  %v8363_v11 = vand.u32 4294901760, %v565_v9 }
  0x19   :  { %296 = vmatpush.msra.mxu0 %v8229_v35  ;;  %7841 = vmatpush.msk.msra.mxu1 %vm8184_vm5, %v8142_v46 }
  0x1a   :  { %271 = vmatpush.msrb.mxu3 %v8257_v42 }
  0x1b   :  { %7842 = vmatpush.msk.msra.mxu1 %vm8199_vm6, %v8142_v46 }
  0x1c   :  { %7838 = vmatmul.msk.f32.vlgmr.msrb.gmra.mxu1 %vm53_vm0, %v8156_v10  ;;  %7843 = vmatpush.msk.msra.mxu3 %vm8184_vm5, %v8142_v46 }
  0x1d   :  { %426 = vmatpush.msrb.mxu1 %v8300_v50 }
  0x1e   :  { %7837 = vmatmul.msk.f32.vlgmr.msrb.gmra.mxu0 %vm53_vm0, %v8156_v10  ;;  %7844 = vmatpush.msk.msra.mxu3 %vm8199_vm6, %v8142_v46 }
  0x1f   :  { %7845 = vmatpush.msk.msrb.mxu0 %vm8170_vm4, %v8142_v46  ;;  %432 = vmatpush.msrb.mxu1 %v8305_v52 }
  0x21   :  { %7846 = vmatpush.msk.msrb.mxu0 %vm8166_vm3, %v8142_v46 }
  0x91   :  { %v112_v54 = vpop.f32.mrf.mxu1 }
  0x93   :  { %v81_v53 = vpop.f32.mrf.mxu0  ;;  %v138_v55 = vpop.f32.mrf.mxu2 }
  0x94   :  { %v113_v56 = vadd.f32 %v112_v54, %v81_v53 }
  0x95   :  { %v163_v57 = vpop.f32.mrf.mxu3 }
  0x96   :  { %v139_v58 = vadd.f32 %v138_v55, %v113_v56 }
  0x98   :  { %v164_v59 = vadd.f32 %v163_v57, %v139_v58 }
  0x99   :  { %v213_v62 = vpop.f32.mrf.mxu1 }
  0x9b   :  { %v190_v60 = vpop.f32.mrf.mxu0 }
  0x9c   :  { %v191_v61 = vadd.f32 %v190_v60, %v164_v59  ;;  %v1030_v59 = vld [vmem:[#allocation2 + $0x18] sm:$0xff] }
  0x9e   :  { %v214_v63 = vadd.f32 %v213_v62, %v191_v61  ;;  %v8397_v62 = vand.u32 4294901760, %v1030_v59 }
  0xa0   :  { %v217_v0 = vsel %vm53_vm0, %v214_v63, 0  ;;  %v1029_v63 = vld [vmem:[#allocation2 + $0x10] sm:$0xff] }
  0xa1   :  { %v237_v1 = vand.u32 4294901760, %v217_v0 }
  0xa3   :  { %v238_v2 = vsub.f32 %v217_v0, %v237_v1  ;;  %273 = vmatmul.f32.vlgmr.msrb.gmra.mxu3 %v237_v1 }
  0xa4   :  { %7847 = vmatpush.msk.msrb.mxu3 %vm8170_vm4, %v8142_v46 }
  0xa5   :  { %299 = vmatmul.f32.vlgmr.msra.gmra.mxu0 %v238_v2  ;;  %v239_v3 = vand.u32 4294901760, %v238_v2 }
  0xa6   :  { %7848 = vmatpush.msk.msrb.mxu3 %vm8166_vm3, %v8142_v46  ;;  %506 = vmatpush.msra.mxu0 %v8285_v47 }
  0xa7   :  { %324 = vmatmul.f32.vlgmr.msra.gmra.mxu1 %v239_v3  ;;  %v240_v4 = vsub.f32 %v238_v2, %v239_v3 }
  0xa8   :  { %510 = vmatpush.msra.mxu0 %v8297_v49  ;;  %7849 = vmatpush.msk.msra.mxu1 %vm8170_vm4, %v8142_v46 }
  0xa9   :  { %v241_v5 = vand.u32 4294901760, %v240_v4 }
  0xaa   :  { %7850 = vmatpush.msk.msra.mxu1 %vm8166_vm3, %v8142_v46 }
  0xab   :  { %242 = vmatmul.f32.vlgmr.msrb.gmra.mxu2 %v241_v5  ;;  %374 = vmatmul.f32.vlgmr.msra.gmra.mxu3 %v237_v1 }
  0xac   :  { %454 = vmatpush.msrb.mxu2 %v8261_v44  ;;  %590 = vmatpush.msra.mxu3 %v8218_v31 }
  0xad   :  { %403 = vmatmul.f32.vlgmr.msrb.gmra.mxu0 %v241_v5  ;;  %v8402_v5 = vsub.f32 %v1030_v59, %v8397_v62 }
  0xae   :  { %457 = vmatpush.msrb.mxu2 %v8264_v45  ;;  %596 = vmatpush.msra.mxu3 %v8222_v33 }
  0xaf   :  { %434 = vmatmul.f32.vlgmr.msrb.gmra.mxu1 %v237_v1  ;;  %618 = vmatpush.msrb.mxu0 %v8177_v19 }
  0xb0   :  { %643 = vmatpush.msrb.mxu1 %v8158_v12 }
  0xb1   :  { %621 = vmatpush.msrb.mxu0 %v8181_v20 }
  0xb2   :  { %645 = vmatpush.msrb.mxu1 %v8160_v13 }
  0xb3   :  { %351 = vmatmul.f32.vlgmr.msra.gmra.mxu2 %v237_v1  ;;  %485 = vmatmul.f32.vlgmr.msrb.gmra.mxu3 %v239_v3  ;;  %v8399_v3 = vand.u32 4294901760, %v1029_v63 }
  0xb4   :  { %559 = vmatpush.msra.mxu2 %v8158_v12  ;;  %695 = vmatpush.msrb.mxu3 %v8158_v12 }
  0xb5   :  { %512 = vmatmul.f32.vlgmr.msra.gmra.mxu0 %v237_v1  ;;  %v8405_v9 = vsub.f32 %v1029_v63, %v8399_v3 }
  0xb6   :  { %561 = vmatpush.msra.mxu2 %v8160_v13  ;;  %697 = vmatpush.msrb.mxu3 %v8160_v13 }
  0xb7   :  { %535 = vmatmul.f32.vlgmr.msra.gmra.mxu1 %v237_v1  ;;  %7855 = vmatpush.msk.msra.mxu0 %vm8184_vm5, %v8142_v46 }
  0xb8   :  { %752 = vmatpush.msra.mxu1 %v8250_v39 }
  0xb9   :  { %7856 = vmatpush.msk.msra.mxu0 %vm8199_vm6, %v8142_v46 }
  0xba   :  { %758 = vmatpush.msra.mxu1 %v8257_v42 }
  0xbb   :  { %460 = vmatmul.f32.vlgmr.msrb.gmra.mxu2 %v238_v2  ;;  %7852 = vmatmul.msk.f32.vlgmr.msra.gmra.mxu3 %vm53_vm0, %v8164_v15 }
  0xbc   :  { %670 = vmatpush.msrb.mxu2 %v8191_v22  ;;  %7857 = vmatpush.msk.msra.mxu3 %vm8184_vm5, %v8142_v46 }
  0xbd   :  { %624 = vmatmul.f32.vlgmr.msrb.gmra.mxu0 %v8333_v7 }
  0xbe   :  { %674 = vmatpush.msrb.mxu2 %v8197_v24  ;;  %7858 = vmatpush.msk.msra.mxu3 %vm8199_vm6, %v8142_v46 }
  0xbf   :  { %649 = vmatmul.f32.vlgmr.msrb.gmra.mxu1 %v8340_v8  ;;  %832 = vmatpush.msrb.mxu0 %v8243_v36 }
  0xc0   :  { %7859 = vmatpush.msk.msrb.mxu1 %vm8184_vm5, %v8142_v46 }
  0xc1   :  { %836 = vmatpush.msrb.mxu0 %v8248_v38 }
  0xc2   :  { %7860 = vmatpush.msk.msrb.mxu1 %vm8199_vm6, %v8142_v46 }
  0xc3   :  { %567 = vmatmul.f32.vlgmr.msra.gmra.mxu2 %v8363_v11  ;;  %7854 = vmatmul.msk.f32.vlgmr.msrb.gmra.mxu3 %vm53_vm0, %v8164_v15 }
  0xc4   :  { %780 = vmatpush.msra.mxu2 %v8224_v34  ;;  %913 = vmatpush.msrb.mxu3 %v8300_v50 }
  0xc6   :  { %783 = vmatpush.msra.mxu2 %v8229_v35  ;;  %919 = vmatpush.msrb.mxu3 %v8305_v52 }
  0xcb   :  { %7853 = vmatmul.msk.f32.vlgmr.msrb.gmra.mxu2 %vm53_vm0, %v8164_v15 }
  0xcc   :  { %7862 = vmatpush.msk.msrb.mxu2 %vm8170_vm4, %v8142_v46 }
  0xce   :  { %7863 = vmatpush.msk.msrb.mxu2 %vm8166_vm3, %v8142_v46 }
 0x122   :  { %v300_v13 = vpop.f32.mrf.mxu0 }
 0x124   :  { %v325_v14 = vpop.f32.mrf.mxu1 }
 0x126   :  { %v274_v12 = vpop.f32.mrf.mxu3 }
 0x12a   :  { %v404_v26 = vpop.f32.mrf.mxu0 }
 0x12c   :  { %v435_v30 = vpop.f32.mrf.mxu1 }
 0x12d   :  { %v436_v37 = vadd.f32 %v435_v30, %v404_v26 }
 0x12e   :  { %v243_v19 = vpop.f32.mrf.mxu2  ;;  %v375_v24 = vpop.f32.mrf.mxu3 }
 0x12f   :  { %v275_v20 = vadd.f32 %v274_v12, %v243_v19 }
 0x131   :  { %v301_v22 = vadd.f32 %v300_v13, %v275_v20  ;;  %v8409_v13 = vand.u32 4294901760, %v8402_v5  ;;  %v8412_v20 = vand.u32 4294901760, %v8405_v9 }
 0x132   :  { %v513_v40 = vpop.f32.mrf.mxu0 }
 0x133   :  { %v326_v27 = vadd.f32 %v325_v14, %v301_v22  ;;  %v1075_v22 = vsub.f32 %v8402_v5, %v8409_v13 }
 0x134   :  { %v536_v51 = vpop.f32.mrf.mxu1 }
 0x136   :  { %v352_v28 = vpop.f32.mrf.mxu2  ;;  %v486_v33 = vpop.f32.mrf.mxu3 }
 0x137   :  { %v353_v29 = vadd.f32 %v352_v28, %v326_v27  ;;  %v1081_v27 = vsub.f32 %v8405_v9, %v8412_v20  ;;  %v8429_v28 = vand.u32 4294901760, %v1075_v22 }
 0x139   :  { %v376_v31 = vadd.f32 %v375_v24, %v353_v29  ;;  %v8434_v30 = vand.u32 4294901760, %v1081_v27 }
 0x13a   :  { %v625_v57 = vpop.f32.mrf.mxu0 }
 0x13b   :  { %379 = vst.msk [vmem:[%s9683_s1] sm:$0xff] %vm378_vm7, %v376_v31 }
 0x13c   :  { %v650_v61 = vpop.f32.mrf.mxu1 }
 0x13e   :  { %v461_v41 = vpop.f32.mrf.mxu2  ;;  %v599_v54 = vpop.f32.mrf.mxu3 }
 0x13f   :  { %v462_v43 = vadd.f32 %v461_v41, %v436_v37 }
 0x141   :  { %v487_v48 = vadd.f32 %v486_v33, %v462_v43 }
 0x143   :  { %v514_v53 = vadd.f32 %v513_v40, %v487_v48 }
 0x145   :  { %v537_v55 = vadd.f32 %v536_v51, %v514_v53 }
 0x146   :  { %v568_v56 = vpop.f32.mrf.mxu2  ;;  %v700_v2 = vpop.f32.mrf.mxu3 }
 0x147   :  { %7851 = vst.msk [vmem:[%s9683_s1 + $0x8] sm:$0xff] %vm378_vm7, %v537_v55  ;;  %v600_v58 = vadd.f32 %v599_v54, %v568_v56 }
 0x149   :  { %v626_v60 = vadd.f32 %v625_v57, %v600_v58 }
 0x14b   :  { %v651_v0 = vadd.f32 %v650_v61, %v626_v60 }
 0x14e   :  { %v677_v1 = vpop.f32.mrf.mxu2 }
 0x14f   :  { %v678_v4 = vadd.f32 %v677_v1, %v651_v0 }
 0x151   :  { %v701_v6 = vadd.f32 %v700_v2, %v678_v4 }
 0x153   :  { %v704_v12 = vsel %vm53_vm0, %v701_v6, 0 }
 0x154   :  { %v724_v14 = vand.u32 4294901760, %v704_v12 }
 0x156   :  { %v725_v19 = vsub.f32 %v704_v12, %v724_v14  ;;  %760 = vmatmul.f32.vlgmr.msra.gmra.mxu1 %v724_v14 }
 0x157   :  { %7864 = vmatpush.msk.msra.mxu1 %vm8170_vm4, %v8142_v46 }
 0x158   :  { %786 = vmatmul.f32.vlgmr.msra.gmra.mxu2 %v725_v19  ;;  %v726_v24 = vand.u32 4294901760, %v725_v19 }
 0x159   :  { %993 = vmatpush.msra.mxu2 %v8285_v47  ;;  %7865 = vmatpush.msk.msra.mxu1 %vm8166_vm3, %v8142_v46 }
 0x15a   :  { %811 = vmatmul.f32.vlgmr.msra.gmra.mxu3 %v726_v24  ;;  %v727_v26 = vsub.f32 %v725_v19, %v726_v24 }
 0x15b   :  { %7866 = vmatpush.msk.msra.mxu3 %vm8170_vm4, %v8142_v46  ;;  %997 = vmatpush.msra.mxu2 %v8297_v49 }
 0x15c   :  { %v728_v29 = vand.u32 4294901760, %v727_v26 }
 0x15d   :  { %7867 = vmatpush.msk.msra.mxu3 %vm8166_vm3, %v8142_v46 }
 0x15e   :  { %729 = vmatmul.f32.vlgmr.msra.gmra.mxu0 %v728_v29  ;;  %861 = vmatmul.f32.vlgmr.msrb.gmra.mxu1 %v724_v14 }
 0x15f   :  { %941 = vmatpush.msra.mxu0 %v8261_v44  ;;  %1077 = vmatpush.msrb.mxu1 %v8429_v28 }
 0x160   :  { %890 = vmatmul.f32.vlgmr.msrb.gmra.mxu2 %v728_v29 }
 0x161   :  { %944 = vmatpush.msra.mxu0 %v8264_v45  ;;  %1105 = vmatpush.msrb.mxu2 %v8402_v5 }
 0x162   :  { %921 = vmatmul.f32.vlgmr.msrb.gmra.mxu3 %v724_v14  ;;  %1083 = vmatpush.msrb.mxu1 %v8434_v30 }
 0x163   :  { %1130 = vmatpush.msrb.mxu3 %v8397_v62  ;;  %1108 = vmatpush.msrb.mxu2 %v8405_v9 }
 0x165   :  { %1132 = vmatpush.msrb.mxu3 %v8399_v3 }
 0x166   :  { %838 = vmatmul.f32.vlgmr.msrb.gmra.mxu0 %v724_v14  ;;  %972 = vmatmul.f32.vlgmr.msra.gmra.mxu1 %v726_v24 }
 0x167   :  { %1046 = vmatpush.msrb.mxu0 %v8397_v62  ;;  %1182 = vmatpush.msra.mxu1 %v8397_v62 }
 0x168   :  { %999 = vmatmul.f32.vlgmr.msra.gmra.mxu2 %v724_v14 }
 0x169   :  { %1048 = vmatpush.msrb.mxu0 %v8399_v3  ;;  %1184 = vmatpush.msra.mxu1 %v8399_v3 }
 0x16a   :  { %1022 = vmatmul.f32.vlgmr.msra.gmra.mxu3 %v724_v14  ;;  %7872 = vmatpush.msk.msra.mxu2 %vm8184_vm5, %v8142_v46 }
 0x16b   :  { %1239 = vmatpush.msra.mxu3 %v8250_v39 }
 0x16c   :  { %7873 = vmatpush.msk.msra.mxu2 %vm8199_vm6, %v8142_v46 }
 0x16d   :  { %1245 = vmatpush.msra.mxu3 %v8257_v42 }
 0x16e   :  { %947 = vmatmul.f32.vlgmr.msra.gmra.mxu0 %v725_v19  ;;  %7869 = vmatmul.msk.f32.vlgmr.msrb.gmra.mxu1 %vm53_vm0, %v8156_v10 }
 0x16f   :  { %1157 = vmatpush.msra.mxu0 %v8409_v13  ;;  %7874 = vmatpush.msk.msrb.mxu1 %vm8184_vm5, %v8142_v46 }
 0x170   :  { %1111 = vmatmul.f32.vlgmr.msrb.gmra.mxu2 %v8174_v18 }
 0x171   :  { %1161 = vmatpush.msra.mxu0 %v8412_v20  ;;  %7875 = vmatpush.msk.msrb.mxu1 %vm8199_vm6, %v8142_v46 }
 0x172   :  { %1136 = vmatmul.f32.vlgmr.msrb.gmra.mxu3 %v8194_v23  ;;  %1319 = vmatpush.msrb.mxu2 %v8243_v36 }
 0x173   :  { %7876 = vmatpush.msk.msrb.mxu3 %vm8184_vm5, %v8142_v46 }
 0x174   :  { %1323 = vmatpush.msrb.mxu2 %v8248_v38 }
 0x175   :  { %7877 = vmatpush.msk.msrb.mxu3 %vm8199_vm6, %v8142_v46 }
 0x176   :  { %1054 = vmatmul.f32.vlgmr.msrb.gmra.mxu0 %v8220_v32  ;;  %7871 = vmatmul.msk.f32.vlgmr.msra.gmra.mxu1 %vm53_vm0, %v8156_v10 }
 0x177   :  { %1267 = vmatpush.msrb.mxu0 %v8224_v34  ;;  %1400 = vmatpush.msra.mxu1 %v8300_v50 }
 0x179   :  { %1270 = vmatpush.msrb.mxu0 %v8229_v35  ;;  %1406 = vmatpush.msra.mxu1 %v8305_v52 }
 0x17e   :  { %7870 = vmatmul.msk.f32.vlgmr.msra.gmra.mxu0 %vm53_vm0, %v8156_v10 }
 0x17f   :  { %7879 = vmatpush.msk.msra.mxu0 %vm8170_vm4, %v8142_v46 }
 0x181   :  { %7880 = vmatpush.msk.msra.mxu0 %vm8166_vm3, %v8142_v46 }
 0x1d3   :  { %v761_v31 = vpop.f32.mrf.mxu1 }
 0x1db   :  { %v730_v33 = vpop.f32.mrf.mxu0  ;;  %v787_v37 = vpop.f32.mrf.mxu2 }
 0x1dc   :  { %v762_v40 = vadd.f32 %v761_v31, %v730_v33  ;;  %v862_v48 = vpop.f32.mrf.mxu1 }
 0x1dd   :  { %v812_v41 = vpop.f32.mrf.mxu3 }
 0x1de   :  { %v788_v43 = vadd.f32 %v787_v37, %v762_v40 }
 0x1e0   :  { %v813_v51 = vadd.f32 %v812_v41, %v788_v43 }
 0x1e3   :  { %v839_v53 = vpop.f32.mrf.mxu0  ;;  %v891_v54 = vpop.f32.mrf.mxu2 }
 0x1e4   :  { %v840_v55 = vadd.f32 %v839_v53, %v813_v51  ;;  %v973_v58 = vpop.f32.mrf.mxu1 }
 0x1e5   :  { %v922_v56 = vpop.f32.mrf.mxu3 }
 0x1e6   :  { %v863_v57 = vadd.f32 %v862_v48, %v840_v55  ;;  %v923_v59 = vadd.f32 %v922_v56, %v891_v54 }
 0x1e8   :  { %7861 = vst.msk [vmem:[%s9683_s1 + $0x10] sm:$0xff] %vm378_vm7, %v863_v57 }
 0x1eb   :  { %v948_v60 = vpop.f32.mrf.mxu0  ;;  %v1000_v61 = vpop.f32.mrf.mxu2 }
 0x1ec   :  { %v949_v63 = vadd.f32 %v948_v60, %v923_v59  ;;  %v1086_v4 = vpop.f32.mrf.mxu1 }
 0x1ed   :  { %v1023_v1 = vpop.f32.mrf.mxu3 }
 0x1ee   :  { %v974_v0 = vadd.f32 %v973_v58, %v949_v63 }
 0x1f0   :  { %v1001_v2 = vadd.f32 %v1000_v61, %v974_v0 }
 0x1f2   :  { %v1024_v6 = vadd.f32 %v1023_v1, %v1001_v2 }
 0x1f3   :  { %v1055_v12 = vpop.f32.mrf.mxu0  ;;  %v1112_v14 = vpop.f32.mrf.mxu2 }
 0x1f4   :  { %7868 = vst.msk [vmem:[%s9683_s1 + $0x18] sm:$0xff] %vm378_vm7, %v1024_v6  ;;  %v1087_v19 = vadd.f32 %v1086_v4, %v1055_v12  ;;  %v1187_v29 = vpop.f32.mrf.mxu1 }
 0x1f5   :  { %v1137_v24 = vpop.f32.mrf.mxu3 }
 0x1f6   :  { %v1113_v22 = vadd.f32 %v1112_v14, %v1087_v19 }
 0x1f8   :  { %v1138_v26 = vadd.f32 %v1137_v24, %v1113_v22  ;;  %v2001_v24 = vld [vmem:[#allocation2 + $0x28] sm:$0xff] }
 0x1fb   :  { %v1164_v27 = vpop.f32.mrf.mxu0 }
 0x1fc   :  { %v1165_v31 = vadd.f32 %v1164_v27, %v1138_v26  ;;  %v8577_v27 = vand.u32 4294901760, %v2001_v24 }
 0x1fe   :  { %v1188_v33 = vadd.f32 %v1187_v29, %v1165_v31  ;;  %v2000_v29 = vld [vmem:[#allocation2 + $0x20] sm:$0xff] }
 0x200   :  { %v1191_v37 = vsel %vm53_vm0, %v1188_v33, 0 }
 0x201   :  { %v1211_v40 = vand.u32 4294901760, %v1191_v37 }
 0x203   :  { %v1212_v41 = vsub.f32 %v1191_v37, %v1211_v40  ;;  %1247 = vmatmul.f32.vlgmr.msra.gmra.mxu3 %v1211_v40 }
 0x204   :  { %7881 = vmatpush.msk.msra.mxu3 %vm8170_vm4, %v8142_v46 }
 0x205   :  { %1273 = vmatmul.f32.vlgmr.msrb.gmra.mxu0 %v1212_v41  ;;  %v1213_v43 = vand.u32 4294901760, %v1212_v41 }
 0x206   :  { %7882 = vmatpush.msk.msra.mxu3 %vm8166_vm3, %v8142_v46  ;;  %1480 = vmatpush.msrb.mxu0 %v8285_v47 }
 0x207   :  { %1298 = vmatmul.f32.vlgmr.msrb.gmra.mxu1 %v1213_v43  ;;  %v1214_v48 = vsub.f32 %v1212_v41, %v1213_v43 }
 0x208   :  { %1484 = vmatpush.msrb.mxu0 %v8297_v49  ;;  %7883 = vmatpush.msk.msrb.mxu1 %vm8170_vm4, %v8142_v46 }
 0x209   :  { %v1215_v51 = vand.u32 4294901760, %v1214_v48 }
 0x20a   :  { %7884 = vmatpush.msk.msrb.mxu1 %vm8166_vm3, %v8142_v46 }
 0x20b   :  { %1216 = vmatmul.f32.vlgmr.msra.gmra.mxu2 %v1215_v51  ;;  %1348 = vmatmul.f32.vlgmr.msrb.gmra.mxu3 %v1211_v40 }
 0x20c   :  { %1428 = vmatpush.msra.mxu2 %v8261_v44  ;;  %1561 = vmatpush.msrb.mxu3 %v8429_v28 }
 0x20d   :  { %1377 = vmatmul.f32.vlgmr.msra.gmra.mxu0 %v1215_v51 }
 0x20e   :  { %1431 = vmatpush.msra.mxu2 %v8264_v45  ;;  %1567 = vmatpush.msrb.mxu3 %v8434_v30 }
 0x20f   :  { %1408 = vmatmul.f32.vlgmr.msra.gmra.mxu1 %v1211_v40  ;;  %1589 = vmatpush.msra.mxu0 %v8402_v5 }
 0x210   :  { %1614 = vmatpush.msra.mxu1 %v8397_v62 }
 0x211   :  { %1592 = vmatpush.msra.mxu0 %v8405_v9 }
 0x212   :  { %1616 = vmatpush.msra.mxu1 %v8399_v3 }
 0x213   :  { %1325 = vmatmul.f32.vlgmr.msrb.gmra.mxu2 %v1211_v40  ;;  %1459 = vmatmul.f32.vlgmr.msra.gmra.mxu3 %v1213_v43  ;;  %v8582_v43 = vsub.f32 %v2001_v24, %v8577_v27 }
 0x214   :  { %1530 = vmatpush.msrb.mxu2 %v8397_v62  ;;  %1666 = vmatpush.msra.mxu3 %v8397_v62 }
 0x215   :  { %1486 = vmatmul.f32.vlgmr.msrb.gmra.mxu0 %v1211_v40 }
 0x216   :  { %1532 = vmatpush.msrb.mxu2 %v8399_v3  ;;  %1668 = vmatpush.msra.mxu3 %v8399_v3 }
 0x217   :  { %1509 = vmatmul.f32.vlgmr.msrb.gmra.mxu1 %v1211_v40  ;;  %7889 = vmatpush.msk.msrb.mxu0 %vm8184_vm5, %v8142_v46  ;;  %v8579_v40 = vand.u32 4294901760, %v2000_v29 }
 0x218   :  { %1723 = vmatpush.msrb.mxu1 %v8250_v39 }
 0x219   :  { %7890 = vmatpush.msk.msrb.mxu0 %vm8199_vm6, %v8142_v46  ;;  %v8585_v51 = vsub.f32 %v2000_v29, %v8579_v40 }
 0x21a   :  { %1729 = vmatpush.msrb.mxu1 %v8257_v42 }
 0x21b   :  { %1434 = vmatmul.f32.vlgmr.msra.gmra.mxu2 %v1212_v41  ;;  %7886 = vmatmul.msk.f32.vlgmr.msrb.gmra.mxu3 %vm53_vm0, %v8164_v15 }
 0x21c   :  { %1641 = vmatpush.msra.mxu2 %v8409_v13  ;;  %7891 = vmatpush.msk.msrb.mxu3 %vm8184_vm5, %v8142_v46 }
 0x21d   :  { %1595 = vmatmul.f32.vlgmr.msra.gmra.mxu0 %v8333_v7 }
 0x21e   :  { %1645 = vmatpush.msra.mxu2 %v8412_v20  ;;  %7892 = vmatpush.msk.msrb.mxu3 %vm8199_vm6, %v8142_v46 }
 0x21f   :  { %1620 = vmatmul.f32.vlgmr.msra.gmra.mxu1 %v8340_v8  ;;  %1803 = vmatpush.msra.mxu0 %v8243_v36 }
 0x220   :  { %7893 = vmatpush.msk.msra.mxu1 %vm8184_vm5, %v8142_v46 }
 0x221   :  { %1807 = vmatpush.msra.mxu0 %v8248_v38 }
 0x222   :  { %7894 = vmatpush.msk.msra.mxu1 %vm8199_vm6, %v8142_v46 }
 0x223   :  { %1538 = vmatmul.f32.vlgmr.msrb.gmra.mxu2 %v8363_v11  ;;  %7888 = vmatmul.msk.f32.vlgmr.msra.gmra.mxu3 %vm53_vm0, %v8164_v15 }
 0x224   :  { %1751 = vmatpush.msrb.mxu2 %v8224_v34  ;;  %1884 = vmatpush.msra.mxu3 %v8300_v50 }
 0x226   :  { %1754 = vmatpush.msrb.mxu2 %v8229_v35  ;;  %1890 = vmatpush.msra.mxu3 %v8305_v52 }
 0x22b   :  { %7887 = vmatmul.msk.f32.vlgmr.msra.gmra.mxu2 %vm53_vm0, %v8164_v15 }
 0x22c   :  { %7896 = vmatpush.msk.msra.mxu2 %vm8170_vm4, %v8142_v46 }
 0x22e   :  { %7897 = vmatpush.msk.msra.mxu2 %vm8166_vm3, %v8142_v46 }
 0x282   :  { %v1274_v3 = vpop.f32.mrf.mxu0 }
 0x284   :  { %v1299_v5 = vpop.f32.mrf.mxu1 }
 0x286   :  { %v1248_v62 = vpop.f32.mrf.mxu3 }
 0x28a   :  { %v1378_v30 = vpop.f32.mrf.mxu0 }
 0x28c   :  { %v1409_v56 = vpop.f32.mrf.mxu1 }
 0x28d   :  { %v1410_v59 = vadd.f32 %v1409_v56, %v1378_v30 }
 0x28e   :  { %v1217_v9 = vpop.f32.mrf.mxu2  ;;  %v1349_v28 = vpop.f32.mrf.mxu3 }
 0x28f   :  { %v1249_v13 = vadd.f32 %v1248_v62, %v1217_v9 }
 0x291   :  { %v1275_v20 = vadd.f32 %v1274_v3, %v1249_v13  ;;  %v8589_v3 = vand.u32 4294901760, %v8582_v43  ;;  %v8592_v13 = vand.u32 4294901760, %v8585_v51 }
 0x292   :  { %v1487_v60 = vpop.f32.mrf.mxu0 }
 0x293   :  { %v1300_v53 = vadd.f32 %v1299_v5, %v1275_v20  ;;  %v2046_v20 = vsub.f32 %v8582_v43, %v8589_v3 }
 0x294   :  { %v1510_v1 = vpop.f32.mrf.mxu1 }
 0x296   :  { %v1326_v54 = vpop.f32.mrf.mxu2  ;;  %v1460_v58 = vpop.f32.mrf.mxu3 }
 0x297   :  { %v1327_v55 = vadd.f32 %v1326_v54, %v1300_v53  ;;  %v2052_v53 = vsub.f32 %v8585_v51, %v8592_v13  ;;  %v8609_v54 = vand.u32 4294901760, %v2046_v20 }
 0x299   :  { %v1350_v57 = vadd.f32 %v1349_v28, %v1327_v55  ;;  %v8614_v56 = vand.u32 4294901760, %v2052_v53 }
 0x29a   :  { %v1596_v14 = vpop.f32.mrf.mxu0 }
 0x29b   :  { %7878 = vst.msk [vmem:[%s9683_s1 + $0x20] sm:$0xff] %vm378_vm7, %v1350_v57 }
 0x29c   :  { %v1621_v26 = vpop.f32.mrf.mxu1 }
 0x29e   :  { %v1435_v61 = vpop.f32.mrf.mxu2  ;;  %v1570_v4 = vpop.f32.mrf.mxu3 }
 0x29f   :  { %v1436_v63 = vadd.f32 %v1435_v61, %v1410_v59 }
 0x2a1   :  { %v1461_v0 = vadd.f32 %v1460_v58, %v1436_v63 }
 0x2a3   :  { %v1488_v2 = vadd.f32 %v1487_v60, %v1461_v0 }
 0x2a5   :  { %v1511_v6 = vadd.f32 %v1510_v1, %v1488_v2 }
 0x2a6   :  { %v1539_v12 = vpop.f32.mrf.mxu2  ;;  %v1671_v37 = vpop.f32.mrf.mxu3 }
 0x2a7   :  { %7885 = vst.msk [vmem:[%s9683_s1 + $0x28] sm:$0xff] %vm378_vm7, %v1511_v6  ;;  %v1571_v19 = vadd.f32 %v1570_v4, %v1539_v12 }
 0x2a9   :  { %v1597_v22 = vadd.f32 %v1596_v14, %v1571_v19 }
 0x2ab   :  { %v1622_v31 = vadd.f32 %v1621_v26, %v1597_v22 }
 0x2ae   :  { %v1648_v33 = vpop.f32.mrf.mxu2 }
 0x2af   :  { %v1649_v41 = vadd.f32 %v1648_v33, %v1622_v31 }
 0x2b1   :  { %v1672_v48 = vadd.f32 %v1671_v37, %v1649_v41 }
 0x2b3   :  { %v1675_v62 = vsel %vm53_vm0, %v1672_v48, 0 }
 0x2b4   :  { %v1695_v5 = vand.u32 4294901760, %v1675_v62 }
 0x2b6   :  { %v1696_v9 = vsub.f32 %v1675_v62, %v1695_v5  ;;  %1731 = vmatmul.f32.vlgmr.msrb.gmra.mxu1 %v1695_v5 }
 0x2b7   :  { %7898 = vmatpush.msk.msrb.mxu1 %vm8170_vm4, %v8142_v46 }
 0x2b8   :  { %1757 = vmatmul.f32.vlgmr.msrb.gmra.mxu2 %v1696_v9  ;;  %v1697_v28 = vand.u32 4294901760, %v1696_v9 }
 0x2b9   :  { %1964 = vmatpush.msrb.mxu2 %v8285_v47  ;;  %7899 = vmatpush.msk.msrb.mxu1 %vm8166_vm3, %v8142_v46 }
 0x2ba   :  { %1782 = vmatmul.f32.vlgmr.msrb.gmra.mxu3 %v1697_v28  ;;  %v1698_v30 = vsub.f32 %v1696_v9, %v1697_v28 }
 0x2bb   :  { %7900 = vmatpush.msk.msrb.mxu3 %vm8170_vm4, %v8142_v46  ;;  %1968 = vmatpush.msrb.mxu2 %v8297_v49 }
 0x2bc   :  { %v1699_v55 = vand.u32 4294901760, %v1698_v30 }
 0x2bd   :  { %7901 = vmatpush.msk.msrb.mxu3 %vm8166_vm3, %v8142_v46 }
 0x2be   :  { %1700 = vmatmul.f32.vlgmr.msrb.gmra.mxu0 %v1699_v55  ;;  %1832 = vmatmul.f32.vlgmr.msra.gmra.mxu1 %v1695_v5 }
 0x2bf   :  { %1912 = vmatpush.msrb.mxu0 %v8261_v44  ;;  %2048 = vmatpush.msra.mxu1 %v8609_v54 }
 0x2c0   :  { %1861 = vmatmul.f32.vlgmr.msra.gmra.mxu2 %v1699_v55 }
 0x2c1   :  { %1915 = vmatpush.msrb.mxu0 %v8264_v45  ;;  %2076 = vmatpush.msra.mxu2 %v8582_v43 }
 0x2c2   :  { %1892 = vmatmul.f32.vlgmr.msra.gmra.mxu3 %v1695_v5  ;;  %2054 = vmatpush.msra.mxu1 %v8614_v56 }
 0x2c3   :  { %2101 = vmatpush.msra.mxu3 %v8577_v27  ;;  %2079 = vmatpush.msra.mxu2 %v8585_v51 }
 0x2c5   :  { %2103 = vmatpush.msra.mxu3 %v8579_v40 }
 0x2c6   :  { %1809 = vmatmul.f32.vlgmr.msra.gmra.mxu0 %v1695_v5  ;;  %1943 = vmatmul.f32.vlgmr.msrb.gmra.mxu1 %v1697_v28 }
 0x2c7   :  { %2017 = vmatpush.msra.mxu0 %v8577_v27  ;;  %2153 = vmatpush.msrb.mxu1 %v8577_v27 }
 0x2c8   :  { %1970 = vmatmul.f32.vlgmr.msrb.gmra.mxu2 %v1695_v5 }
 0x2c9   :  { %2019 = vmatpush.msra.mxu0 %v8579_v40  ;;  %2155 = vmatpush.msrb.mxu1 %v8579_v40 }
 0x2ca   :  { %1993 = vmatmul.f32.vlgmr.msrb.gmra.mxu3 %v1695_v5  ;;  %7906 = vmatpush.msk.msrb.mxu2 %vm8184_vm5, %v8142_v46 }
 0x2cb   :  { %2210 = vmatpush.msrb.mxu3 %v8250_v39 }
 0x2cc   :  { %7907 = vmatpush.msk.msrb.mxu2 %vm8199_vm6, %v8142_v46 }
 0x2cd   :  { %2216 = vmatpush.msrb.mxu3 %v8257_v42 }
 0x2ce   :  { %1918 = vmatmul.f32.vlgmr.msrb.gmra.mxu0 %v1696_v9  ;;  %7903 = vmatmul.msk.f32.vlgmr.msra.gmra.mxu1 %vm53_vm0, %v8156_v10 }
 0x2cf   :  { %2128 = vmatpush.msrb.mxu0 %v8589_v3  ;;  %7908 = vmatpush.msk.msra.mxu1 %vm8184_vm5, %v8142_v46 }
 0x2d0   :  { %2082 = vmatmul.f32.vlgmr.msra.gmra.mxu2 %v8174_v18 }
 0x2d1   :  { %2132 = vmatpush.msrb.mxu0 %v8592_v13  ;;  %7909 = vmatpush.msk.msra.mxu1 %vm8199_vm6, %v8142_v46 }
 0x2d2   :  { %2107 = vmatmul.f32.vlgmr.msra.gmra.mxu3 %v8194_v23  ;;  %2290 = vmatpush.msra.mxu2 %v8243_v36 }
 0x2d3   :  { %7910 = vmatpush.msk.msra.mxu3 %vm8184_vm5, %v8142_v46 }
 0x2d4   :  { %2294 = vmatpush.msra.mxu2 %v8248_v38 }
 0x2d5   :  { %7911 = vmatpush.msk.msra.mxu3 %vm8199_vm6, %v8142_v46 }
 0x2d6   :  { %2025 = vmatmul.f32.vlgmr.msra.gmra.mxu0 %v8220_v32  ;;  %7905 = vmatmul.msk.f32.vlgmr.msrb.gmra.mxu1 %vm53_vm0, %v8156_v10 }
 0x2d7   :  { %2238 = vmatpush.msra.mxu0 %v8224_v34  ;;  %2371 = vmatpush.msrb.mxu1 %v8300_v50 }
 0x2d9   :  { %2241 = vmatpush.msra.mxu0 %v8229_v35  ;;  %2377 = vmatpush.msrb.mxu1 %v8305_v52 }
 0x2de   :  { %7904 = vmatmul.msk.f32.vlgmr.msrb.gmra.mxu0 %vm53_vm0, %v8156_v10 }
 0x2df   :  { %7913 = vmatpush.msk.msrb.mxu0 %vm8170_vm4, %v8142_v46 }
 0x2e1   :  { %7914 = vmatpush.msk.msrb.mxu0 %vm8166_vm3, %v8142_v46 }
 0x333   :  { %v1732_v57 = vpop.f32.mrf.mxu1 }
 0x33b   :  { %v1701_v58 = vpop.f32.mrf.mxu0  ;;  %v1758_v59 = vpop.f32.mrf.mxu2 }
 0x33c   :  { %v1733_v60 = vadd.f32 %v1732_v57, %v1701_v58  ;;  %v1833_v0 = vpop.f32.mrf.mxu1 }
 0x33d   :  { %v1783_v61 = vpop.f32.mrf.mxu3 }
 0x33e   :  { %v1759_v63 = vadd.f32 %v1758_v59, %v1733_v60 }
 0x340   :  { %v1784_v1 = vadd.f32 %v1783_v61, %v1759_v63 }
 0x343   :  { %v1810_v2 = vpop.f32.mrf.mxu0  ;;  %v1862_v4 = vpop.f32.mrf.mxu2 }
 0x344   :  { %v1811_v6 = vadd.f32 %v1810_v2, %v1784_v1  ;;  %v1944_v19 = vpop.f32.mrf.mxu1 }
 0x345   :  { %v1893_v12 = vpop.f32.mrf.mxu3 }
 0x346   :  { %v1834_v14 = vadd.f32 %v1833_v0, %v1811_v6  ;;  %v1894_v22 = vadd.f32 %v1893_v12, %v1862_v4 }
 0x348   :  { %7895 = vst.msk [vmem:[%s9683_s1 + $0x30] sm:$0xff] %vm378_vm7, %v1834_v14 }
 0x34b   :  { %v1919_v24 = vpop.f32.mrf.mxu0  ;;  %v1971_v26 = vpop.f32.mrf.mxu2 }
 0x34c   :  { %v1920_v29 = vadd.f32 %v1919_v24, %v1894_v22  ;;  %v2057_v41 = vpop.f32.mrf.mxu1 }
 0x34d   :  { %v1994_v33 = vpop.f32.mrf.mxu3 }
 0x34e   :  { %v1945_v31 = vadd.f32 %v1944_v19, %v1920_v29 }
 0x350   :  { %v1972_v37 = vadd.f32 %v1971_v26, %v1945_v31 }
 0x352   :  { %v1995_v48 = vadd.f32 %v1994_v33, %v1972_v37 }
 0x353   :  { %v2026_v62 = vpop.f32.mrf.mxu0  ;;  %v2083_v5 = vpop.f32.mrf.mxu2 }
 0x354   :  { %7902 = vst.msk [vmem:[%s9683_s1 + $0x38] sm:$0xff] %vm378_vm7, %v1995_v48  ;;  %v2058_v9 = vadd.f32 %v2057_v41, %v2026_v62  ;;  %v2158_v55 = vpop.f32.mrf.mxu1 }
 0x355   :  { %v2108_v28 = vpop.f32.mrf.mxu3 }
 0x356   :  { %v2084_v20 = vadd.f32 %v2083_v5, %v2058_v9 }
 0x358   :  { %v2109_v30 = vadd.f32 %v2108_v28, %v2084_v20  ;;  %v2972_v28 = vld [vmem:[#allocation2 + $0x38] sm:$0xff] }
 0x35b   :  { %v2135_v53 = vpop.f32.mrf.mxu0 }
 0x35c   :  { %v2136_v57 = vadd.f32 %v2135_v53, %v2109_v30  ;;  %v8757_v53 = vand.u32 4294901760, %v2972_v28 }
 0x35e   :  { %v2159_v58 = vadd.f32 %v2158_v55, %v2136_v57  ;;  %v2971_v55 = vld [vmem:[#allocation2 + $0x30] sm:$0xff] }
 0x360   :  { %v2162_v59 = vsel %vm53_vm0, %v2159_v58, 0 }
 0x361   :  { %v2182_v60 = vand.u32 4294901760, %v2162_v59 }
 0x363   :  { %v2183_v61 = vsub.f32 %v2162_v59, %v2182_v60  ;;  %2218 = vmatmul.f32.vlgmr.msrb.gmra.mxu3 %v2182_v60 }
 0x364   :  { %7915 = vmatpush.msk.msrb.mxu3 %vm8170_vm4, %v8142_v46 }
 0x365   :  { %2244 = vmatmul.f32.vlgmr.msra.gmra.mxu0 %v2183_v61  ;;  %v2184_v63 = vand.u32 4294901760, %v2183_v61 }
 0x366   :  { %7916 = vmatpush.msk.msrb.mxu3 %vm8166_vm3, %v8142_v46  ;;  %2451 = vmatpush.msra.mxu0 %v8285_v47 }
 0x367   :  { %2269 = vmatmul.f32.vlgmr.msra.gmra.mxu1 %v2184_v63  ;;  %v2185_v0 = vsub.f32 %v2183_v61, %v2184_v63 }
 0x368   :  { %2455 = vmatpush.msra.mxu0 %v8297_v49  ;;  %7917 = vmatpush.msk.msra.mxu1 %vm8170_vm4, %v8142_v46 }
 0x369   :  { %v2186_v1 = vand.u32 4294901760, %v2185_v0 }
 0x36a   :  { %7918 = vmatpush.msk.msra.mxu1 %vm8166_vm3, %v8142_v46 }
 0x36b   :  { %2187 = vmatmul.f32.vlgmr.msrb.gmra.mxu2 %v2186_v1  ;;  %2319 = vmatmul.f32.vlgmr.msra.gmra.mxu3 %v2182_v60 }
 0x36c   :  { %2399 = vmatpush.msrb.mxu2 %v8261_v44  ;;  %2532 = vmatpush.msra.mxu3 %v8609_v54 }
 0x36d   :  { %2348 = vmatmul.f32.vlgmr.msrb.gmra.mxu0 %v2186_v1 }
 0x36e   :  { %2402 = vmatpush.msrb.mxu2 %v8264_v45  ;;  %2538 = vmatpush.msra.mxu3 %v8614_v56 }
 0x36f   :  { %2379 = vmatmul.f32.vlgmr.msrb.gmra.mxu1 %v2182_v60  ;;  %2560 = vmatpush.msrb.mxu0 %v8582_v43 }
 0x370   :  { %2585 = vmatpush.msrb.mxu1 %v8577_v27 }
 0x371   :  { %2563 = vmatpush.msrb.mxu0 %v8585_v51 }
 0x372   :  { %2587 = vmatpush.msrb.mxu1 %v8579_v40 }
 0x373   :  { %2296 = vmatmul.f32.vlgmr.msra.gmra.mxu2 %v2182_v60  ;;  %2430 = vmatmul.f32.vlgmr.msrb.gmra.mxu3 %v2184_v63  ;;  %v8762_v63 = vsub.f32 %v2972_v28, %v8757_v53 }
 0x374   :  { %2501 = vmatpush.msra.mxu2 %v8577_v27  ;;  %2637 = vmatpush.msrb.mxu3 %v8577_v27 }
 0x375   :  { %2457 = vmatmul.f32.vlgmr.msra.gmra.mxu0 %v2182_v60 }
 0x376   :  { %2503 = vmatpush.msra.mxu2 %v8579_v40  ;;  %2639 = vmatpush.msrb.mxu3 %v8579_v40 }
 0x377   :  { %2480 = vmatmul.f32.vlgmr.msra.gmra.mxu1 %v2182_v60  ;;  %7923 = vmatpush.msk.msra.mxu0 %vm8184_vm5, %v8142_v46  ;;  %v8759_v60 = vand.u32 4294901760, %v2971_v55 }
 0x378   :  { %2694 = vmatpush.msra.mxu1 %v8250_v39 }
 0x379   :  { %7924 = vmatpush.msk.msra.mxu0 %vm8199_vm6, %v8142_v46  ;;  %v8765_v1 = vsub.f32 %v2971_v55, %v8759_v60 }
 0x37a   :  { %2700 = vmatpush.msra.mxu1 %v8257_v42 }
 0x37b   :  { %2405 = vmatmul.f32.vlgmr.msrb.gmra.mxu2 %v2183_v61  ;;  %7920 = vmatmul.msk.f32.vlgmr.msra.gmra.mxu3 %vm53_vm0, %v8164_v15 }
 0x37c   :  { %2612 = vmatpush.msrb.mxu2 %v8589_v3  ;;  %7925 = vmatpush.msk.msra.mxu3 %vm8184_vm5, %v8142_v46 }
 0x37d   :  { %2566 = vmatmul.f32.vlgmr.msrb.gmra.mxu0 %v8333_v7 }
 0x37e   :  { %2616 = vmatpush.msrb.mxu2 %v8592_v13  ;;  %7926 = vmatpush.msk.msra.mxu3 %vm8199_vm6, %v8142_v46 }
 0x37f   :  { %2591 = vmatmul.f32.vlgmr.msrb.gmra.mxu1 %v8340_v8  ;;  %2774 = vmatpush.msrb.mxu0 %v8243_v36 }
 0x380   :  { %7927 = vmatpush.msk.msrb.mxu1 %vm8184_vm5, %v8142_v46 }
 0x381   :  { %2778 = vmatpush.msrb.mxu0 %v8248_v38 }
 0x382   :  { %7928 = vmatpush.msk.msrb.mxu1 %vm8199_vm6, %v8142_v46 }
 0x383   :  { %2509 = vmatmul.f32.vlgmr.msra.gmra.mxu2 %v8363_v11  ;;  %7922 = vmatmul.msk.f32.vlgmr.msrb.gmra.mxu3 %vm53_vm0, %v8164_v15 }
 0x384   :  { %2722 = vmatpush.msra.mxu2 %v8224_v34  ;;  %2855 = vmatpush.msrb.mxu3 %v8300_v50 }
 0x386   :  { %2725 = vmatpush.msra.mxu2 %v8229_v35  ;;  %2861 = vmatpush.msrb.mxu3 %v8305_v52 }
 0x38b   :  { %7921 = vmatmul.msk.f32.vlgmr.msrb.gmra.mxu2 %vm53_vm0, %v8164_v15 }
 0x38c   :  { %7930 = vmatpush.msk.msrb.mxu2 %vm8170_vm4, %v8142_v46 }
 0x38e   :  { %7931 = vmatpush.msk.msrb.mxu2 %vm8166_vm3, %v8142_v46 }
 0x3e2   :  { %v2245_v40 = vpop.f32.mrf.mxu0 }
 0x3e4   :  { %v2270_v43 = vpop.f32.mrf.mxu1 }
 0x3e6   :  { %v2219_v27 = vpop.f32.mrf.mxu3 }
 0x3ea   :  { %v2349_v56 = vpop.f32.mrf.mxu0 }
 0x3ec   :  { %v2380_v12 = vpop.f32.mrf.mxu1 }
 0x3ed   :  { %v2381_v22 = vadd.f32 %v2380_v12, %v2349_v56 }
 0x3ee   :  { %v2188_v51 = vpop.f32.mrf.mxu2  ;;  %v2320_v54 = vpop.f32.mrf.mxu3 }
 0x3ef   :  { %v2220_v3 = vadd.f32 %v2219_v27, %v2188_v51 }
 0x3f1   :  { %v2246_v13 = vadd.f32 %v2245_v40, %v2220_v3  ;;  %v8769_v40 = vand.u32 4294901760, %v8762_v63  ;;  %v8772_v3 = vand.u32 4294901760, %v8765_v1 }
 0x3f2   :  { %v2458_v24 = vpop.f32.mrf.mxu0 }
 0x3f3   :  { %v2271_v2 = vadd.f32 %v2270_v43, %v2246_v13  ;;  %v3017_v13 = vsub.f32 %v8762_v63, %v8769_v40 }
 0x3f4   :  { %v2481_v33 = vpop.f32.mrf.mxu1 }
 0x3f6   :  { %v2297_v4 = vpop.f32.mrf.mxu2  ;;  %v2431_v19 = vpop.f32.mrf.mxu3 }
 0x3f7   :  { %v2298_v6 = vadd.f32 %v2297_v4, %v2271_v2  ;;  %v3023_v2 = vsub.f32 %v8765_v1, %v8772_v3  ;;  %v8789_v4 = vand.u32 4294901760, %v3017_v13 }
 0x3f9   :  { %v2321_v14 = vadd.f32 %v2320_v54, %v2298_v6  ;;  %v8794_v12 = vand.u32 4294901760, %v3023_v2 }
 0x3fa   :  { %v2567_v5 = vpop.f32.mrf.mxu0 }
 0x3fb   :  { %7912 = vst.msk [vmem:[%s9683_s1 + $0x40] sm:$0xff] %vm378_vm7, %v2321_v14 }
 0x3fc   :  { %v2592_v30 = vpop.f32.mrf.mxu1 }
 0x3fe   :  { %v2406_v26 = vpop.f32.mrf.mxu2  ;;  %v2541_v41 = vpop.f32.mrf.mxu3 }
 0x3ff   :  { %v2407_v29 = vadd.f32 %v2406_v26, %v2381_v22 }
 0x401   :  { %v2432_v31 = vadd.f32 %v2431_v19, %v2407_v29 }
 0x403   :  { %v2459_v37 = vadd.f32 %v2458_v24, %v2432_v31 }
 0x405   :  { %v2482_v48 = vadd.f32 %v2481_v33, %v2459_v37 }
 0x406   :  { %v2510_v62 = vpop.f32.mrf.mxu2  ;;  %v2642_v59 = vpop.f32.mrf.mxu3 }
 0x407   :  { %7919 = vst.msk [vmem:[%s9683_s1 + $0x48] sm:$0xff] %vm378_vm7, %v2482_v48  ;;  %v2542_v9 = vadd.f32 %v2541_v41, %v2510_v62 }
 0x409   :  { %v2568_v20 = vadd.f32 %v2567_v5, %v2542_v9 }
 0x40b   :  { %v2593_v57 = vadd.f32 %v2592_v30, %v2568_v20 }
 0x40e   :  { %v2619_v58 = vpop.f32.mrf.mxu2 }
 0x40f   :  { %v2620_v61 = vadd.f32 %v2619_v58, %v2593_v57 }
 0x411   :  { %v2643_v0 = vadd.f32 %v2642_v59, %v2620_v61 }
 0x413   :  { %v2646_v27 = vsel %vm53_vm0, %v2643_v0, 0 }
 0x414   :  { %v2666_v43 = vand.u32 4294901760, %v2646_v27 }
 0x416   :  { %v2667_v51 = vsub.f32 %v2646_v27, %v2666_v43  ;;  %2702 = vmatmul.f32.vlgmr.msra.gmra.mxu1 %v2666_v43 }
 0x417   :  { %7932 = vmatpush.msk.msra.mxu1 %vm8170_vm4, %v8142_v46 }
 0x418   :  { %2728 = vmatmul.f32.vlgmr.msra.gmra.mxu2 %v2667_v51  ;;  %v2668_v54 = vand.u32 4294901760, %v2667_v51 }
 0x419   :  { %2935 = vmatpush.msra.mxu2 %v8285_v47  ;;  %7933 = vmatpush.msk.msra.mxu1 %vm8166_vm3, %v8142_v46 }
 0x41a   :  { %2753 = vmatmul.f32.vlgmr.msra.gmra.mxu3 %v2668_v54  ;;  %v2669_v56 = vsub.f32 %v2667_v51, %v2668_v54 }
 0x41b   :  { %7934 = vmatpush.msk.msra.mxu3 %vm8170_vm4, %v8142_v46  ;;  %2939 = vmatpush.msra.mxu2 %v8297_v49 }
 0x41c   :  { %v2670_v6 = vand.u32 4294901760, %v2669_v56 }
 0x41d   :  { %7935 = vmatpush.msk.msra.mxu3 %vm8166_vm3, %v8142_v46 }
 0x41e   :  { %2671 = vmatmul.f32.vlgmr.msra.gmra.mxu0 %v2670_v6  ;;  %2803 = vmatmul.f32.vlgmr.msrb.gmra.mxu1 %v2666_v43 }
 0x41f   :  { %2883 = vmatpush.msra.mxu0 %v8261_v44  ;;  %3019 = vmatpush.msrb.mxu1 %v8789_v4 }
 0x420   :  { %2832 = vmatmul.f32.vlgmr.msrb.gmra.mxu2 %v2670_v6 }
 0x421   :  { %2886 = vmatpush.msra.mxu0 %v8264_v45  ;;  %3047 = vmatpush.msrb.mxu2 %v8762_v63 }
 0x422   :  { %2863 = vmatmul.f32.vlgmr.msrb.gmra.mxu3 %v2666_v43  ;;  %3025 = vmatpush.msrb.mxu1 %v8794_v12 }
 0x423   :  { %3072 = vmatpush.msrb.mxu3 %v8757_v53  ;;  %3050 = vmatpush.msrb.mxu2 %v8765_v1 }
 0x425   :  { %3074 = vmatpush.msrb.mxu3 %v8759_v60 }
 0x426   :  { %2780 = vmatmul.f32.vlgmr.msrb.gmra.mxu0 %v2666_v43  ;;  %2914 = vmatmul.f32.vlgmr.msra.gmra.mxu1 %v2668_v54 }
 0x427   :  { %2988 = vmatpush.msrb.mxu0 %v8757_v53  ;;  %3124 = vmatpush.msra.mxu1 %v8757_v53 }
 0x428   :  { %2941 = vmatmul.f32.vlgmr.msra.gmra.mxu2 %v2666_v43 }
 0x429   :  { %2990 = vmatpush.msrb.mxu0 %v8759_v60  ;;  %3126 = vmatpush.msra.mxu1 %v8759_v60 }
 0x42a   :  { %2964 = vmatmul.f32.vlgmr.msra.gmra.mxu3 %v2666_v43  ;;  %7940 = vmatpush.msk.msra.mxu2 %vm8184_vm5, %v8142_v46 }
 0x42b   :  { %3181 = vmatpush.msra.mxu3 %v8250_v39 }
 0x42c   :  { %7941 = vmatpush.msk.msra.mxu2 %vm8199_vm6, %v8142_v46 }
 0x42d   :  { %3187 = vmatpush.msra.mxu3 %v8257_v42 }
 0x42e   :  { %2889 = vmatmul.f32.vlgmr.msra.gmra.mxu0 %v2667_v51  ;;  %7937 = vmatmul.msk.f32.vlgmr.msrb.gmra.mxu1 %vm53_vm0, %v8156_v10 }
 0x42f   :  { %3099 = vmatpush.msra.mxu0 %v8769_v40  ;;  %7942 = vmatpush.msk.msrb.mxu1 %vm8184_vm5, %v8142_v46 }
 0x430   :  { %3053 = vmatmul.f32.vlgmr.msrb.gmra.mxu2 %v8174_v18 }
 0x431   :  { %3103 = vmatpush.msra.mxu0 %v8772_v3  ;;  %7943 = vmatpush.msk.msrb.mxu1 %vm8199_vm6, %v8142_v46 }
 0x432   :  { %3078 = vmatmul.f32.vlgmr.msrb.gmra.mxu3 %v8194_v23  ;;  %3261 = vmatpush.msrb.mxu2 %v8243_v36 }
 0x433   :  { %7944 = vmatpush.msk.msrb.mxu3 %vm8184_vm5, %v8142_v46 }
 0x434   :  { %3265 = vmatpush.msrb.mxu2 %v8248_v38 }
 0x435   :  { %7945 = vmatpush.msk.msrb.mxu3 %vm8199_vm6, %v8142_v46 }
 0x436   :  { %2996 = vmatmul.f32.vlgmr.msrb.gmra.mxu0 %v8220_v32  ;;  %7939 = vmatmul.msk.f32.vlgmr.msra.gmra.mxu1 %vm53_vm0, %v8156_v10 }
 0x437   :  { %3209 = vmatpush.msrb.mxu0 %v8224_v34  ;;  %3342 = vmatpush.msra.mxu1 %v8300_v50 }
 0x439   :  { %3212 = vmatpush.msrb.mxu0 %v8229_v35  ;;  %3348 = vmatpush.msra.mxu1 %v8305_v52 }
 0x43e   :  { %7938 = vmatmul.msk.f32.vlgmr.msra.gmra.mxu0 %vm53_vm0, %v8156_v10 }
 0x43f   :  { %7947 = vmatpush.msk.msra.mxu0 %vm8170_vm4, %v8142_v46 }
 0x441   :  { %7948 = vmatpush.msk.msra.mxu0 %vm8166_vm3, %v8142_v46 }
 0x493   :  { %v2703_v14 = vpop.f32.mrf.mxu1 }
 0x49b   :  { %v2672_v19 = vpop.f32.mrf.mxu0  ;;  %v2729_v22 = vpop.f32.mrf.mxu2 }
 0x49c   :  { %v2704_v24 = vadd.f32 %v2703_v14, %v2672_v19  ;;  %v2804_v31 = vpop.f32.mrf.mxu1 }
 0x49d   :  { %v2754_v26 = vpop.f32.mrf.mxu3 }
 0x49e   :  { %v2730_v29 = vadd.f32 %v2729_v22, %v2704_v24 }
 0x4a0   :  { %v2755_v33 = vadd.f32 %v2754_v26, %v2730_v29 }
 0x4a3   :  { %v2781_v37 = vpop.f32.mrf.mxu0  ;;  %v2833_v41 = vpop.f32.mrf.mxu2 }
 0x4a4   :  { %v2782_v48 = vadd.f32 %v2781_v37, %v2755_v33  ;;  %v2915_v9 = vpop.f32.mrf.mxu1 }
 0x4a5   :  { %v2864_v62 = vpop.f32.mrf.mxu3 }
 0x4a6   :  { %v2805_v5 = vadd.f32 %v2804_v31, %v2782_v48  ;;  %v2865_v20 = vadd.f32 %v2864_v62, %v2833_v41 }
 0x4a8   :  { %7929 = vst.msk [vmem:[%s9683_s1 + $0x50] sm:$0xff] %vm378_vm7, %v2805_v5 }
 0x4ab   :  { %v2890_v28 = vpop.f32.mrf.mxu0  ;;  %v2942_v30 = vpop.f32.mrf.mxu2 }
 0x4ac   :  { %v2891_v55 = vadd.f32 %v2890_v28, %v2865_v20  ;;  %v3028_v61 = vpop.f32.mrf.mxu1 }
 0x4ad   :  { %v2965_v58 = vpop.f32.mrf.mxu3 }
 0x4ae   :  { %v2916_v57 = vadd.f32 %v2915_v9, %v2891_v55 }
 0x4b0   :  { %v2943_v59 = vadd.f32 %v2942_v30, %v2916_v57 }
 0x4b2   :  { %v2966_v0 = vadd.f32 %v2965_v58, %v2943_v59 }
 0x4b3   :  { %v2997_v27 = vpop.f32.mrf.mxu0  ;;  %v3054_v43 = vpop.f32.mrf.mxu2 }
 0x4b4   :  { %7936 = vst.msk [vmem:[%s9683_s1 + $0x58] sm:$0xff] %vm378_vm7, %v2966_v0  ;;  %v3029_v51 = vadd.f32 %v3028_v61, %v2997_v27  ;;  %v3129_v6 = vpop.f32.mrf.mxu1 }
 0x4b5   :  { %v3079_v54 = vpop.f32.mrf.mxu3 }
 0x4b6   :  { %v3055_v13 = vadd.f32 %v3054_v43, %v3029_v51 }
 0x4b8   :  { %v3080_v56 = vadd.f32 %v3079_v54, %v3055_v13  ;;  %v3943_v54 = vld [vmem:[#allocation2 + $0x48] sm:$0xff] }
 0x4bb   :  { %v3106_v2 = vpop.f32.mrf.mxu0 }
 0x4bc   :  { %v3107_v14 = vadd.f32 %v3106_v2, %v3080_v56  ;;  %v8937_v2 = vand.u32 4294901760, %v3943_v54 }
 0x4be   :  { %v3130_v19 = vadd.f32 %v3129_v6, %v3107_v14  ;;  %v3942_v6 = vld [vmem:[#allocation2 + $0x40] sm:$0xff] }
 0x4c0   :  { %v3133_v22 = vsel %vm53_vm0, %v3130_v19, 0 }
 0x4c1   :  { %v3153_v24 = vand.u32 4294901760, %v3133_v22 }
 0x4c3   :  { %v3154_v26 = vsub.f32 %v3133_v22, %v3153_v24  ;;  %3189 = vmatmul.f32.vlgmr.msra.gmra.mxu3 %v3153_v24 }
 0x4c4   :  { %7949 = vmatpush.msk.msra.mxu3 %vm8170_vm4, %v8142_v46 }
 0x4c5   :  { %3215 = vmatmul.f32.vlgmr.msrb.gmra.mxu0 %v3154_v26  ;;  %v3155_v29 = vand.u32 4294901760, %v3154_v26 }
 0x4c6   :  { %7950 = vmatpush.msk.msra.mxu3 %vm8166_vm3, %v8142_v46  ;;  %3422 = vmatpush.msrb.mxu0 %v8285_v47 }
 0x4c7   :  { %3240 = vmatmul.f32.vlgmr.msrb.gmra.mxu1 %v3155_v29  ;;  %v3156_v31 = vsub.f32 %v3154_v26, %v3155_v29 }
 0x4c8   :  { %3426 = vmatpush.msrb.mxu0 %v8297_v49  ;;  %7951 = vmatpush.msk.msrb.mxu1 %vm8170_vm4, %v8142_v46 }
 0x4c9   :  { %v3157_v33 = vand.u32 4294901760, %v3156_v31 }
 0x4ca   :  { %7952 = vmatpush.msk.msrb.mxu1 %vm8166_vm3, %v8142_v46 }
 0x4cb   :  { %3158 = vmatmul.f32.vlgmr.msra.gmra.mxu2 %v3157_v33  ;;  %3290 = vmatmul.f32.vlgmr.msrb.gmra.mxu3 %v3153_v24 }
 0x4cc   :  { %3370 = vmatpush.msra.mxu2 %v8261_v44  ;;  %3503 = vmatpush.msrb.mxu3 %v8789_v4 }
 0x4cd   :  { %3319 = vmatmul.f32.vlgmr.msra.gmra.mxu0 %v3157_v33 }
 0x4ce   :  { %3373 = vmatpush.msra.mxu2 %v8264_v45  ;;  %3509 = vmatpush.msrb.mxu3 %v8794_v12 }
 0x4cf   :  { %3350 = vmatmul.f32.vlgmr.msra.gmra.mxu1 %v3153_v24  ;;  %3531 = vmatpush.msra.mxu0 %v8762_v63 }
 0x4d0   :  { %3556 = vmatpush.msra.mxu1 %v8757_v53 }
 0x4d1   :  { %3534 = vmatpush.msra.mxu0 %v8765_v1 }
 0x4d2   :  { %3558 = vmatpush.msra.mxu1 %v8759_v60 }
 0x4d3   :  { %3267 = vmatmul.f32.vlgmr.msrb.gmra.mxu2 %v3153_v24  ;;  %3401 = vmatmul.f32.vlgmr.msra.gmra.mxu3 %v3155_v29  ;;  %v8942_v29 = vsub.f32 %v3943_v54, %v8937_v2 }
 0x4d4   :  { %3472 = vmatpush.msrb.mxu2 %v8757_v53  ;;  %3608 = vmatpush.msra.mxu3 %v8757_v53 }
 0x4d5   :  { %3428 = vmatmul.f32.vlgmr.msrb.gmra.mxu0 %v3153_v24 }
 0x4d6   :  { %3474 = vmatpush.msrb.mxu2 %v8759_v60  ;;  %3610 = vmatpush.msra.mxu3 %v8759_v60 }
 0x4d7   :  { %3451 = vmatmul.f32.vlgmr.msrb.gmra.mxu1 %v3153_v24  ;;  %7957 = vmatpush.msk.msrb.mxu0 %vm8184_vm5, %v8142_v46  ;;  %v8939_v24 = vand.u32 4294901760, %v3942_v6 }
 0x4d8   :  { %3665 = vmatpush.msrb.mxu1 %v8250_v39 }
 0x4d9   :  { %7958 = vmatpush.msk.msrb.mxu0 %vm8199_vm6, %v8142_v46  ;;  %v8945_v33 = vsub.f32 %v3942_v6, %v8939_v24 }
 0x4da   :  { %3671 = vmatpush.msrb.mxu1 %v8257_v42 }
 0x4db   :  { %3376 = vmatmul.f32.vlgmr.msra.gmra.mxu2 %v3154_v26  ;;  %7954 = vmatmul.msk.f32.vlgmr.msrb.gmra.mxu3 %vm53_vm0, %v8164_v15 }
 0x4dc   :  { %3583 = vmatpush.msra.mxu2 %v8769_v40  ;;  %7959 = vmatpush.msk.msrb.mxu3 %vm8184_vm5, %v8142_v46 }
 0x4dd   :  { %3537 = vmatmul.f32.vlgmr.msra.gmra.mxu0 %v8333_v7 }
 0x4de   :  { %3587 = vmatpush.msra.mxu2 %v8772_v3  ;;  %7960 = vmatpush.msk.msrb.mxu3 %vm8199_vm6, %v8142_v46 }
 0x4df   :  { %3562 = vmatmul.f32.vlgmr.msra.gmra.mxu1 %v8340_v8  ;;  %3745 = vmatpush.msra.mxu0 %v8243_v36 }
 0x4e0   :  { %7961 = vmatpush.msk.msra.mxu1 %vm8184_vm5, %v8142_v46 }
 0x4e1   :  { %3749 = vmatpush.msra.mxu0 %v8248_v38 }
 0x4e2   :  { %7962 = vmatpush.msk.msra.mxu1 %vm8199_vm6, %v8142_v46 }
 0x4e3   :  { %3480 = vmatmul.f32.vlgmr.msrb.gmra.mxu2 %v8363_v11  ;;  %7956 = vmatmul.msk.f32.vlgmr.msra.gmra.mxu3 %vm53_vm0, %v8164_v15 }
 0x4e4   :  { %3693 = vmatpush.msrb.mxu2 %v8224_v34  ;;  %3826 = vmatpush.msra.mxu3 %v8300_v50 }
 0x4e6   :  { %3696 = vmatpush.msrb.mxu2 %v8229_v35  ;;  %3832 = vmatpush.msra.mxu3 %v8305_v52 }
 0x4eb   :  { %7955 = vmatmul.msk.f32.vlgmr.msra.gmra.mxu2 %vm53_vm0, %v8164_v15 }
 0x4ec   :  { %7964 = vmatpush.msk.msra.mxu2 %vm8170_vm4, %v8142_v46 }
 0x4ee   :  { %7965 = vmatpush.msk.msra.mxu2 %vm8166_vm3, %v8142_v46 }
 0x542   :  { %v3216_v60 = vpop.f32.mrf.mxu0 }
 0x544   :  { %v3241_v63 = vpop.f32.mrf.mxu1 }
 0x546   :  { %v3190_v53 = vpop.f32.mrf.mxu3 }
 0x54a   :  { %v3320_v12 = vpop.f32.mrf.mxu0 }
 0x54c   :  { %v3351_v62 = vpop.f32.mrf.mxu1 }
 0x54d   :  { %v3352_v20 = vadd.f32 %v3351_v62, %v3320_v12 }
 0x54e   :  { %v3159_v1 = vpop.f32.mrf.mxu2  ;;  %v3291_v4 = vpop.f32.mrf.mxu3 }
 0x54f   :  { %v3191_v40 = vadd.f32 %v3190_v53, %v3159_v1 }
 0x551   :  { %v3217_v3 = vadd.f32 %v3216_v60, %v3191_v40  ;;  %v8949_v60 = vand.u32 4294901760, %v8942_v29  ;;  %v8952_v40 = vand.u32 4294901760, %v8945_v33 }
 0x552   :  { %v3429_v28 = vpop.f32.mrf.mxu0 }
 0x553   :  { %v3242_v37 = vadd.f32 %v3241_v63, %v3217_v3  ;;  %v3988_v3 = vsub.f32 %v8942_v29, %v8949_v60 }
 0x554   :  { %v3452_v58 = vpop.f32.mrf.mxu1 }
 0x556   :  { %v3268_v41 = vpop.f32.mrf.mxu2  ;;  %v3402_v9 = vpop.f32.mrf.mxu3 }
 0x557   :  { %v3269_v48 = vadd.f32 %v3268_v41, %v3242_v37  ;;  %v3994_v37 = vsub.f32 %v8945_v33, %v8952_v40  ;;  %v8969_v41 = vand.u32 4294901760, %v3988_v3 }
 0x559   :  { %v3292_v5 = vadd.f32 %v3291_v4, %v3269_v48  ;;  %v8974_v62 = vand.u32 4294901760, %v3994_v37 }
 0x55a   :  { %v3538_v43 = vpop.f32.mrf.mxu0 }
 0x55b   :  { %7946 = vst.msk [vmem:[%s9683_s1 + $0x60] sm:$0xff] %vm378_vm7, %v3292_v5 }
 0x55c   :  { %v3563_v56 = vpop.f32.mrf.mxu1 }
 0x55e   :  { %v3377_v30 = vpop.f32.mrf.mxu2  ;;  %v3512_v61 = vpop.f32.mrf.mxu3 }
 0x55f   :  { %v3378_v55 = vadd.f32 %v3377_v30, %v3352_v20 }
 0x561   :  { %v3403_v57 = vadd.f32 %v3402_v9, %v3378_v55 }
 0x563   :  { %v3430_v59 = vadd.f32 %v3429_v28, %v3403_v57 }
 0x565   :  { %v3453_v0 = vadd.f32 %v3452_v58, %v3430_v59 }
 0x566   :  { %v3481_v27 = vpop.f32.mrf.mxu2  ;;  %v3613_v22 = vpop.f32.mrf.mxu3 }
 0x567   :  { %7953 = vst.msk [vmem:[%s9683_s1 + $0x68] sm:$0xff] %vm378_vm7, %v3453_v0  ;;  %v3513_v51 = vadd.f32 %v3512_v61, %v3481_v27 }
 0x569   :  { %v3539_v13 = vadd.f32 %v3538_v43, %v3513_v51 }
 0x56b   :  { %v3564_v14 = vadd.f32 %v3563_v56, %v3539_v13 }
 0x56e   :  { %v3590_v19 = vpop.f32.mrf.mxu2 }
 0x56f   :  { %v3591_v26 = vadd.f32 %v3590_v19, %v3564_v14 }
 0x571   :  { %v3614_v31 = vadd.f32 %v3613_v22, %v3591_v26 }
 0x573   :  { %v3617_v53 = vsel %vm53_vm0, %v3614_v31, 0 }
 0x574   :  { %v3637_v63 = vand.u32 4294901760, %v3617_v53 }
 0x576   :  { %v3638_v1 = vsub.f32 %v3617_v53, %v3637_v63  ;;  %3673 = vmatmul.f32.vlgmr.msrb.gmra.mxu1 %v3637_v63 }
 0x577   :  { %7966 = vmatpush.msk.msrb.mxu1 %vm8170_vm4, %v8142_v46 }
 0x578   :  { %3699 = vmatmul.f32.vlgmr.msrb.gmra.mxu2 %v3638_v1  ;;  %v3639_v4 = vand.u32 4294901760, %v3638_v1 }
 0x579   :  { %3906 = vmatpush.msrb.mxu2 %v8285_v47  ;;  %7967 = vmatpush.msk.msrb.mxu1 %vm8166_vm3, %v8142_v46 }
 0x57a   :  { %3724 = vmatmul.f32.vlgmr.msrb.gmra.mxu3 %v3639_v4  ;;  %v3640_v12 = vsub.f32 %v3638_v1, %v3639_v4 }
 0x57b   :  { %7968 = vmatpush.msk.msrb.mxu3 %vm8170_vm4, %v8142_v46  ;;  %3910 = vmatpush.msrb.mxu2 %v8297_v49 }
 0x57c   :  { %v3641_v48 = vand.u32 4294901760, %v3640_v12 }
 0x57d   :  { %7969 = vmatpush.msk.msrb.mxu3 %vm8166_vm3, %v8142_v46 }
 0x57e   :  { %3642 = vmatmul.f32.vlgmr.msrb.gmra.mxu0 %v3641_v48  ;;  %3774 = vmatmul.f32.vlgmr.msra.gmra.mxu1 %v3637_v63 }
 0x57f   :  { %3854 = vmatpush.msrb.mxu0 %v8261_v44  ;;  %3990 = vmatpush.msra.mxu1 %v8969_v41 }
 0x580   :  { %3803 = vmatmul.f32.vlgmr.msra.gmra.mxu2 %v3641_v48 }
 0x581   :  { %3857 = vmatpush.msrb.mxu0 %v8264_v45  ;;  %4018 = vmatpush.msra.mxu2 %v8942_v29 }
 0x582   :  { %3834 = vmatmul.f32.vlgmr.msra.gmra.mxu3 %v3637_v63  ;;  %3996 = vmatpush.msra.mxu1 %v8974_v62 }
 0x583   :  { %4043 = vmatpush.msra.mxu3 %v8937_v2  ;;  %4021 = vmatpush.msra.mxu2 %v8945_v33 }
 0x585   :  { %4045 = vmatpush.msra.mxu3 %v8939_v24 }
 0x586   :  { %3751 = vmatmul.f32.vlgmr.msra.gmra.mxu0 %v3637_v63  ;;  %3885 = vmatmul.f32.vlgmr.msrb.gmra.mxu1 %v3639_v4 }
 0x587   :  { %3959 = vmatpush.msra.mxu0 %v8937_v2  ;;  %4095 = vmatpush.msrb.mxu1 %v8937_v2 }
 0x588   :  { %3912 = vmatmul.f32.vlgmr.msrb.gmra.mxu2 %v3637_v63 }
 0x589   :  { %3961 = vmatpush.msra.mxu0 %v8939_v24  ;;  %4097 = vmatpush.msrb.mxu1 %v8939_v24 }
 0x58a   :  { %3935 = vmatmul.f32.vlgmr.msrb.gmra.mxu3 %v3637_v63  ;;  %7974 = vmatpush.msk.msrb.mxu2 %vm8184_vm5, %v8142_v46 }
 0x58b   :  { %4152 = vmatpush.msrb.mxu3 %v8250_v39 }
 0x58c   :  { %7975 = vmatpush.msk.msrb.mxu2 %vm8199_vm6, %v8142_v46 }
 0x58d   :  { %4158 = vmatpush.msrb.mxu3 %v8257_v42 }
 0x58e   :  { %3860 = vmatmul.f32.vlgmr.msrb.gmra.mxu0 %v3638_v1  ;;  %7971 = vmatmul.msk.f32.vlgmr.msra.gmra.mxu1 %vm53_vm0, %v8156_v10 }
 0x58f   :  { %4070 = vmatpush.msrb.mxu0 %v8949_v60  ;;  %7976 = vmatpush.msk.msra.mxu1 %vm8184_vm5, %v8142_v46 }
 0x590   :  { %4024 = vmatmul.f32.vlgmr.msra.gmra.mxu2 %v8174_v18 }
 0x591   :  { %4074 = vmatpush.msrb.mxu0 %v8952_v40  ;;  %7977 = vmatpush.msk.msra.mxu1 %vm8199_vm6, %v8142_v46 }
 0x592   :  { %4049 = vmatmul.f32.vlgmr.msra.gmra.mxu3 %v8194_v23  ;;  %4232 = vmatpush.msra.mxu2 %v8243_v36 }
 0x593   :  { %7978 = vmatpush.msk.msra.mxu3 %vm8184_vm5, %v8142_v46 }
 0x594   :  { %4236 = vmatpush.msra.mxu2 %v8248_v38 }
 0x595   :  { %7979 = vmatpush.msk.msra.mxu3 %vm8199_vm6, %v8142_v46 }
 0x596   :  { %3967 = vmatmul.f32.vlgmr.msra.gmra.mxu0 %v8220_v32  ;;  %7973 = vmatmul.msk.f32.vlgmr.msrb.gmra.mxu1 %vm53_vm0, %v8156_v10 }
 0x597   :  { %4180 = vmatpush.msra.mxu0 %v8224_v34  ;;  %4313 = vmatpush.msrb.mxu1 %v8300_v50 }
 0x599   :  { %4183 = vmatpush.msra.mxu0 %v8229_v35  ;;  %4319 = vmatpush.msrb.mxu1 %v8305_v52 }
 0x59e   :  { %7972 = vmatmul.msk.f32.vlgmr.msrb.gmra.mxu0 %vm53_vm0, %v8156_v10 }
 0x59f   :  { %7981 = vmatpush.msk.msrb.mxu0 %vm8170_vm4, %v8142_v46 }
 0x5a1   :  { %7982 = vmatpush.msk.msrb.mxu0 %vm8166_vm3, %v8142_v46 }
 0x5f3   :  { %v3674_v5 = vpop.f32.mrf.mxu1 }
 0x5fb   :  { %v3643_v9 = vpop.f32.mrf.mxu0  ;;  %v3700_v20 = vpop.f32.mrf.mxu2 }
 0x5fc   :  { %v3675_v28 = vadd.f32 %v3674_v5, %v3643_v9  ;;  %v3775_v57 = vpop.f32.mrf.mxu1 }
 0x5fd   :  { %v3725_v30 = vpop.f32.mrf.mxu3 }
 0x5fe   :  { %v3701_v55 = vadd.f32 %v3700_v20, %v3675_v28 }
 0x600   :  { %v3726_v58 = vadd.f32 %v3725_v30, %v3701_v55 }
 0x603   :  { %v3752_v59 = vpop.f32.mrf.mxu0  ;;  %v3804_v61 = vpop.f32.mrf.mxu2 }
 0x604   :  { %v3753_v0 = vadd.f32 %v3752_v59, %v3726_v58  ;;  %v3886_v51 = vpop.f32.mrf.mxu1 }
 0x605   :  { %v3835_v27 = vpop.f32.mrf.mxu3 }
 0x606   :  { %v3776_v43 = vadd.f32 %v3775_v57, %v3753_v0  ;;  %v3836_v13 = vadd.f32 %v3835_v27, %v3804_v61 }
 0x608   :  { %7963 = vst.msk [vmem:[%s9683_s1 + $0x70] sm:$0xff] %vm378_vm7, %v3776_v43 }
 0x60b   :  { %v3861_v54 = vpop.f32.mrf.mxu0  ;;  %v3913_v56 = vpop.f32.mrf.mxu2 }
 0x60c   :  { %v3862_v6 = vadd.f32 %v3861_v54, %v3836_v13  ;;  %v3999_v26 = vpop.f32.mrf.mxu1 }
 0x60d   :  { %v3936_v19 = vpop.f32.mrf.mxu3 }
 0x60e   :  { %v3887_v14 = vadd.f32 %v3886_v51, %v3862_v6 }
 0x610   :  { %v3914_v22 = vadd.f32 %v3913_v56, %v3887_v14 }
 0x612   :  { %v3937_v31 = vadd.f32 %v3936_v19, %v3914_v22 }
 0x613   :  { %v3968_v53 = vpop.f32.mrf.mxu0  ;;  %v4025_v63 = vpop.f32.mrf.mxu2 }
 0x614   :  { %7970 = vst.msk [vmem:[%s9683_s1 + $0x78] sm:$0xff] %vm378_vm7, %v3937_v31  ;;  %v4000_v1 = vadd.f32 %v3999_v26, %v3968_v53  ;;  %v4100_v48 = vpop.f32.mrf.mxu1 }
 0x615   :  { %v4050_v4 = vpop.f32.mrf.mxu3 }
 0x616   :  { %v4026_v3 = vadd.f32 %v4025_v63, %v4000_v1 }
 0x618   :  { %v4051_v12 = vadd.f32 %v4050_v4, %v4026_v3  ;;  %v4914_v4 = vld [vmem:[#allocation2 + $0x58] sm:$0xff] }
 0x61b   :  { %v4077_v37 = vpop.f32.mrf.mxu0 }
 0x61c   :  { %v4078_v5 = vadd.f32 %v4077_v37, %v4051_v12  ;;  %v9117_v37 = vand.u32 4294901760, %v4914_v4 }
 0x61e   :  { %v4101_v9 = vadd.f32 %v4100_v48, %v4078_v5  ;;  %v4913_v48 = vld [vmem:[#allocation2 + $0x50] sm:$0xff] }
 0x620   :  { %v4104_v20 = vsel %vm53_vm0, %v4101_v9, 0 }
 0x621   :  { %v4124_v28 = vand.u32 4294901760, %v4104_v20 }
 0x623   :  { %v4125_v30 = vsub.f32 %v4104_v20, %v4124_v28  ;;  %4160 = vmatmul.f32.vlgmr.msrb.gmra.mxu3 %v4124_v28 }
 0x624   :  { %7983 = vmatpush.msk.msrb.mxu3 %vm8170_vm4, %v8142_v46 }
 0x625   :  { %4186 = vmatmul.f32.vlgmr.msra.gmra.mxu0 %v4125_v30  ;;  %v4126_v55 = vand.u32 4294901760, %v4125_v30 }
 0x626   :  { %7984 = vmatpush.msk.msrb.mxu3 %vm8166_vm3, %v8142_v46  ;;  %4393 = vmatpush.msra.mxu0 %v8285_v47 }
 0x627   :  { %4211 = vmatmul.f32.vlgmr.msra.gmra.mxu1 %v4126_v55  ;;  %v4127_v57 = vsub.f32 %v4125_v30, %v4126_v55 }
 0x628   :  { %4397 = vmatpush.msra.mxu0 %v8297_v49  ;;  %7985 = vmatpush.msk.msra.mxu1 %vm8170_vm4, %v8142_v46 }
 0x629   :  { %v4128_v58 = vand.u32 4294901760, %v4127_v57 }
 0x62a   :  { %7986 = vmatpush.msk.msra.mxu1 %vm8166_vm3, %v8142_v46 }
 0x62b   :  { %4129 = vmatmul.f32.vlgmr.msrb.gmra.mxu2 %v4128_v58  ;;  %4261 = vmatmul.f32.vlgmr.msra.gmra.mxu3 %v4124_v28 }
 0x62c   :  { %4341 = vmatpush.msrb.mxu2 %v8261_v44  ;;  %4474 = vmatpush.msra.mxu3 %v8969_v41 }
 0x62d   :  { %4290 = vmatmul.f32.vlgmr.msrb.gmra.mxu0 %v4128_v58 }
 0x62e   :  { %4344 = vmatpush.msrb.mxu2 %v8264_v45  ;;  %4480 = vmatpush.msra.mxu3 %v8974_v62 }
 0x62f   :  { %4321 = vmatmul.f32.vlgmr.msrb.gmra.mxu1 %v4124_v28  ;;  %4502 = vmatpush.msrb.mxu0 %v8942_v29 }
 0x630   :  { %4527 = vmatpush.msrb.mxu1 %v8937_v2 }
 0x631   :  { %4505 = vmatpush.msrb.mxu0 %v8945_v33 }
 0x632   :  { %4529 = vmatpush.msrb.mxu1 %v8939_v24 }
 0x633   :  { %4238 = vmatmul.f32.vlgmr.msra.gmra.mxu2 %v4124_v28  ;;  %4372 = vmatmul.f32.vlgmr.msrb.gmra.mxu3 %v4126_v55  ;;  %v9122_v55 = vsub.f32 %v4914_v4, %v9117_v37 }
 0x634   :  { %4443 = vmatpush.msra.mxu2 %v8937_v2  ;;  %4579 = vmatpush.msrb.mxu3 %v8937_v2 }
 0x635   :  { %4399 = vmatmul.f32.vlgmr.msra.gmra.mxu0 %v4124_v28 }
 0x636   :  { %4445 = vmatpush.msra.mxu2 %v8939_v24  ;;  %4581 = vmatpush.msrb.mxu3 %v8939_v24 }
 0x637   :  { %4422 = vmatmul.f32.vlgmr.msra.gmra.mxu1 %v4124_v28  ;;  %7991 = vmatpush.msk.msra.mxu0 %vm8184_vm5, %v8142_v46  ;;  %v9119_v28 = vand.u32 4294901760, %v4913_v48 }
 0x638   :  { %4636 = vmatpush.msra.mxu1 %v8250_v39 }
 0x639   :  { %7992 = vmatpush.msk.msra.mxu0 %vm8199_vm6, %v8142_v46  ;;  %v9125_v58 = vsub.f32 %v4913_v48, %v9119_v28 }
 0x63a   :  { %4642 = vmatpush.msra.mxu1 %v8257_v42 }
 0x63b   :  { %4347 = vmatmul.f32.vlgmr.msrb.gmra.mxu2 %v4125_v30  ;;  %7988 = vmatmul.msk.f32.vlgmr.msra.gmra.mxu3 %vm53_vm0, %v8164_v15 }
 0x63c   :  { %4554 = vmatpush.msrb.mxu2 %v8949_v60  ;;  %7993 = vmatpush.msk.msra.mxu3 %vm8184_vm5, %v8142_v46 }
 0x63d   :  { %4508 = vmatmul.f32.vlgmr.msrb.gmra.mxu0 %v8333_v7 }
 0x63e   :  { %4558 = vmatpush.msrb.mxu2 %v8952_v40  ;;  %7994 = vmatpush.msk.msra.mxu3 %vm8199_vm6, %v8142_v46 }
 0x63f   :  { %4533 = vmatmul.f32.vlgmr.msrb.gmra.mxu1 %v8340_v8  ;;  %4716 = vmatpush.msrb.mxu0 %v8243_v36 }
 0x640   :  { %7995 = vmatpush.msk.msrb.mxu1 %vm8184_vm5, %v8142_v46 }
 0x641   :  { %4720 = vmatpush.msrb.mxu0 %v8248_v38 }
 0x642   :  { %7996 = vmatpush.msk.msrb.mxu1 %vm8199_vm6, %v8142_v46 }
 0x643   :  { %4451 = vmatmul.f32.vlgmr.msra.gmra.mxu2 %v8363_v11  ;;  %7990 = vmatmul.msk.f32.vlgmr.msrb.gmra.mxu3 %vm53_vm0, %v8164_v15 }
 0x644   :  { %4664 = vmatpush.msra.mxu2 %v8224_v34  ;;  %4797 = vmatpush.msrb.mxu3 %v8300_v50 }
 0x646   :  { %4667 = vmatpush.msra.mxu2 %v8229_v35  ;;  %4803 = vmatpush.msrb.mxu3 %v8305_v52 }
 0x64b   :  { %7989 = vmatmul.msk.f32.vlgmr.msrb.gmra.mxu2 %vm53_vm0, %v8164_v15 }
 0x64c   :  { %7998 = vmatpush.msk.msrb.mxu2 %vm8170_vm4, %v8142_v46 }
 0x64e   :  { %7999 = vmatpush.msk.msrb.mxu2 %vm8166_vm3, %v8142_v46 }
 0x6a2   :  { %v4187_v24 = vpop.f32.mrf.mxu0 }
 0x6a4   :  { %v4212_v29 = vpop.f32.mrf.mxu1 }
 0x6a6   :  { %v4161_v2 = vpop.f32.mrf.mxu3 }
 0x6aa   :  { %v4291_v62 = vpop.f32.mrf.mxu0 }
 0x6ac   :  { %v4322_v27 = vpop.f32.mrf.mxu1 }
 0x6ad   :  { %v4323_v13 = vadd.f32 %v4322_v27, %v4291_v62 }
 0x6ae   :  { %v4130_v33 = vpop.f32.mrf.mxu2  ;;  %v4262_v41 = vpop.f32.mrf.mxu3 }
 0x6af   :  { %v4162_v60 = vadd.f32 %v4161_v2, %v4130_v33 }
 0x6b1   :  { %v4188_v40 = vadd.f32 %v4187_v24, %v4162_v60  ;;  %v9129_v24 = vand.u32 4294901760, %v9122_v55  ;;  %v9132_v60 = vand.u32 4294901760, %v9125_v58 }
 0x6b2   :  { %v4400_v54 = vpop.f32.mrf.mxu0 }
 0x6b3   :  { %v4213_v59 = vadd.f32 %v4212_v29, %v4188_v40  ;;  %v4959_v40 = vsub.f32 %v9122_v55, %v9129_v24 }
 0x6b4   :  { %v4423_v19 = vpop.f32.mrf.mxu1 }
 0x6b6   :  { %v4239_v61 = vpop.f32.mrf.mxu2  ;;  %v4373_v51 = vpop.f32.mrf.mxu3 }
 0x6b7   :  { %v4240_v0 = vadd.f32 %v4239_v61, %v4213_v59  ;;  %v4965_v59 = vsub.f32 %v9125_v58, %v9132_v60  ;;  %v9149_v61 = vand.u32 4294901760, %v4959_v40 }
 0x6b9   :  { %v4263_v43 = vadd.f32 %v4262_v41, %v4240_v0  ;;  %v9154_v27 = vand.u32 4294901760, %v4965_v59 }
 0x6ba   :  { %v4509_v63 = vpop.f32.mrf.mxu0 }
 0x6bb   :  { %7980 = vst.msk [vmem:[%s9683_s1 + $0x80] sm:$0xff] %vm378_vm7, %v4263_v43 }
 0x6bc   :  { %v4534_v12 = vpop.f32.mrf.mxu1 }
 0x6be   :  { %v4348_v56 = vpop.f32.mrf.mxu2  ;;  %v4483_v26 = vpop.f32.mrf.mxu3 }
 0x6bf   :  { %v4349_v6 = vadd.f32 %v4348_v56, %v4323_v13 }
 0x6c1   :  { %v4374_v14 = vadd.f32 %v4373_v51, %v4349_v6 }
 0x6c3   :  { %v4401_v22 = vadd.f32 %v4400_v54, %v4374_v14 }
 0x6c5   :  { %v4424_v31 = vadd.f32 %v4423_v19, %v4401_v22 }
 0x6c6   :  { %v4452_v53 = vpop.f32.mrf.mxu2  ;;  %v4584_v20 = vpop.f32.mrf.mxu3 }
 0x6c7   :  { %7987 = vst.msk [vmem:[%s9683_s1 + $0x88] sm:$0xff] %vm378_vm7, %v4424_v31  ;;  %v4484_v1 = vadd.f32 %v4483_v26, %v4452_v53 }
 0x6c9   :  { %v4510_v3 = vadd.f32 %v4509_v63, %v4484_v1 }
 0x6cb   :  { %v4535_v5 = vadd.f32 %v4534_v12, %v4510_v3 }
 0x6ce   :  { %v4561_v9 = vpop.f32.mrf.mxu2 }
 0x6cf   :  { %v4562_v30 = vadd.f32 %v4561_v9, %v4535_v5 }
 0x6d1   :  { %v4585_v57 = vadd.f32 %v4584_v20, %v4562_v30 }
 0x6d3   :  { %v4588_v2 = vsel %vm53_vm0, %v4585_v57, 0 }
 0x6d4   :  { %v4608_v29 = vand.u32 4294901760, %v4588_v2 }
 0x6d6   :  { %v4609_v33 = vsub.f32 %v4588_v2, %v4608_v29  ;;  %4644 = vmatmul.f32.vlgmr.msra.gmra.mxu1 %v4608_v29 }
 0x6d7   :  { %8000 = vmatpush.msk.msra.mxu1 %vm8170_vm4, %v8142_v46 }
 0x6d8   :  { %4670 = vmatmul.f32.vlgmr.msra.gmra.mxu2 %v4609_v33  ;;  %v4610_v41 = vand.u32 4294901760, %v4609_v33 }
 0x6d9   :  { %4877 = vmatpush.msra.mxu2 %v8285_v47  ;;  %8001 = vmatpush.msk.msra.mxu1 %vm8166_vm3, %v8142_v46 }
 0x6da   :  { %4695 = vmatmul.f32.vlgmr.msra.gmra.mxu3 %v4610_v41  ;;  %v4611_v62 = vsub.f32 %v4609_v33, %v4610_v41 }
 0x6db   :  { %8002 = vmatpush.msk.msra.mxu3 %vm8170_vm4, %v8142_v46  ;;  %4881 = vmatpush.msra.mxu2 %v8297_v49 }
 0x6dc   :  { %v4612_v0 = vand.u32 4294901760, %v4611_v62 }
 0x6dd   :  { %8003 = vmatpush.msk.msra.mxu3 %vm8166_vm3, %v8142_v46 }
 0x6de   :  { %4613 = vmatmul.f32.vlgmr.msra.gmra.mxu0 %v4612_v0  ;;  %4745 = vmatmul.f32.vlgmr.msrb.gmra.mxu1 %v4608_v29 }
 0x6df   :  { %4825 = vmatpush.msra.mxu0 %v8261_v44  ;;  %4961 = vmatpush.msrb.mxu1 %v9149_v61 }
 0x6e0   :  { %4774 = vmatmul.f32.vlgmr.msrb.gmra.mxu2 %v4612_v0 }
 0x6e1   :  { %4828 = vmatpush.msra.mxu0 %v8264_v45  ;;  %4989 = vmatpush.msrb.mxu2 %v9122_v55 }
 0x6e2   :  { %4805 = vmatmul.f32.vlgmr.msrb.gmra.mxu3 %v4608_v29  ;;  %4967 = vmatpush.msrb.mxu1 %v9154_v27 }
 0x6e3   :  { %5014 = vmatpush.msrb.mxu3 %v9117_v37  ;;  %4992 = vmatpush.msrb.mxu2 %v9125_v58 }
 0x6e5   :  { %5016 = vmatpush.msrb.mxu3 %v9119_v28 }
 0x6e6   :  { %4722 = vmatmul.f32.vlgmr.msrb.gmra.mxu0 %v4608_v29  ;;  %4856 = vmatmul.f32.vlgmr.msra.gmra.mxu1 %v4610_v41 }
 0x6e7   :  { %4930 = vmatpush.msrb.mxu0 %v9117_v37  ;;  %5066 = vmatpush.msra.mxu1 %v9117_v37 }
 0x6e8   :  { %4883 = vmatmul.f32.vlgmr.msra.gmra.mxu2 %v4608_v29 }
 0x6e9   :  { %4932 = vmatpush.msrb.mxu0 %v9119_v28  ;;  %5068 = vmatpush.msra.mxu1 %v9119_v28 }
 0x6ea   :  { %4906 = vmatmul.f32.vlgmr.msra.gmra.mxu3 %v4608_v29  ;;  %8008 = vmatpush.msk.msra.mxu2 %vm8184_vm5, %v8142_v46 }
 0x6eb   :  { %5123 = vmatpush.msra.mxu3 %v8250_v39 }
 0x6ec   :  { %8009 = vmatpush.msk.msra.mxu2 %vm8199_vm6, %v8142_v46 }
 0x6ed   :  { %5129 = vmatpush.msra.mxu3 %v8257_v42 }
 0x6ee   :  { %4831 = vmatmul.f32.vlgmr.msra.gmra.mxu0 %v4609_v33  ;;  %8005 = vmatmul.msk.f32.vlgmr.msrb.gmra.mxu1 %vm53_vm0, %v8156_v10 }
 0x6ef   :  { %5041 = vmatpush.msra.mxu0 %v9129_v24  ;;  %8010 = vmatpush.msk.msrb.mxu1 %vm8184_vm5, %v8142_v46 }
 0x6f0   :  { %4995 = vmatmul.f32.vlgmr.msrb.gmra.mxu2 %v8174_v18 }
 0x6f1   :  { %5045 = vmatpush.msra.mxu0 %v9132_v60  ;;  %8011 = vmatpush.msk.msrb.mxu1 %vm8199_vm6, %v8142_v46 }
 0x6f2   :  { %5020 = vmatmul.f32.vlgmr.msrb.gmra.mxu3 %v8194_v23  ;;  %5203 = vmatpush.msrb.mxu2 %v8243_v36 }
 0x6f3   :  { %8012 = vmatpush.msk.msrb.mxu3 %vm8184_vm5, %v8142_v46 }
 0x6f4   :  { %5207 = vmatpush.msrb.mxu2 %v8248_v38 }
 0x6f5   :  { %8013 = vmatpush.msk.msrb.mxu3 %vm8199_vm6, %v8142_v46 }
 0x6f6   :  { %4938 = vmatmul.f32.vlgmr.msrb.gmra.mxu0 %v8220_v32  ;;  %8007 = vmatmul.msk.f32.vlgmr.msra.gmra.mxu1 %vm53_vm0, %v8156_v10 }
 0x6f7   :  { %5151 = vmatpush.msrb.mxu0 %v8224_v34  ;;  %5284 = vmatpush.msra.mxu1 %v8300_v50 }
 0x6f9   :  { %5154 = vmatpush.msrb.mxu0 %v8229_v35  ;;  %5290 = vmatpush.msra.mxu1 %v8305_v52 }
 0x6fe   :  { %8006 = vmatmul.msk.f32.vlgmr.msra.gmra.mxu0 %vm53_vm0, %v8156_v10 }
 0x6ff   :  { %8015 = vmatpush.msk.msra.mxu0 %vm8170_vm4, %v8142_v46 }
 0x701   :  { %8016 = vmatpush.msk.msra.mxu0 %vm8166_vm3, %v8142_v46 }
 0x753   :  { %v4645_v43 = vpop.f32.mrf.mxu1 }
 0x75b   :  { %v4614_v51 = vpop.f32.mrf.mxu0  ;;  %v4671_v13 = vpop.f32.mrf.mxu2 }
 0x75c   :  { %v4646_v54 = vadd.f32 %v4645_v43, %v4614_v51  ;;  %v4746_v14 = vpop.f32.mrf.mxu1 }
 0x75d   :  { %v4696_v56 = vpop.f32.mrf.mxu3 }
 0x75e   :  { %v4672_v6 = vadd.f32 %v4671_v13, %v4646_v54 }
 0x760   :  { %v4697_v19 = vadd.f32 %v4696_v56, %v4672_v6 }
 0x763   :  { %v4723_v22 = vpop.f32.mrf.mxu0  ;;  %v4775_v26 = vpop.f32.mrf.mxu2 }
 0x764   :  { %v4724_v31 = vadd.f32 %v4723_v22, %v4697_v19  ;;  %v4857_v1 = vpop.f32.mrf.mxu1 }
 0x765   :  { %v4806_v53 = vpop.f32.mrf.mxu3 }
 0x766   :  { %v4747_v63 = vadd.f32 %v4746_v14, %v4724_v31  ;;  %v4807_v3 = vadd.f32 %v4806_v53, %v4775_v26 }
 0x768   :  { %7997 = vst.msk [vmem:[%s9683_s1 + $0x90] sm:$0xff] %vm378_vm7, %v4747_v63 }
 0x76b   :  { %v4832_v4 = vpop.f32.mrf.mxu0  ;;  %v4884_v12 = vpop.f32.mrf.mxu2 }
 0x76c   :  { %v4833_v48 = vadd.f32 %v4832_v4, %v4807_v3  ;;  %v4970_v30 = vpop.f32.mrf.mxu1 }
 0x76d   :  { %v4907_v9 = vpop.f32.mrf.mxu3 }
 0x76e   :  { %v4858_v5 = vadd.f32 %v4857_v1, %v4833_v48 }
 0x770   :  { %v4885_v20 = vadd.f32 %v4884_v12, %v4858_v5 }
 0x772   :  { %v4908_v57 = vadd.f32 %v4907_v9, %v4885_v20 }
 0x773   :  { %v4939_v2 = vpop.f32.mrf.mxu0  ;;  %v4996_v29 = vpop.f32.mrf.mxu2 }
 0x774   :  { %8004 = vst.msk [vmem:[%s9683_s1 + $0x98] sm:$0xff] %vm378_vm7, %v4908_v57  ;;  %v4971_v33 = vadd.f32 %v4970_v30, %v4939_v2  ;;  %v5071_v0 = vpop.f32.mrf.mxu1 }
 0x775   :  { %v5021_v41 = vpop.f32.mrf.mxu3 }
 0x776   :  { %v4997_v40 = vadd.f32 %v4996_v29, %v4971_v33 }
 0x778   :  { %v5022_v62 = vadd.f32 %v5021_v41, %v4997_v40  ;;  %v5885_v41 = vld [vmem:[#allocation2 + $0x68] sm:$0xff] }
 0x77b   :  { %v5048_v59 = vpop.f32.mrf.mxu0 }
 0x77c   :  { %v5049_v43 = vadd.f32 %v5048_v59, %v5022_v62  ;;  %v9297_v59 = vand.u32 4294901760, %v5885_v41 }
 0x77e   :  { %v5072_v51 = vadd.f32 %v5071_v0, %v5049_v43  ;;  %v5884_v0 = vld [vmem:[#allocation2 + $0x60] sm:$0xff] }
 0x780   :  { %v5075_v13 = vsel %vm53_vm0, %v5072_v51, 0 }
 0x781   :  { %v5095_v54 = vand.u32 4294901760, %v5075_v13 }
 0x783   :  { %v5096_v56 = vsub.f32 %v5075_v13, %v5095_v54  ;;  %5131 = vmatmul.f32.vlgmr.msra.gmra.mxu3 %v5095_v54 }
 0x784   :  { %8017 = vmatpush.msk.msra.mxu3 %vm8170_vm4, %v8142_v46 }
 0x785   :  { %5157 = vmatmul.f32.vlgmr.msrb.gmra.mxu0 %v5096_v56  ;;  %v5097_v6 = vand.u32 4294901760, %v5096_v56 }
 0x786   :  { %8018 = vmatpush.msk.msra.mxu3 %vm8166_vm3, %v8142_v46  ;;  %5364 = vmatpush.msrb.mxu0 %v8285_v47 }
 0x787   :  { %5182 = vmatmul.f32.vlgmr.msrb.gmra.mxu1 %v5097_v6  ;;  %v5098_v14 = vsub.f32 %v5096_v56, %v5097_v6 }
 0x788   :  { %5368 = vmatpush.msrb.mxu0 %v8297_v49  ;;  %8019 = vmatpush.msk.msrb.mxu1 %vm8170_vm4, %v8142_v46 }
 0x789   :  { %v5099_v19 = vand.u32 4294901760, %v5098_v14 }
 0x78a   :  { %8020 = vmatpush.msk.msrb.mxu1 %vm8166_vm3, %v8142_v46 }
 0x78b   :  { %5100 = vmatmul.f32.vlgmr.msra.gmra.mxu2 %v5099_v19  ;;  %5232 = vmatmul.f32.vlgmr.msrb.gmra.mxu3 %v5095_v54 }
 0x78c   :  { %5312 = vmatpush.msra.mxu2 %v8261_v44  ;;  %5445 = vmatpush.msrb.mxu3 %v9149_v61 }
 0x78d   :  { %5261 = vmatmul.f32.vlgmr.msra.gmra.mxu0 %v5099_v19 }
 0x78e   :  { %5315 = vmatpush.msra.mxu2 %v8264_v45  ;;  %5451 = vmatpush.msrb.mxu3 %v9154_v27 }
 0x78f   :  { %5292 = vmatmul.f32.vlgmr.msra.gmra.mxu1 %v5095_v54  ;;  %5473 = vmatpush.msra.mxu0 %v9122_v55 }
 0x790   :  { %5498 = vmatpush.msra.mxu1 %v9117_v37 }
 0x791   :  { %5476 = vmatpush.msra.mxu0 %v9125_v58 }
 0x792   :  { %5500 = vmatpush.msra.mxu1 %v9119_v28 }
 0x793   :  { %5209 = vmatmul.f32.vlgmr.msrb.gmra.mxu2 %v5095_v54  ;;  %5343 = vmatmul.f32.vlgmr.msra.gmra.mxu3 %v5097_v6  ;;  %v9302_v6 = vsub.f32 %v5885_v41, %v9297_v59 }
 0x794   :  { %5414 = vmatpush.msrb.mxu2 %v9117_v37  ;;  %5550 = vmatpush.msra.mxu3 %v9117_v37 }
 0x795   :  { %5370 = vmatmul.f32.vlgmr.msrb.gmra.mxu0 %v5095_v54 }
 0x796   :  { %5416 = vmatpush.msrb.mxu2 %v9119_v28  ;;  %5552 = vmatpush.msra.mxu3 %v9119_v28 }
 0x797   :  { %5393 = vmatmul.f32.vlgmr.msrb.gmra.mxu1 %v5095_v54  ;;  %8025 = vmatpush.msk.msrb.mxu0 %vm8184_vm5, %v8142_v46  ;;  %v9299_v54 = vand.u32 4294901760, %v5884_v0 }
 0x798   :  { %5607 = vmatpush.msrb.mxu1 %v8250_v39 }
 0x799   :  { %8026 = vmatpush.msk.msrb.mxu0 %vm8199_vm6, %v8142_v46  ;;  %v9305_v19 = vsub.f32 %v5884_v0, %v9299_v54 }
 0x79a   :  { %5613 = vmatpush.msrb.mxu1 %v8257_v42 }
 0x79b   :  { %5318 = vmatmul.f32.vlgmr.msra.gmra.mxu2 %v5096_v56  ;;  %8022 = vmatmul.msk.f32.vlgmr.msrb.gmra.mxu3 %vm53_vm0, %v8164_v15 }
 0x79c   :  { %5525 = vmatpush.msra.mxu2 %v9129_v24  ;;  %8027 = vmatpush.msk.msrb.mxu3 %vm8184_vm5, %v8142_v46 }
 0x79d   :  { %5479 = vmatmul.f32.vlgmr.msra.gmra.mxu0 %v8333_v7 }
 0x79e   :  { %5529 = vmatpush.msra.mxu2 %v9132_v60  ;;  %8028 = vmatpush.msk.msrb.mxu3 %vm8199_vm6, %v8142_v46 }
 0x79f   :  { %5504 = vmatmul.f32.vlgmr.msra.gmra.mxu1 %v8340_v8  ;;  %5687 = vmatpush.msra.mxu0 %v8243_v36 }
 0x7a0   :  { %8029 = vmatpush.msk.msra.mxu1 %vm8184_vm5, %v8142_v46 }
 0x7a1   :  { %5691 = vmatpush.msra.mxu0 %v8248_v38 }
 0x7a2   :  { %8030 = vmatpush.msk.msra.mxu1 %vm8199_vm6, %v8142_v46 }
 0x7a3   :  { %5422 = vmatmul.f32.vlgmr.msrb.gmra.mxu2 %v8363_v11  ;;  %8024 = vmatmul.msk.f32.vlgmr.msra.gmra.mxu3 %vm53_vm0, %v8164_v15 }
 0x7a4   :  { %5635 = vmatpush.msrb.mxu2 %v8224_v34  ;;  %5768 = vmatpush.msra.mxu3 %v8300_v50 }
 0x7a6   :  { %5638 = vmatpush.msrb.mxu2 %v8229_v35  ;;  %5774 = vmatpush.msra.mxu3 %v8305_v52 }
 0x7ab   :  { %8023 = vmatmul.msk.f32.vlgmr.msra.gmra.mxu2 %vm53_vm0, %v8164_v15 }
 0x7ac   :  { %8032 = vmatpush.msk.msra.mxu2 %vm8170_vm4, %v8142_v46 }
 0x7ae   :  { %8033 = vmatpush.msk.msra.mxu2 %vm8166_vm3, %v8142_v46 }
 0x802   :  { %v5158_v28 = vpop.f32.mrf.mxu0 }
 0x804   :  { %v5183_v55 = vpop.f32.mrf.mxu1 }
 0x806   :  { %v5132_v37 = vpop.f32.mrf.mxu3 }
 0x80a   :  { %v5262_v27 = vpop.f32.mrf.mxu0 }
 0x80c   :  { %v5293_v53 = vpop.f32.mrf.mxu1 }
 0x80d   :  { %v5294_v3 = vadd.f32 %v5293_v53, %v5262_v27 }
 0x80e   :  { %v5101_v58 = vpop.f32.mrf.mxu2  ;;  %v5233_v61 = vpop.f32.mrf.mxu3 }
 0x80f   :  { %v5133_v24 = vadd.f32 %v5132_v37, %v5101_v58 }
 0x811   :  { %v5159_v60 = vadd.f32 %v5158_v28, %v5133_v24  ;;  %v9309_v28 = vand.u32 4294901760, %v9302_v6  ;;  %v9312_v24 = vand.u32 4294901760, %v9305_v19 }
 0x812   :  { %v5371_v4 = vpop.f32.mrf.mxu0 }
 0x813   :  { %v5184_v22 = vadd.f32 %v5183_v55, %v5159_v60  ;;  %v5930_v60 = vsub.f32 %v9302_v6, %v9309_v28 }
 0x814   :  { %v5394_v9 = vpop.f32.mrf.mxu1 }
 0x816   :  { %v5210_v26 = vpop.f32.mrf.mxu2  ;;  %v5344_v1 = vpop.f32.mrf.mxu3 }
 0x817   :  { %v5211_v31 = vadd.f32 %v5210_v26, %v5184_v22  ;;  %v5936_v22 = vsub.f32 %v9305_v19, %v9312_v24  ;;  %v9329_v26 = vand.u32 4294901760, %v5930_v60 }
 0x819   :  { %v5234_v63 = vadd.f32 %v5233_v61, %v5211_v31  ;;  %v9334_v53 = vand.u32 4294901760, %v5936_v22 }
 0x81a   :  { %v5480_v29 = vpop.f32.mrf.mxu0 }
 0x81b   :  { %8014 = vst.msk [vmem:[%s9683_s1 + $0xa0] sm:$0xff] %vm378_vm7, %v5234_v63 }
 0x81c   :  { %v5505_v62 = vpop.f32.mrf.mxu1 }
 0x81e   :  { %v5319_v12 = vpop.f32.mrf.mxu2  ;;  %v5454_v30 = vpop.f32.mrf.mxu3 }
 0x81f   :  { %v5320_v48 = vadd.f32 %v5319_v12, %v5294_v3 }
 0x821   :  { %v5345_v5 = vadd.f32 %v5344_v1, %v5320_v48 }
 0x823   :  { %v5372_v20 = vadd.f32 %v5371_v4, %v5345_v5 }
 0x825   :  { %v5395_v57 = vadd.f32 %v5394_v9, %v5372_v20 }
 0x826   :  { %v5423_v2 = vpop.f32.mrf.mxu2  ;;  %v5555_v13 = vpop.f32.mrf.mxu3 }
 0x827   :  { %8021 = vst.msk [vmem:[%s9683_s1 + $0xa8] sm:$0xff] %vm378_vm7, %v5395_v57  ;;  %v5455_v33 = vadd.f32 %v5454_v30, %v5423_v2 }
 0x829   :  { %v5481_v40 = vadd.f32 %v5480_v29, %v5455_v33 }
 0x82b   :  { %v5506_v43 = vadd.f32 %v5505_v62, %v5481_v40 }
 0x82e   :  { %v5532_v51 = vpop.f32.mrf.mxu2 }
 0x82f   :  { %v5533_v56 = vadd.f32 %v5532_v51, %v5506_v43 }
 0x831   :  { %v5556_v14 = vadd.f32 %v5555_v13, %v5533_v56 }
 0x833   :  { %v5559_v37 = vsel %vm53_vm0, %v5556_v14, 0 }
 0x834   :  { %v5579_v55 = vand.u32 4294901760, %v5559_v37 }
 0x836   :  { %v5580_v58 = vsub.f32 %v5559_v37, %v5579_v55  ;;  %5615 = vmatmul.f32.vlgmr.msrb.gmra.mxu1 %v5579_v55 }
 0x837   :  { %8034 = vmatpush.msk.msrb.mxu1 %vm8170_vm4, %v8142_v46 }
 0x838   :  { %v5581_v61 = vand.u32 4294901760, %v5580_v58  ;;  %5641 = vmatmul.f32.vlgmr.msrb.gmra.mxu2 %v5580_v58 }
 0x839   :  { %5848 = vmatpush.msrb.mxu2 %v8285_v47  ;;  %8035 = vmatpush.msk.msrb.mxu1 %vm8166_vm3, %v8142_v46 }
 0x83a   :  { %v5582_v27 = vsub.f32 %v5580_v58, %v5581_v61  ;;  %5666 = vmatmul.f32.vlgmr.msrb.gmra.mxu3 %v5581_v61 }
 0x83b   :  { %8036 = vmatpush.msk.msrb.mxu3 %vm8170_vm4, %v8142_v46  ;;  %5852 = vmatpush.msrb.mxu2 %v8297_v49 }
 0x83c   :  { %v5583_v31 = vand.u32 4294901760, %v5582_v27 }
 0x83d   :  { %8037 = vmatpush.msk.msrb.mxu3 %vm8166_vm3, %v8142_v46 }
 0x83e   :  { %5584 = vmatmul.f32.vlgmr.msrb.gmra.mxu0 %v5583_v31  ;;  %5716 = vmatmul.f32.vlgmr.msra.gmra.mxu1 %v5579_v55 }
 0x83f   :  { %5796 = vmatpush.msrb.mxu0 %v8261_v44  ;;  %5932 = vmatpush.msra.mxu1 %v9329_v26 }
 0x840   :  { %5745 = vmatmul.f32.vlgmr.msra.gmra.mxu2 %v5583_v31 }
 0x841   :  { %5799 = vmatpush.msrb.mxu0 %v8264_v45  ;;  %5960 = vmatpush.msra.mxu2 %v9302_v6 }
 0x842   :  { %5776 = vmatmul.f32.vlgmr.msra.gmra.mxu3 %v5579_v55  ;;  %5938 = vmatpush.msra.mxu1 %v9334_v53 }
 0x843   :  { %5985 = vmatpush.msra.mxu3 %v9297_v59  ;;  %5963 = vmatpush.msra.mxu2 %v9305_v19 }
 0x845   :  { %5987 = vmatpush.msra.mxu3 %v9299_v54 }
 0x846   :  { %5693 = vmatmul.f32.vlgmr.msra.gmra.mxu0 %v5579_v55  ;;  %5827 = vmatmul.f32.vlgmr.msrb.gmra.mxu1 %v5581_v61 }
 0x847   :  { %5901 = vmatpush.msra.mxu0 %v9297_v59  ;;  %6037 = vmatpush.msrb.mxu1 %v9297_v59 }
 0x848   :  { %5854 = vmatmul.f32.vlgmr.msrb.gmra.mxu2 %v5579_v55 }
 0x849   :  { %5903 = vmatpush.msra.mxu0 %v9299_v54  ;;  %6039 = vmatpush.msrb.mxu1 %v9299_v54 }
 0x84a   :  { %5877 = vmatmul.f32.vlgmr.msrb.gmra.mxu3 %v5579_v55  ;;  %8042 = vmatpush.msk.msrb.mxu2 %vm8184_vm5, %v8142_v46 }
 0x84b   :  { %6094 = vmatpush.msrb.mxu3 %v8250_v39 }
 0x84c   :  { %8043 = vmatpush.msk.msrb.mxu2 %vm8199_vm6, %v8142_v46 }
 0x84d   :  { %6100 = vmatpush.msrb.mxu3 %v8257_v42 }
 0x84e   :  { %5802 = vmatmul.f32.vlgmr.msrb.gmra.mxu0 %v5580_v58  ;;  %8039 = vmatmul.msk.f32.vlgmr.msra.gmra.mxu1 %vm53_vm0, %v8156_v10 }
 0x84f   :  { %6012 = vmatpush.msrb.mxu0 %v9309_v28  ;;  %8044 = vmatpush.msk.msra.mxu1 %vm8184_vm5, %v8142_v46 }
 0x850   :  { %5966 = vmatmul.f32.vlgmr.msra.gmra.mxu2 %v8174_v18 }
 0x851   :  { %6016 = vmatpush.msrb.mxu0 %v9312_v24  ;;  %8045 = vmatpush.msk.msra.mxu1 %vm8199_vm6, %v8142_v46 }
 0x852   :  { %5991 = vmatmul.f32.vlgmr.msra.gmra.mxu3 %v8194_v23  ;;  %6174 = vmatpush.msra.mxu2 %v8243_v36 }
 0x853   :  { %8046 = vmatpush.msk.msra.mxu3 %vm8184_vm5, %v8142_v46 }
 0x854   :  { %6178 = vmatpush.msra.mxu2 %v8248_v38 }
 0x855   :  { %8047 = vmatpush.msk.msra.mxu3 %vm8199_vm6, %v8142_v46 }
 0x856   :  { %5909 = vmatmul.f32.vlgmr.msra.gmra.mxu0 %v8220_v32  ;;  %8041 = vmatmul.msk.f32.vlgmr.msrb.gmra.mxu1 %vm53_vm0, %v8156_v10 }
 0x857   :  { %6122 = vmatpush.msra.mxu0 %v8224_v34  ;;  %6255 = vmatpush.msrb.mxu1 %v8300_v50 }
 0x859   :  { %6125 = vmatpush.msra.mxu0 %v8229_v35  ;;  %6261 = vmatpush.msrb.mxu1 %v8305_v52 }
 0x85e   :  { %8040 = vmatmul.msk.f32.vlgmr.msrb.gmra.mxu0 %vm53_vm0, %v8156_v10 }
 0x85f   :  { %8049 = vmatpush.msk.msrb.mxu0 %vm8170_vm4, %v8142_v46 }
 0x861   :  { %8050 = vmatpush.msk.msrb.mxu0 %vm8166_vm3, %v8142_v46 }
 0x8b3   :  { %v5616_v63 = vpop.f32.mrf.mxu1 }
 0x8bb   :  { %v5585_v1 = vpop.f32.mrf.mxu0  ;;  %v5642_v3 = vpop.f32.mrf.mxu2 }
 0x8bc   :  { %v5617_v4 = vadd.f32 %v5616_v63, %v5585_v1  ;;  %v5717_v5 = vpop.f32.mrf.mxu1 }
 0x8bd   :  { %v5667_v12 = vpop.f32.mrf.mxu3 }
 0x8be   :  { %v5643_v48 = vadd.f32 %v5642_v3, %v5617_v4 }
 0x8c0   :  { %v5668_v9 = vadd.f32 %v5667_v12, %v5643_v48 }
 0x8c3   :  { %v5694_v20 = vpop.f32.mrf.mxu0  ;;  %v5746_v30 = vpop.f32.mrf.mxu2 }
 0x8c4   :  { %v5695_v57 = vadd.f32 %v5694_v20, %v5668_v9  ;;  %v5828_v33 = vpop.f32.mrf.mxu1 }
 0x8c5   :  { %v5777_v2 = vpop.f32.mrf.mxu3 }
 0x8c6   :  { %v5718_v29 = vadd.f32 %v5717_v5, %v5695_v57  ;;  %v5778_v40 = vadd.f32 %v5777_v2, %v5746_v30 }
 0x8c8   :  { %8031 = vst.msk [vmem:[%s9683_s1 + $0xb0] sm:$0xff] %vm378_vm7, %v5718_v29 }
 0x8cb   :  { %v5803_v41 = vpop.f32.mrf.mxu0  ;;  %v5855_v62 = vpop.f32.mrf.mxu2 }
 0x8cc   :  { %v5804_v0 = vadd.f32 %v5803_v41, %v5778_v40  ;;  %v5941_v56 = vpop.f32.mrf.mxu1 }
 0x8cd   :  { %v5878_v51 = vpop.f32.mrf.mxu3 }
 0x8ce   :  { %v5829_v43 = vadd.f32 %v5828_v33, %v5804_v0 }
 0x8d0   :  { %v5856_v13 = vadd.f32 %v5855_v62, %v5829_v43 }
 0x8d2   :  { %v5879_v14 = vadd.f32 %v5878_v51, %v5856_v13 }
 0x8d3   :  { %v5910_v37 = vpop.f32.mrf.mxu0  ;;  %v5967_v55 = vpop.f32.mrf.mxu2 }
 0x8d4   :  { %8038 = vst.msk [vmem:[%s9683_s1 + $0xb8] sm:$0xff] %vm378_vm7, %v5879_v14  ;;  %v5942_v58 = vadd.f32 %v5941_v56, %v5910_v37  ;;  %v6042_v31 = vpop.f32.mrf.mxu1 }
 0x8d5   :  { %v5992_v61 = vpop.f32.mrf.mxu3 }
 0x8d6   :  { %v5968_v60 = vadd.f32 %v5967_v55, %v5942_v58 }
 0x8d8   :  { %v5993_v27 = vadd.f32 %v5992_v61, %v5968_v60  ;;  %v6856_v61 = vld [vmem:[#allocation2 + $0x78] sm:$0xff] }
 0x8db   :  { %v6019_v22 = vpop.f32.mrf.mxu0 }
 0x8dc   :  { %v6020_v63 = vadd.f32 %v6019_v22, %v5993_v27  ;;  %v9477_v22 = vand.u32 4294901760, %v6856_v61 }
 0x8de   :  { %v6043_v1 = vadd.f32 %v6042_v31, %v6020_v63  ;;  %v6855_v31 = vld [vmem:[#allocation2 + $0x70] sm:$0xff] }
 0x8e0   :  { %v6046_v3 = vsel %vm53_vm0, %v6043_v1, 0 }
 0x8e1   :  { %v6066_v4 = vand.u32 4294901760, %v6046_v3 }
 0x8e3   :  { %v6067_v12 = vsub.f32 %v6046_v3, %v6066_v4  ;;  %6102 = vmatmul.f32.vlgmr.msrb.gmra.mxu3 %v6066_v4 }
 0x8e4   :  { %8051 = vmatpush.msk.msrb.mxu3 %vm8170_vm4, %v8142_v46 }
 0x8e5   :  { %v6068_v48 = vand.u32 4294901760, %v6067_v12  ;;  %6128 = vmatmul.f32.vlgmr.msra.gmra.mxu0 %v6067_v12 }
 0x8e6   :  { %8052 = vmatpush.msk.msrb.mxu3 %vm8166_vm3, %v8142_v46  ;;  %6335 = vmatpush.msra.mxu0 %v8285_v47 }
 0x8e7   :  { %v6069_v5 = vsub.f32 %v6067_v12, %v6068_v48  ;;  %6153 = vmatmul.f32.vlgmr.msra.gmra.mxu1 %v6068_v48 }
 0x8e8   :  { %6339 = vmatpush.msra.mxu0 %v8297_v49  ;;  %8053 = vmatpush.msk.msra.mxu1 %vm8170_vm4, %v8142_v46 }
 0x8e9   :  { %v6070_v9 = vand.u32 4294901760, %v6069_v5 }
 0x8ea   :  { %8054 = vmatpush.msk.msra.mxu1 %vm8166_vm3, %v8142_v46 }
 0x8eb   :  { %6071 = vmatmul.f32.vlgmr.msrb.gmra.mxu2 %v6070_v9  ;;  %6203 = vmatmul.f32.vlgmr.msra.gmra.mxu3 %v6066_v4 }
 0x8ec   :  { %6283 = vmatpush.msrb.mxu2 %v8261_v44  ;;  %6416 = vmatpush.msra.mxu3 %v9329_v26 }
 0x8ed   :  { %6232 = vmatmul.f32.vlgmr.msrb.gmra.mxu0 %v6070_v9 }
 0x8ee   :  { %6286 = vmatpush.msrb.mxu2 %v8264_v45  ;;  %6422 = vmatpush.msra.mxu3 %v9334_v53 }
 0x8ef   :  { %6263 = vmatmul.f32.vlgmr.msrb.gmra.mxu1 %v6066_v4  ;;  %6444 = vmatpush.msrb.mxu0 %v9302_v6 }
 0x8f0   :  { %6469 = vmatpush.msrb.mxu1 %v9297_v59 }
 0x8f1   :  { %6447 = vmatpush.msrb.mxu0 %v9305_v19 }
 0x8f2   :  { %6471 = vmatpush.msrb.mxu1 %v9299_v54 }
 0x8f3   :  { %6180 = vmatmul.f32.vlgmr.msra.gmra.mxu2 %v6066_v4  ;;  %6314 = vmatmul.f32.vlgmr.msrb.gmra.mxu3 %v6068_v48  ;;  %v9482_v48 = vsub.f32 %v6856_v61, %v9477_v22 }
 0x8f4   :  { %6385 = vmatpush.msra.mxu2 %v9297_v59  ;;  %6521 = vmatpush.msrb.mxu3 %v9297_v59 }
 0x8f5   :  { %6341 = vmatmul.f32.vlgmr.msra.gmra.mxu0 %v6066_v4 }
 0x8f6   :  { %6387 = vmatpush.msra.mxu2 %v9299_v54  ;;  %6523 = vmatpush.msrb.mxu3 %v9299_v54 }
 0x8f7   :  { %6364 = vmatmul.f32.vlgmr.msra.gmra.mxu1 %v6066_v4  ;;  %8059 = vmatpush.msk.msra.mxu0 %vm8184_vm5, %v8142_v46  ;;  %v9479_v4 = vand.u32 4294901760, %v6855_v31 }
 0x8f8   :  { %6578 = vmatpush.msra.mxu1 %v8250_v39 }
 0x8f9   :  { %8060 = vmatpush.msk.msra.mxu0 %vm8199_vm6, %v8142_v46  ;;  %v9485_v9 = vsub.f32 %v6855_v31, %v9479_v4 }
 0x8fa   :  { %6584 = vmatpush.msra.mxu1 %v8257_v42 }
 0x8fb   :  { %6289 = vmatmul.f32.vlgmr.msrb.gmra.mxu2 %v6067_v12  ;;  %8056 = vmatmul.msk.f32.vlgmr.msra.gmra.mxu3 %vm53_vm0, %v8164_v15 }
 0x8fc   :  { %6496 = vmatpush.msrb.mxu2 %v9309_v28  ;;  %8061 = vmatpush.msk.msra.mxu3 %vm8184_vm5, %v8142_v46 }
 0x8fd   :  { %6450 = vmatmul.f32.vlgmr.msrb.gmra.mxu0 %v8333_v7 }
 0x8fe   :  { %6500 = vmatpush.msrb.mxu2 %v9312_v24  ;;  %8062 = vmatpush.msk.msra.mxu3 %vm8199_vm6, %v8142_v46 }
 0x8ff   :  { %6475 = vmatmul.f32.vlgmr.msrb.gmra.mxu1 %v8340_v8  ;;  %6658 = vmatpush.msrb.mxu0 %v8243_v36 }
 0x900   :  { %8063 = vmatpush.msk.msrb.mxu1 %vm8184_vm5, %v8142_v46 }
 0x901   :  { %6662 = vmatpush.msrb.mxu0 %v8248_v38 }
 0x902   :  { %8064 = vmatpush.msk.msrb.mxu1 %vm8199_vm6, %v8142_v46 }
 0x903   :  { %6393 = vmatmul.f32.vlgmr.msra.gmra.mxu2 %v8363_v11  ;;  %8058 = vmatmul.msk.f32.vlgmr.msrb.gmra.mxu3 %vm53_vm0, %v8164_v15 }
 0x904   :  { %6606 = vmatpush.msra.mxu2 %v8224_v34  ;;  %6739 = vmatpush.msrb.mxu3 %v8300_v50 }
 0x906   :  { %6609 = vmatpush.msra.mxu2 %v8229_v35  ;;  %6745 = vmatpush.msrb.mxu3 %v8305_v52 }
 0x90b   :  { %8057 = vmatmul.msk.f32.vlgmr.msrb.gmra.mxu2 %vm53_vm0, %v8164_v15 }
 0x90c   :  { %8066 = vmatpush.msk.msrb.mxu2 %vm8170_vm4, %v8142_v46 }
 0x90e   :  { %8067 = vmatpush.msk.msrb.mxu2 %vm8166_vm3, %v8142_v46 }
 0x962   :  { %v6129_v54 = vpop.f32.mrf.mxu0 }
 0x964   :  { %v6154_v6 = vpop.f32.mrf.mxu1 }
 0x966   :  { %v6103_v59 = vpop.f32.mrf.mxu3 }
 0x96a   :  { %v6233_v53 = vpop.f32.mrf.mxu0 }
 0x96c   :  { %v6264_v2 = vpop.f32.mrf.mxu1 }
 0x96d   :  { %v6265_v40 = vadd.f32 %v6264_v2, %v6233_v53 }
 0x96e   :  { %v6072_v19 = vpop.f32.mrf.mxu2  ;;  %v6204_v26 = vpop.f32.mrf.mxu3 }
 0x96f   :  { %v6104_v28 = vadd.f32 %v6103_v59, %v6072_v19 }
 0x971   :  { %v6130_v24 = vadd.f32 %v6129_v54, %v6104_v28  ;;  %v9489_v54 = vand.u32 4294901760, %v9482_v48  ;;  %v9492_v28 = vand.u32 4294901760, %v9485_v9 }
 0x972   :  { %v6342_v41 = vpop.f32.mrf.mxu0 }
 0x973   :  { %v6155_v20 = vadd.f32 %v6154_v6, %v6130_v24  ;;  %v6901_v24 = vsub.f32 %v9482_v48, %v9489_v54 }
 0x974   :  { %v6365_v51 = vpop.f32.mrf.mxu1 }
 0x976   :  { %v6181_v30 = vpop.f32.mrf.mxu2  ;;  %v6315_v33 = vpop.f32.mrf.mxu3 }
 0x977   :  { %v6182_v57 = vadd.f32 %v6181_v30, %v6155_v20  ;;  %v6907_v20 = vsub.f32 %v9485_v9, %v9492_v28  ;;  %v9509_v30 = vand.u32 4294901760, %v6901_v24 }
 0x979   :  { %v6205_v29 = vadd.f32 %v6204_v26, %v6182_v57  ;;  %v9514_v2 = vand.u32 4294901760, %v6907_v20 }
 0x97a   :  { %v6451_v55 = vpop.f32.mrf.mxu0 }
 0x97b   :  { %8048 = vst.msk [vmem:[%s9683_s1 + $0xc0] sm:$0xff] %vm378_vm7, %v6205_v29 }
 0x97c   :  { %v6476_v27 = vpop.f32.mrf.mxu1 }
 0x97e   :  { %v6290_v62 = vpop.f32.mrf.mxu2  ;;  %v6425_v56 = vpop.f32.mrf.mxu3 }
 0x97f   :  { %v6291_v0 = vadd.f32 %v6290_v62, %v6265_v40 }
 0x981   :  { %v6316_v43 = vadd.f32 %v6315_v33, %v6291_v0 }
 0x983   :  { %v6343_v13 = vadd.f32 %v6342_v41, %v6316_v43 }
 0x985   :  { %v6366_v14 = vadd.f32 %v6365_v51, %v6343_v13 }
 0x986   :  { %v6394_v37 = vpop.f32.mrf.mxu2  ;;  %v6526_v3 = vpop.f32.mrf.mxu3 }
 0x987   :  { %8055 = vst.msk [vmem:[%s9683_s1 + $0xc8] sm:$0xff] %vm378_vm7, %v6366_v14  ;;  %v6426_v58 = vadd.f32 %v6425_v56, %v6394_v37 }
 0x989   :  { %v6452_v60 = vadd.f32 %v6451_v55, %v6426_v58 }
 0x98b   :  { %v6477_v63 = vadd.f32 %v6476_v27, %v6452_v60 }
 0x98e   :  { %v6503_v1 = vpop.f32.mrf.mxu2 }
 0x98f   :  { %v6504_v12 = vadd.f32 %v6503_v1, %v6477_v63 }
 0x991   :  { %v6527_v5 = vadd.f32 %v6526_v3, %v6504_v12 }
 0x993   :  { %v6530_v59 = vsel %vm53_vm0, %v6527_v5, 0 }
 0x994   :  { %v6550_v6 = vand.u32 4294901760, %v6530_v59 }
 0x996   :  { %v6551_v19 = vsub.f32 %v6530_v59, %v6550_v6  ;;  %6586 = vmatmul.f32.vlgmr.msra.gmra.mxu1 %v6550_v6 }
 0x997   :  { %8068 = vmatpush.msk.msra.mxu1 %vm8170_vm4, %v8142_v46 }
 0x998   :  { %v6552_v26 = vand.u32 4294901760, %v6551_v19  ;;  %6612 = vmatmul.f32.vlgmr.msra.gmra.mxu2 %v6551_v19 }
 0x999   :  { %6819 = vmatpush.msra.mxu2 %v8285_v47  ;;  %8069 = vmatpush.msk.msra.mxu1 %vm8166_vm3, %v8142_v46 }
 0x99a   :  { %v6553_v53 = vsub.f32 %v6551_v19, %v6552_v26  ;;  %6637 = vmatmul.f32.vlgmr.msra.gmra.mxu3 %v6552_v26 }
 0x99b   :  { %8070 = vmatpush.msk.msra.mxu3 %vm8170_vm4, %v8142_v46  ;;  %6823 = vmatpush.msra.mxu2 %v8297_v49 }
 0x99c   :  { %v6554_v57 = vand.u32 4294901760, %v6553_v53 }
 0x99d   :  { %8071 = vmatpush.msk.msra.mxu3 %vm8166_vm3, %v8142_v46 }
 0x99e   :  { %6555 = vmatmul.f32.vlgmr.msra.gmra.mxu0 %v6554_v57  ;;  %6687 = vmatmul.f32.vlgmr.msrb.gmra.mxu1 %v6550_v6 }
 0x99f   :  { %6767 = vmatpush.msra.mxu0 %v8261_v44  ;;  %6903 = vmatpush.msrb.mxu1 %v9509_v30 }
 0x9a0   :  { %6716 = vmatmul.f32.vlgmr.msrb.gmra.mxu2 %v6554_v57 }
 0x9a1   :  { %6770 = vmatpush.msra.mxu0 %v8264_v45  ;;  %6931 = vmatpush.msrb.mxu2 %v9482_v48 }
 0x9a2   :  { %6747 = vmatmul.f32.vlgmr.msrb.gmra.mxu3 %v6550_v6  ;;  %6909 = vmatpush.msrb.mxu1 %v9514_v2 }
 0x9a3   :  { %6956 = vmatpush.msrb.mxu3 %v9477_v22  ;;  %6934 = vmatpush.msrb.mxu2 %v9485_v9 }
 0x9a5   :  { %6958 = vmatpush.msrb.mxu3 %v9479_v4 }
 0x9a6   :  { %6664 = vmatmul.f32.vlgmr.msrb.gmra.mxu0 %v6550_v6  ;;  %6798 = vmatmul.f32.vlgmr.msra.gmra.mxu1 %v6552_v26 }
 0x9a7   :  { %6872 = vmatpush.msrb.mxu0 %v9477_v22  ;;  %7008 = vmatpush.msra.mxu1 %v9477_v22 }
 0x9a8   :  { %6825 = vmatmul.f32.vlgmr.msra.gmra.mxu2 %v6550_v6 }
 0x9a9   :  { %6874 = vmatpush.msrb.mxu0 %v9479_v4  ;;  %7010 = vmatpush.msra.mxu1 %v9479_v4 }
 0x9aa   :  { %6848 = vmatmul.f32.vlgmr.msra.gmra.mxu3 %v6550_v6  ;;  %8076 = vmatpush.msk.msra.mxu2 %vm8184_vm5, %v8142_v46 }
 0x9ab   :  { %7065 = vmatpush.msra.mxu3 %v8250_v39 }
 0x9ac   :  { %8077 = vmatpush.msk.msra.mxu2 %vm8199_vm6, %v8142_v46 }
 0x9ad   :  { %7071 = vmatpush.msra.mxu3 %v8257_v42 }
 0x9ae   :  { %6773 = vmatmul.f32.vlgmr.msra.gmra.mxu0 %v6551_v19  ;;  %8073 = vmatmul.msk.f32.vlgmr.msrb.gmra.mxu1 %vm53_vm0, %v8156_v10 }
 0x9af   :  { %6983 = vmatpush.msra.mxu0 %v9489_v54  ;;  %8078 = vmatpush.msk.msrb.mxu1 %vm8184_vm5, %v8142_v46 }
 0x9b0   :  { %6937 = vmatmul.f32.vlgmr.msrb.gmra.mxu2 %v8174_v18 }
 0x9b1   :  { %6987 = vmatpush.msra.mxu0 %v9492_v28  ;;  %8079 = vmatpush.msk.msrb.mxu1 %vm8199_vm6, %v8142_v46 }
 0x9b2   :  { %6962 = vmatmul.f32.vlgmr.msrb.gmra.mxu3 %v8194_v23  ;;  %7145 = vmatpush.msrb.mxu2 %v8243_v36 }
 0x9b3   :  { %8080 = vmatpush.msk.msrb.mxu3 %vm8184_vm5, %v8142_v46 }
 0x9b4   :  { %7149 = vmatpush.msrb.mxu2 %v8248_v38 }
 0x9b5   :  { %8081 = vmatpush.msk.msrb.mxu3 %vm8199_vm6, %v8142_v46 }
 0x9b6   :  { %6880 = vmatmul.f32.vlgmr.msrb.gmra.mxu0 %v8220_v32  ;;  %8075 = vmatmul.msk.f32.vlgmr.msra.gmra.mxu1 %vm53_vm0, %v8156_v10 }
 0x9b7   :  { %7093 = vmatpush.msrb.mxu0 %v8224_v34  ;;  %7226 = vmatpush.msra.mxu1 %v8300_v50 }
 0x9b9   :  { %7096 = vmatpush.msrb.mxu0 %v8229_v35  ;;  %7232 = vmatpush.msra.mxu1 %v8305_v52 }
 0x9be   :  { %8074 = vmatmul.msk.f32.vlgmr.msra.gmra.mxu0 %vm53_vm0, %v8156_v10 }
 0x9bf   :  { %8083 = vmatpush.msk.msra.mxu0 %vm8170_vm4, %v8142_v46 }
 0x9c1   :  { %8084 = vmatpush.msk.msra.mxu0 %vm8166_vm3, %v8142_v46 }
 0xa13   :  { %v6587_v18 = vpop.f32.mrf.mxu1 }
 0xa1b   :  { %v6556_v23 = vpop.f32.mrf.mxu0  ;;  %v6613_v32 = vpop.f32.mrf.mxu2 }
 0xa1c   :  { %v6588_v29 = vadd.f32 %v6587_v18, %v6556_v23  ;;  %v6688_v41 = vpop.f32.mrf.mxu1 }
 0xa1d   :  { %v6638_v33 = vpop.f32.mrf.mxu3 }
 0xa1e   :  { %v6614_v40 = vadd.f32 %v6613_v32, %v6588_v29 }
 0xa20   :  { %v6639_v62 = vadd.f32 %v6638_v33, %v6614_v40 }
 0xa23   :  { %v6665_v0 = vpop.f32.mrf.mxu0  ;;  %v6717_v43 = vpop.f32.mrf.mxu2 }
 0xa24   :  { %v6666_v51 = vadd.f32 %v6665_v0, %v6639_v62  ;;  %v6799_v56 = vpop.f32.mrf.mxu1 }
 0xa25   :  { %v6748_v10 = vpop.f32.mrf.mxu3 }
 0xa26   :  { %v6689_v13 = vadd.f32 %v6688_v41, %v6666_v51  ;;  %v6749_v14 = vadd.f32 %v6748_v10, %v6717_v43 }
 0xa28   :  { %8065 = vst.msk [vmem:[%s9683_s1 + $0xd0] sm:$0xff] %vm378_vm7, %v6689_v13 }
 0xa2b   :  { %v6774_v37 = vpop.f32.mrf.mxu0  ;;  %v6826_v55 = vpop.f32.mrf.mxu2 }
 0xa2c   :  { %v6775_v58 = vadd.f32 %v6774_v37, %v6749_v14  ;;  %v6912_v31 = vpop.f32.mrf.mxu1 }
 0xa2d   :  { %v6849_v61 = vpop.f32.mrf.mxu3 }
 0xa2e   :  { %v6800_v60 = vadd.f32 %v6799_v56, %v6775_v58 }
 0xa30   :  { %v6827_v27 = vadd.f32 %v6826_v55, %v6800_v60 }
 0xa32   :  { %v6850_v63 = vadd.f32 %v6849_v61, %v6827_v27 }
 0xa33   :  { %v6881_v1 = vpop.f32.mrf.mxu0  ;;  %v6938_v3 = vpop.f32.mrf.mxu2 }
 0xa34   :  { %8072 = vst.msk [vmem:[%s9683_s1 + $0xd8] sm:$0xff] %vm378_vm7, %v6850_v63  ;;  %v6913_v12 = vadd.f32 %v6912_v31, %v6881_v1  ;;  %v7013_v24 = vpop.f32.mrf.mxu1 }
 0xa35   :  { %v6963_v59 = vpop.f32.mrf.mxu3 }
 0xa36   :  { %v6939_v5 = vadd.f32 %v6938_v3, %v6913_v12 }
 0xa38   :  { %v6964_v6 = vadd.f32 %v6963_v59, %v6939_v5 }
 0xa3b   :  { %v6990_v19 = vpop.f32.mrf.mxu0 }
 0xa3c   :  { %v6991_v26 = vadd.f32 %v6990_v19, %v6964_v6 }
 0xa3e   :  { %v7014_v53 = vadd.f32 %v7013_v24, %v6991_v26 }
 0xa40   :  { %v7017_v20 = vsel %vm53_vm0, %v7014_v53, 0 }
 0xa41   :  { %v7037_v57 = vand.u32 4294901760, %v7017_v20 }
 0xa43   :  { %v7038_v18 = vsub.f32 %v7017_v20, %v7037_v57  ;;  %7073 = vmatmul.f32.vlgmr.msra.gmra.mxu3 %v7037_v57 }
 0xa44   :  { %8085 = vmatpush.msk.msra.mxu3 %vm8170_vm4, %v8142_v46 }
 0xa45   :  { %v7039_v23 = vand.u32 4294901760, %v7038_v18  ;;  %7099 = vmatmul.f32.vlgmr.msrb.gmra.mxu0 %v7038_v18 }
 0xa46   :  { %8086 = vmatpush.msk.msra.mxu3 %vm8166_vm3, %v8142_v46  ;;  %7306 = vmatpush.msrb.mxu0 %v8285_v47 }
 0xa47   :  { %v7040_v32 = vsub.f32 %v7038_v18, %v7039_v23  ;;  %7124 = vmatmul.f32.vlgmr.msrb.gmra.mxu1 %v7039_v23 }
 0xa48   :  { %7310 = vmatpush.msrb.mxu0 %v8297_v49  ;;  %8087 = vmatpush.msk.msrb.mxu1 %vm8170_vm4, %v8142_v46 }
 0xa49   :  { %v7041_v29 = vand.u32 4294901760, %v7040_v32 }
 0xa4a   :  { %8088 = vmatpush.msk.msrb.mxu1 %vm8166_vm3, %v8142_v46 }
 0xa4b   :  { %7042 = vmatmul.f32.vlgmr.msra.gmra.mxu2 %v7041_v29  ;;  %7174 = vmatmul.f32.vlgmr.msrb.gmra.mxu3 %v7037_v57 }
 0xa4c   :  { %7254 = vmatpush.msra.mxu2 %v8261_v44  ;;  %7387 = vmatpush.msrb.mxu3 %v9509_v30 }
 0xa4d   :  { %7203 = vmatmul.f32.vlgmr.msra.gmra.mxu0 %v7041_v29 }
 0xa4e   :  { %7257 = vmatpush.msra.mxu2 %v8264_v45  ;;  %7393 = vmatpush.msrb.mxu3 %v9514_v2 }
 0xa4f   :  { %7234 = vmatmul.f32.vlgmr.msra.gmra.mxu1 %v7037_v57  ;;  %7415 = vmatpush.msra.mxu0 %v9482_v48 }
 0xa50   :  { %7440 = vmatpush.msra.mxu1 %v9477_v22 }
 0xa51   :  { %7418 = vmatpush.msra.mxu0 %v9485_v9 }
 0xa52   :  { %7442 = vmatpush.msra.mxu1 %v9479_v4 }
 0xa53   :  { %7151 = vmatmul.f32.vlgmr.msrb.gmra.mxu2 %v7037_v57  ;;  %7285 = vmatmul.f32.vlgmr.msra.gmra.mxu3 %v7039_v23 }
 0xa54   :  { %7356 = vmatpush.msrb.mxu2 %v9477_v22  ;;  %7492 = vmatpush.msra.mxu3 %v9477_v22 }
 0xa55   :  { %7312 = vmatmul.f32.vlgmr.msrb.gmra.mxu0 %v7037_v57 }
 0xa56   :  { %7358 = vmatpush.msrb.mxu2 %v9479_v4  ;;  %7494 = vmatpush.msra.mxu3 %v9479_v4 }
 0xa57   :  { %7335 = vmatmul.f32.vlgmr.msrb.gmra.mxu1 %v7037_v57  ;;  %8093 = vmatpush.msk.msrb.mxu0 %vm8184_vm5, %v8142_v46 }
 0xa58   :  { %7549 = vmatpush.msrb.mxu1 %v8250_v39 }
 0xa59   :  { %8094 = vmatpush.msk.msrb.mxu0 %vm8199_vm6, %v8142_v46 }
 0xa5a   :  { %7555 = vmatpush.msrb.mxu1 %v8257_v42 }
 0xa5b   :  { %7260 = vmatmul.f32.vlgmr.msra.gmra.mxu2 %v7038_v18  ;;  %8090 = vmatmul.msk.f32.vlgmr.msrb.gmra.mxu3 %vm53_vm0, %v8164_v15 }
 0xa5c   :  { %7467 = vmatpush.msra.mxu2 %v9489_v54  ;;  %8095 = vmatpush.msk.msrb.mxu3 %vm8184_vm5, %v8142_v46 }
 0xa5d   :  { %7421 = vmatmul.f32.vlgmr.msra.gmra.mxu0 %v8333_v7 }
 0xa5e   :  { %7471 = vmatpush.msra.mxu2 %v9492_v28  ;;  %8096 = vmatpush.msk.msrb.mxu3 %vm8199_vm6, %v8142_v46 }
 0xa5f   :  { %7446 = vmatmul.f32.vlgmr.msra.gmra.mxu1 %v8340_v8  ;;  %7629 = vmatpush.msra.mxu0 %v8243_v36 }
 0xa60   :  { %8097 = vmatpush.msk.msra.mxu1 %vm8184_vm5, %v8142_v46 }
 0xa61   :  { %7633 = vmatpush.msra.mxu0 %v8248_v38 }
 0xa62   :  { %8098 = vmatpush.msk.msra.mxu1 %vm8199_vm6, %v8142_v46 }
 0xa63   :  { %7364 = vmatmul.f32.vlgmr.msrb.gmra.mxu2 %v8363_v11  ;;  %8092 = vmatmul.msk.f32.vlgmr.msra.gmra.mxu3 %vm53_vm0, %v8164_v15 }
 0xa64   :  { %7577 = vmatpush.msrb.mxu2 %v8224_v34  ;;  %7710 = vmatpush.msra.mxu3 %v8300_v50 }
 0xa66   :  { %7580 = vmatpush.msrb.mxu2 %v8229_v35  ;;  %7716 = vmatpush.msra.mxu3 %v8305_v52 }
 0xa6b   :  { %8091 = vmatmul.msk.f32.vlgmr.msra.gmra.mxu2 %vm53_vm0, %v8164_v15 }
 0xa6c   :  { %8100 = vmatpush.msk.msra.mxu2 %vm8170_vm4, %v8142_v46 }
 0xa6e   :  { %8101 = vmatpush.msk.msra.mxu2 %vm8166_vm3, %v8142_v46 }
 0xac2   :  { %v7100_v25 = vpop.f32.mrf.mxu0 }
 0xac4   :  { %v7125_v34 = vpop.f32.mrf.mxu1 }
 0xac6   :  { %v7074_v21 = vpop.f32.mrf.mxu3 }
 0xaca   :  { %v7204_v42 = vpop.f32.mrf.mxu0 }
 0xacc   :  { %v7235_v15 = vpop.f32.mrf.mxu1 }
 0xacd   :  { %v7236_v22 = vadd.f32 %v7235_v15, %v7204_v42 }
 0xace   :  { %v7043_v36 = vpop.f32.mrf.mxu2  ;;  %v7175_v35 = vpop.f32.mrf.mxu3 }
 0xacf   :  { %v7075_v38 = vadd.f32 %v7074_v21, %v7043_v36 }
 0xad1   :  { %v7101_v39 = vadd.f32 %v7100_v25, %v7075_v38 }
 0xad2   :  { %v7313_v4 = vpop.f32.mrf.mxu0 }
 0xad3   :  { %v7126_v50 = vadd.f32 %v7125_v34, %v7101_v39 }
 0xad4   :  { %v7336_v28 = vpop.f32.mrf.mxu1 }
 0xad6   :  { %v7152_v52 = vpop.f32.mrf.mxu2  ;;  %v7286_v11 = vpop.f32.mrf.mxu3 }
 0xad7   :  { %v7153_v7 = vadd.f32 %v7152_v52, %v7126_v50 }
 0xad9   :  { %v7176_v8 = vadd.f32 %v7175_v35, %v7153_v7 }
 0xada   :  { %v7422_v41 = vpop.f32.mrf.mxu0 }
 0xadb   :  { %8082 = vst.msk [vmem:[%s9683_s1 + $0xe0] sm:$0xff] %vm378_vm7, %v7176_v8 }
 0xadc   :  { %v7447_v43 = vpop.f32.mrf.mxu1 }
 0xade   :  { %v7261_v48 = vpop.f32.mrf.mxu2  ;;  %v7396_v2 = vpop.f32.mrf.mxu3 }
 0xadf   :  { %v7262_v9 = vadd.f32 %v7261_v48, %v7236_v22 }
 0xae1   :  { %v7287_v54 = vadd.f32 %v7286_v11, %v7262_v9 }
 0xae3   :  { %v7314_v30 = vadd.f32 %v7313_v4, %v7287_v54 }
 0xae5   :  { %v7337_v33 = vadd.f32 %v7336_v28, %v7314_v30 }
 0xae6   :  { %v7365_v40 = vpop.f32.mrf.mxu2  ;;  %v7497_v13 = vpop.f32.mrf.mxu3 }
 0xae7   :  { %8089 = vst.msk [vmem:[%s9683_s1 + $0xe8] sm:$0xff] %vm378_vm7, %v7337_v33  ;;  %v7397_v62 = vadd.f32 %v7396_v2, %v7365_v40 }
 0xae9   :  { %v7423_v0 = vadd.f32 %v7422_v41, %v7397_v62 }
 0xaeb   :  { %v7448_v51 = vadd.f32 %v7447_v43, %v7423_v0 }
 0xaee   :  { %v7474_v10 = vpop.f32.mrf.mxu2 }
 0xaef   :  { %v7475_v56 = vadd.f32 %v7474_v10, %v7448_v51 }
 0xaf1   :  { %v7498_v14 = vadd.f32 %v7497_v13, %v7475_v56 }
 0xaf3   :  { %v7501_v37 = vsel %vm53_vm0, %v7498_v14, 0 }
 0xaf4   :  { %v7521_v55 = vand.u32 4294901760, %v7501_v37 }
 0xaf6   :  { %v7522_v58 = vsub.f32 %v7501_v37, %v7521_v55  ;;  %7557 = vmatmul.f32.vlgmr.msrb.gmra.mxu1 %v7521_v55 }
 0xaf7   :  { %8102 = vmatpush.msk.msrb.mxu1 %vm8170_vm4, %v8142_v46 }
 0xaf8   :  { %v7523_v60 = vand.u32 4294901760, %v7522_v58  ;;  %7583 = vmatmul.f32.vlgmr.msrb.gmra.mxu2 %v7522_v58 }
 0xaf9   :  { %7790 = vmatpush.msrb.mxu2 %v8285_v47  ;;  %8103 = vmatpush.msk.msrb.mxu1 %vm8166_vm3, %v8142_v46 }
 0xafa   :  { %v7524_v61 = vsub.f32 %v7522_v58, %v7523_v60  ;;  %7608 = vmatmul.f32.vlgmr.msrb.gmra.mxu3 %v7523_v60 }
 0xafb   :  { %8104 = vmatpush.msk.msrb.mxu3 %vm8170_vm4, %v8142_v46  ;;  %7794 = vmatpush.msrb.mxu2 %v8297_v49 }
 0xafc   :  { %v7525_v27 = vand.u32 4294901760, %v7524_v61 }
 0xafd   :  { %8105 = vmatpush.msk.msrb.mxu3 %vm8166_vm3, %v8142_v46 }
 0xafe   :  { %7526 = vmatmul.f32.vlgmr.msrb.gmra.mxu0 %v7525_v27  ;;  %7658 = vmatmul.f32.vlgmr.msra.gmra.mxu1 %v7521_v55 }
 0xaff   :  { %7738 = vmatpush.msrb.mxu0 %v8261_v44 }
 0xb00   :  { %7687 = vmatmul.f32.vlgmr.msra.gmra.mxu2 %v7525_v27 }
 0xb01   :  { %7741 = vmatpush.msrb.mxu0 %v8264_v45 }
 0xb02   :  { %7718 = vmatmul.f32.vlgmr.msra.gmra.mxu3 %v7521_v55 }
 0xb06   :  { %7635 = vmatmul.f32.vlgmr.msra.gmra.mxu0 %v7521_v55  ;;  %7769 = vmatmul.f32.vlgmr.msrb.gmra.mxu1 %v7523_v60 }
 0xb08   :  { %7796 = vmatmul.f32.vlgmr.msrb.gmra.mxu2 %v7521_v55 }
 0xb0a   :  { %7819 = vmatmul.f32.vlgmr.msrb.gmra.mxu3 %v7521_v55 }
 0xb0e   :  { %7744 = vmatmul.f32.vlgmr.msrb.gmra.mxu0 %v7522_v58 }
 0xb73   :  { %v7558_v17 = vpop.f32.mrf.mxu1 }
 0xb7b   :  { %v7527_v47 = vpop.f32.mrf.mxu0  ;;  %v7584_v49 = vpop.f32.mrf.mxu2 }
 0xb7c   :  { %v7559_v31 = vadd.f32 %v7558_v17, %v7527_v47  ;;  %v7659_v1 = vpop.f32.mrf.mxu1 }
 0xb7d   :  { %v7609_v63 = vpop.f32.mrf.mxu3 }
 0xb7e   :  { %v7585_v16 = vadd.f32 %v7584_v49, %v7559_v31 }
 0xb80   :  { %v7610_v46 = vadd.f32 %v7609_v63, %v7585_v16 }
 0xb83   :  { %v7636_v3 = vpop.f32.mrf.mxu0  ;;  %v7688_v44 = vpop.f32.mrf.mxu2 }
 0xb84   :  { %v7637_v12 = vadd.f32 %v7636_v3, %v7610_v46  ;;  %v7770_v24 = vpop.f32.mrf.mxu1 }
 0xb85   :  { %v7719_v59 = vpop.f32.mrf.mxu3 }
 0xb86   :  { %v7660_v5 = vadd.f32 %v7659_v1, %v7637_v12  ;;  %v7720_v45 = vadd.f32 %v7719_v59, %v7688_v44 }
 0xb88   :  { %8099 = vst.msk [vmem:[%s9683_s1 + $0xf0] sm:$0xff] %vm378_vm7, %v7660_v5 }
 0xb8b   :  { %v7745_v6 = vpop.f32.mrf.mxu0  ;;  %v7797_v53 = vpop.f32.mrf.mxu2 }
 0xb8c   :  { %v7746_v19 = vadd.f32 %v7745_v6, %v7720_v45 }
 0xb8d   :  { %v7820_v57 = vpop.f32.mrf.mxu3 }
 0xb8e   :  { %v7771_v26 = vadd.f32 %v7770_v24, %v7746_v19 }
 0xb90   :  { %v7798_v20 = vadd.f32 %v7797_v53, %v7771_v26 }
 0xb92   :  { %v7821_v18 = vadd.f32 %v7820_v57, %v7798_v20 }
 0xb94   :  { %8106 = vst.msk [vmem:[%s9683_s1 + $0xf8] sm:$0xff] %vm378_vm7, %v7821_v18 }
 0xb95   :  { %7829 = vsyncpa [#allocation3], 1 }

</bundles_post_ra>
